<compile_context>
chip_gen: v6e
topology: v6e:2x2x1
jax: 0.10.0
libtpu: 0.0.40
codegen_flags: <defaults>
</compile_context>

<pallas_src>
import numpy as np
import jax
import jax.numpy as jnp
from jax.experimental import pallas as pl
from jax.experimental.pallas import tpu as pltpu


# ----------------------------------------------------------------------------
# Fused Pallas kernel: one grid step == one batch element, everything in VMEM.
# ----------------------------------------------------------------------------
def _lenet_kernel(
    x_ref,                      # (1, 28, 28)  input image (rows=h, lanes=w)
    c1_ref,                     # (720, 28)    banded conv1 weights, rows=(kj, c, oi)
    b1_ref,                     # (144, 1)     conv1 bias per (c, oi) row
    p1e_ref, p1o_ref,           # (72, 144)    pool1 row selectors (even/odd rows)
    q1e_ref, q1o_ref,           # (24, 12)     pool1 col selectors (even/odd cols)
    c2_ref,                     # (640, 72)    banded conv2 weights, rows=(kj, c, oi), cols=(ci, h)
    b2_ref,                     # (128, 1)
    p2e_ref, p2o_ref,           # (64, 128)
    q2e_ref, q2o_ref,           # (8, 4)
    w1t_ref,                    # (4, 120, 64) fc1 weights regrouped per pooled column w
    bf1_ref,                    # (120, 1)
    fc2_ref,                    # (84, 120)
    bf2_ref,                    # (84, 1)
    outw_ref,                   # (10, 84)
    bout_ref,                   # (10, 1)
    o_ref,                      # (1, 10, 1)   log-probs (column) for this batch element
):
    f32 = jnp.float32
    xb = x_ref[0]                                           # (28, 28)

    # ---- conv1: one banded MXU matmul per horizontal tap kj --------------
    # acc1[c*24+oi, oj] = conv1(x)[c, oi, oj]   (width stays on lanes)
    acc1 = b1_ref[...]                                      # (144, 1), broadcasts over lanes
    for kj in range(5):
        blk = c1_ref[kj * 144:(kj + 1) * 144, :]            # (144, 28)
        acc1 = acc1 + jnp.dot(blk, xb[:, kj:kj + 24],
                              preferred_element_type=f32)   # (144, 24)

    # ---- pool1: 2x2/stride-2 max pool via exact 0/1 selection matmuls ----
    rmax = jnp.maximum(
        jnp.dot(p1e_ref[...], acc1, preferred_element_type=f32),
        jnp.dot(p1o_ref[...], acc1, preferred_element_type=f32))   # (72, 24)
    a1 = jnp.maximum(
        jnp.dot(rmax, q1e_ref[...], preferred_element_type=f32),
        jnp.dot(rmax, q1o_ref[...], preferred_element_type=f32))   # (72, 12)
    # a1[c*12 + h, w] = pool1 output at (channel c, row h, col w)

    # ---- conv2 ------------------------------------------------------------
    acc2 = b2_ref[...]                                      # (128, 1)
    for kj in range(5):
        blk = c2_ref[kj * 128:(kj + 1) * 128, :]            # (128, 72)
        acc2 = acc2 + jnp.dot(blk, a1[:, kj:kj + 8],
                              preferred_element_type=f32)   # (128, 8)

    # ---- pool2 ------------------------------------------------------------
    rmax2 = jnp.maximum(
        jnp.dot(p2e_ref[...], acc2, preferred_element_type=f32),
        jnp.dot(p2o_ref[...], acc2, preferred_element_type=f32))   # (64, 8)
    a2 = jnp.maximum(
        jnp.dot(rmax2, q2e_ref[...], preferred_element_type=f32),
        jnp.dot(rmax2, q2o_ref[...], preferred_element_type=f32))  # (64, 4)
    # a2[c*4 + h, w] = pool2 output at (channel c, row h, col w)

    # ---- MLP head (column-vector activations; flatten never materializes) -
    h1 = bf1_ref[...]                                       # (120, 1)
    for w in range(4):                                      # sum over pooled columns
        h1 = h1 + jnp.dot(w1t_ref[w], a2[:, w:w + 1],
                          preferred_element_type=f32)       # (120, 1)
    h1 = jnp.maximum(h1, 0.0)

    h2 = jnp.maximum(
        jnp.dot(fc2_ref[...], h1, preferred_element_type=f32) + bf2_ref[...], 0.0)  # (84, 1)
    logits = jnp.dot(outw_ref[...], h2, preferred_element_type=f32) + bout_ref[...]  # (10, 1)

    # ---- log_softmax over the 10 classes (rows); 10 elements -> unroll the
    # reduction with static slices to keep the lowering trivially simple.
    m = logits[0:1, :]
    for i in range(1, 10):
        m = jnp.maximum(m, logits[i:i + 1, :])
    z = jnp.exp(logits - m)
    s = z[0:1, :]
    for i in range(1, 10):
        s = s + z[i:i + 1, :]
    o_ref[0] = logits - (m + jnp.log(s))                    # (10, 1)


# ----------------------------------------------------------------------------
# One-time, parameter-only preprocessing (wrapper side).
# ----------------------------------------------------------------------------
def _conv_band_matrix(w, H):
    """w: (Cout, Cin, KH, KW) -> banded matrix (KW*Cout*Ho, Cin*H).

    Row (kj, o, oi), column (ci, h) holds w[o, ci, h-oi, kj] (0 outside the
    band).  Then  conv(x)[o, oi, oj] = sum_kj (M_kj @ x[:, oj+kj])  with the
    width dimension staying on the lane axis of the matmul.
    """
    Cout, Cin, KH, KW = w.shape
    Ho = H - KH + 1
    ki = jnp.arange(H)[None, :] - jnp.arange(Ho)[:, None]           # (Ho, H)
    valid = ((ki >= 0) & (ki < KH)).astype(w.dtype)
    kic = jnp.clip(ki, 0, KH - 1)
    wt = jnp.transpose(w, (3, 0, 1, 2))                             # (KW, Cout, Cin, KH)
    c = wt[:, :, :, kic]                                            # (KW, Cout, Cin, Ho, H)
    c = c * valid[None, None, None, :, :]
    c = jnp.transpose(c, (0, 1, 3, 2, 4))                           # (KW, Cout, Ho, Cin, H)
    return c.reshape(KW * Cout * Ho, Cin * H)


def _pool_selectors(C, H, W):
    """Exact 0/1 selection matrices for a 2x2/stride-2 max pool applied to a
    (C*H, W) activation whose rows are ordered (channel, row)."""
    Hp, Wp = H // 2, W // 2
    rows = np.arange(C * Hp)
    ch, i = rows // Hp, rows % Hp
    pe = np.zeros((C * Hp, C * H), np.float32)
    po = np.zeros((C * Hp, C * H), np.float32)
    pe[rows, ch * H + 2 * i] = 1.0
    po[rows, ch * H + 2 * i + 1] = 1.0
    qe = np.zeros((W, Wp), np.float32)
    qo = np.zeros((W, Wp), np.float32)
    qe[2 * np.arange(Wp), np.arange(Wp)] = 1.0
    qo[2 * np.arange(Wp) + 1, np.arange(Wp)] = 1.0
    return pe, po, qe, qo


# ----------------------------------------------------------------------------
# Forward pass
# ----------------------------------------------------------------------------
def lenet_forward(params, x):
    """x: (B, 1, 28, 28) float32 -> log-probs (B, 10). One fused Pallas kernel."""
    B = x.shape[0]
    f32 = jnp.float32
    x3 = x[:, 0, :, :].astype(f32)                                  # (B, 28, 28)

    # --- parameter-only transforms (done once per param set) ---
    c1 = _conv_band_matrix(params["conv1_w"], 28)                   # (720, 28)
    b1 = jnp.repeat(params["conv1_b"], 24)[:, None]                 # (144, 1)
    c2 = _conv_band_matrix(params["conv2_w"], 12)                   # (640, 72)
    b2 = jnp.repeat(params["conv2_b"], 8)[:, None]                  # (128, 1)
    p1e, p1o, q1e, q1o = _pool_selectors(6, 24, 24)
    p2e, p2o, q2e, q2o = _pool_selectors(16, 8, 8)
    # fc1 weight regrouped per pooled column w: [w, out, c*4+h] == fc1_w[out, c*16+h*4+w]
    w1t = params["fc1_w"].reshape(120, 16, 4, 4).transpose(3, 0, 1, 2).reshape(4, 120, 64)
    bf1 = params["fc1_b"][:, None]                                  # (120, 1)
    fc2 = params["fc2_w"]                                           # (84, 120)
    bf2 = params["fc2_b"][:, None]                                  # (84, 1)
    outw = params["out_w"]                                          # (10, 84)
    bout = params["out_b"][:, None]                                 # (10, 1)

    def full(shape):                                                # whole-array block, fetched once
        n = len(shape)
        return pl.BlockSpec(shape, lambda b, _n=n: (0,) * _n)

    out = pl.pallas_call(
        _lenet_kernel,
        out_shape=jax.ShapeDtypeStruct((B, 10, 1), f32),
        grid=(B,),
        in_specs=[
            pl.BlockSpec((1, 28, 28), lambda b: (b, 0, 0)),
            full(c1.shape), full(b1.shape),
            full(p1e.shape), full(p1o.shape), full(q1e.shape), full(q1o.shape),
            full(c2.shape), full(b2.shape),
            full(p2e.shape), full(p2o.shape), full(q2e.shape), full(q2o.shape),
            full(w1t.shape), full(bf1.shape),
            full(fc2.shape), full(bf2.shape),
            full(outw.shape), full(bout.shape),
        ],
        out_specs=pl.BlockSpec((1, 10, 1), lambda b: (b, 0, 0)),
        compiler_params=pltpu.CompilerParams(
            dimension_semantics=("parallel",)),
    )(x3, c1, b1, p1e, p1o, q1e, q1o, c2, b2, p2e, p2o, q2e, q2o,
      w1t, bf1, fc2, bf2, outw, bout)

    return out[:, :, 0]                                             # (B, 10)


# ----------------------------------------------------------------------------
# Parameters (deterministic, PyTorch-default-style uniform init)
# ----------------------------------------------------------------------------
def init_params(key):
    def uinit(key, shape, fan_in):
        bound = 1.0 / (fan_in ** 0.5)
        return jax.random.uniform(key, shape, jnp.float32, -bound, bound)

    keys = jax.random.split(key, 10)
    return {
        "conv1_w": uinit(keys[0], (6, 1, 5, 5), 1 * 5 * 5),
        "conv1_b": uinit(keys[1], (6,), 1 * 5 * 5),
        "conv2_w": uinit(keys[2], (16, 6, 5, 5), 6 * 5 * 5),
        "conv2_b": uinit(keys[3], (16,), 6 * 5 * 5),
        "fc1_w": uinit(keys[4], (120, 256), 256),
        "fc1_b": uinit(keys[5], (120,), 256),
        "fc2_w": uinit(keys[6], (84, 120), 120),
        "fc2_b": uinit(keys[7], (84,), 120),
        "out_w": uinit(keys[8], (10, 84), 84),
        "out_b": uinit(keys[9], (10,), 84),
    }


# ----------------------------------------------------------------------------
# Plain-JAX reference (matches the PyTorch module) for a correctness check.
# ----------------------------------------------------------------------------
def lenet_reference(params, x):
    def conv(x, w, b):
        y = jax.lax.conv_general_dilated(
            x, w, window_strides=(1, 1), padding="VALID",
            dimension_numbers=("NCHW", "OIHW", "NCHW"))
        return y + b[None, :, None, None]

    def pool(x):
        B, C, H, W = x.shape
        return x.reshape(B, C, H // 2, 2, W // 2, 2).max(axis=(3, 5))

    x = pool(conv(x, params["conv1_w"], params["conv1_b"]))
    x = pool(conv(x, params["conv2_w"], params["conv2_b"]))
    x = x.reshape(x.shape[0], -1)
    x = jnp.maximum(x @ params["fc1_w"].T + params["fc1_b"], 0.0)
    x = jnp.maximum(x @ params["fc2_w"].T + params["fc2_b"], 0.0)
    x = x @ params["out_w"].T + params["out_b"]
    return jax.nn.log_softmax(x, axis=-1)


if __name__ == "__main__":
    key = jax.random.PRNGKey(0)
    pkey, xkey = jax.random.split(key)
    params = init_params(pkey)

    # MNIST-shaped input: fc1 expects 16*4*4 = 256 features -> spatial must be 28x28.
    x = jax.random.normal(xkey, (2, 1, 28, 28), dtype=jnp.float32)

    fwd = jax.jit(lenet_forward)
    y = jax.block_until_ready(fwd(params, x))

    # sanity: shape, log-softmax rows exponentiate-sum to 1, matches reference
    assert y.shape == (2, 10)
    row_sums = jnp.exp(y).sum(axis=-1)
    assert bool(jnp.all(jnp.abs(row_sums - 1.0) < 1e-4))
    y_ref = lenet_reference(params, x)
    assert bool(jnp.allclose(y, y_ref, atol=1e-3, rtol=1e-3)), \
        float(jnp.max(jnp.abs(y - y_ref)))

    print("KERNEL_OK")
</pallas_src>

<mosaic_0001>
module attributes {stable_mosaic.version = 11 : i64} {
  func.func @_lenet_kernel(%arg0: i32, %arg1: memref<1x28x28xf32, #tpu.memory_space<vmem>>, %arg2: memref<720x28xf32, #tpu.memory_space<vmem>>, %arg3: memref<144x1xf32, #tpu.memory_space<vmem>>, %arg4: memref<72x144xf32, #tpu.memory_space<vmem>>, %arg5: memref<72x144xf32, #tpu.memory_space<vmem>>, %arg6: memref<24x12xf32, #tpu.memory_space<vmem>>, %arg7: memref<24x12xf32, #tpu.memory_space<vmem>>, %arg8: memref<640x72xf32, #tpu.memory_space<vmem>>, %arg9: memref<128x1xf32, #tpu.memory_space<vmem>>, %arg10: memref<64x128xf32, #tpu.memory_space<vmem>>, %arg11: memref<64x128xf32, #tpu.memory_space<vmem>>, %arg12: memref<8x4xf32, #tpu.memory_space<vmem>>, %arg13: memref<8x4xf32, #tpu.memory_space<vmem>>, %arg14: memref<4x120x64xf32, #tpu.memory_space<vmem>>, %arg15: memref<120x1xf32, #tpu.memory_space<vmem>>, %arg16: memref<84x120xf32, #tpu.memory_space<vmem>>, %arg17: memref<84x1xf32, #tpu.memory_space<vmem>>, %arg18: memref<10x84xf32, #tpu.memory_space<vmem>>, %arg19: memref<10x1xf32, #tpu.memory_space<vmem>>, %arg20: memref<1x10x1xf32, #tpu.memory_space<vmem>>) attributes {dimension_semantics = [#tpu.dimension_semantics<parallel>], iteration_bounds = array<i64: 2>, scalar_prefetch = 0 : i64, scratch_operands = 0 : i64, tpu.core_type = #tpu.core_type<tc>, window_params = [{transform_indices = @transform_0, window_bounds = array<i64: 1, 28, 28>}, {pipeline_mode = #tpu.pipeline_mode<synchronous>, transform_indices = @transform_1, window_bounds = array<i64: 720, 28>}, {pipeline_mode = #tpu.pipeline_mode<synchronous>, transform_indices = @transform_2, window_bounds = array<i64: 144, 1>}, {pipeline_mode = #tpu.pipeline_mode<synchronous>, transform_indices = @transform_3, window_bounds = array<i64: 72, 144>}, {pipeline_mode = #tpu.pipeline_mode<synchronous>, transform_indices = @transform_4, window_bounds = array<i64: 72, 144>}, {pipeline_mode = #tpu.pipeline_mode<synchronous>, transform_indices = @transform_5, window_bounds = array<i64: 24, 12>}, {pipeline_mode = #tpu.pipeline_mode<synchronous>, transform_indices = @transform_6, window_bounds = array<i64: 24, 12>}, {pipeline_mode = #tpu.pipeline_mode<synchronous>, transform_indices = @transform_7, window_bounds = array<i64: 640, 72>}, {pipeline_mode = #tpu.pipeline_mode<synchronous>, transform_indices = @transform_8, window_bounds = array<i64: 128, 1>}, {pipeline_mode = #tpu.pipeline_mode<synchronous>, transform_indices = @transform_9, window_bounds = array<i64: 64, 128>}, {pipeline_mode = #tpu.pipeline_mode<synchronous>, transform_indices = @transform_10, window_bounds = array<i64: 64, 128>}, {pipeline_mode = #tpu.pipeline_mode<synchronous>, transform_indices = @transform_11, window_bounds = array<i64: 8, 4>}, {pipeline_mode = #tpu.pipeline_mode<synchronous>, transform_indices = @transform_12, window_bounds = array<i64: 8, 4>}, {pipeline_mode = #tpu.pipeline_mode<synchronous>, transform_indices = @transform_13, window_bounds = array<i64: 4, 120, 64>}, {pipeline_mode = #tpu.pipeline_mode<synchronous>, transform_indices = @transform_14, window_bounds = array<i64: 120, 1>}, {pipeline_mode = #tpu.pipeline_mode<synchronous>, transform_indices = @transform_15, window_bounds = array<i64: 84, 120>}, {pipeline_mode = #tpu.pipeline_mode<synchronous>, transform_indices = @transform_16, window_bounds = array<i64: 84, 1>}, {pipeline_mode = #tpu.pipeline_mode<synchronous>, transform_indices = @transform_17, window_bounds = array<i64: 10, 84>}, {pipeline_mode = #tpu.pipeline_mode<synchronous>, transform_indices = @transform_18, window_bounds = array<i64: 10, 1>}, {transform_indices = @transform_19, window_bounds = array<i64: 1, 10, 1>}]} {
    %c0 = arith.constant 0 : index
    %c0_0 = arith.constant 0 : index
    %c0_1 = arith.constant 0 : index
    %0 = vector.load %arg1[%c0, %c0_0, %c0_1] : memref<1x28x28xf32, #tpu.memory_space<vmem>>, vector<1x28x28xf32>
    %1 = vector.shape_cast %0 : vector<1x28x28xf32> to vector<28x28xf32>
    %c0_2 = arith.constant 0 : index
    %c0_3 = arith.constant 0 : index
    %2 = vector.load %arg3[%c0_2, %c0_3] : memref<144x1xf32, #tpu.memory_space<vmem>>, vector<144x1xf32>
    %c0_4 = arith.constant 0 : index
    %c0_5 = arith.constant 0 : index
    %3 = vector.load %arg2[%c0_4, %c0_5] : memref<720x28xf32, #tpu.memory_space<vmem>>, vector<144x28xf32>
    %4 = vector.extract_strided_slice %1 {offsets = [0, 0], sizes = [28, 24], strides = [1, 1]} : vector<28x28xf32> to vector<28x24xf32>
    %cst = arith.constant dense<0.000000e+00> : vector<144x24xf32>
    %5 = tpu.matmul %3, %4, %cst {dimension_numbers = #tpu.dot_dimension_numbers<[1], [0], [0], [1], [0, 0, 1, 1], [], []>} : vector<144x28xf32>, vector<28x24xf32>, vector<144x24xf32> -> vector<144x24xf32>
    %6 = vector.broadcast %2 : vector<144x1xf32> to vector<144x24xf32>
    %7 = arith.addf %6, %5 : vector<144x24xf32>
    %c144 = arith.constant 144 : index
    %c0_6 = arith.constant 0 : index
    %8 = vector.load %arg2[%c144, %c0_6] : memref<720x28xf32, #tpu.memory_space<vmem>>, vector<144x28xf32>
    %9 = vector.extract_strided_slice %1 {offsets = [0, 1], sizes = [28, 24], strides = [1, 1]} : vector<28x28xf32> to vector<28x24xf32>
    %cst_7 = arith.constant dense<0.000000e+00> : vector<144x24xf32>
    %10 = tpu.matmul %8, %9, %cst_7 {dimension_numbers = #tpu.dot_dimension_numbers<[1], [0], [0], [1], [0, 0, 1, 1], [], []>} : vector<144x28xf32>, vector<28x24xf32>, vector<144x24xf32> -> vector<144x24xf32>
    %11 = arith.addf %7, %10 : vector<144x24xf32>
    %c288 = arith.constant 288 : index
    %c0_8 = arith.constant 0 : index
    %12 = vector.load %arg2[%c288, %c0_8] : memref<720x28xf32, #tpu.memory_space<vmem>>, vector<144x28xf32>
    %13 = vector.extract_strided_slice %1 {offsets = [0, 2], sizes = [28, 24], strides = [1, 1]} : vector<28x28xf32> to vector<28x24xf32>
    %cst_9 = arith.constant dense<0.000000e+00> : vector<144x24xf32>
    %14 = tpu.matmul %12, %13, %cst_9 {dimension_numbers = #tpu.dot_dimension_numbers<[1], [0], [0], [1], [0, 0, 1, 1], [], []>} : vector<144x28xf32>, vector<28x24xf32>, vector<144x24xf32> -> vector<144x24xf32>
    %15 = arith.addf %11, %14 : vector<144x24xf32>
    %c432 = arith.constant 432 : index
    %c0_10 = arith.constant 0 : index
    %16 = vector.load %arg2[%c432, %c0_10] : memref<720x28xf32, #tpu.memory_space<vmem>>, vector<144x28xf32>
    %17 = vector.extract_strided_slice %1 {offsets = [0, 3], sizes = [28, 24], strides = [1, 1]} : vector<28x28xf32> to vector<28x24xf32>
    %cst_11 = arith.constant dense<0.000000e+00> : vector<144x24xf32>
    %18 = tpu.matmul %16, %17, %cst_11 {dimension_numbers = #tpu.dot_dimension_numbers<[1], [0], [0], [1], [0, 0, 1, 1], [], []>} : vector<144x28xf32>, vector<28x24xf32>, vector<144x24xf32> -> vector<144x24xf32>
    %19 = arith.addf %15, %18 : vector<144x24xf32>
    %c576 = arith.constant 576 : index
    %c0_12 = arith.constant 0 : index
    %20 = vector.load %arg2[%c576, %c0_12] : memref<720x28xf32, #tpu.memory_space<vmem>>, vector<144x28xf32>
    %21 = vector.extract_strided_slice %1 {offsets = [0, 4], sizes = [28, 24], strides = [1, 1]} : vector<28x28xf32> to vector<28x24xf32>
    %cst_13 = arith.constant dense<0.000000e+00> : vector<144x24xf32>
    %22 = tpu.matmul %20, %21, %cst_13 {dimension_numbers = #tpu.dot_dimension_numbers<[1], [0], [0], [1], [0, 0, 1, 1], [], []>} : vector<144x28xf32>, vector<28x24xf32>, vector<144x24xf32> -> vector<144x24xf32>
    %23 = arith.addf %19, %22 : vector<144x24xf32>
    %c0_14 = arith.constant 0 : index
    %c0_15 = arith.constant 0 : index
    %24 = vector.load %arg4[%c0_14, %c0_15] : memref<72x144xf32, #tpu.memory_space<vmem>>, vector<72x144xf32>
    %cst_16 = arith.constant dense<0.000000e+00> : vector<72x24xf32>
    %25 = tpu.matmul %24, %23, %cst_16 {dimension_numbers = #tpu.dot_dimension_numbers<[1], [0], [0], [1], [0, 0, 1, 1], [], []>} : vector<72x144xf32>, vector<144x24xf32>, vector<72x24xf32> -> vector<72x24xf32>
    %c0_17 = arith.constant 0 : index
    %c0_18 = arith.constant 0 : index
    %26 = vector.load %arg5[%c0_17, %c0_18] : memref<72x144xf32, #tpu.memory_space<vmem>>, vector<72x144xf32>
    %cst_19 = arith.constant dense<0.000000e+00> : vector<72x24xf32>
    %27 = tpu.matmul %26, %23, %cst_19 {dimension_numbers = #tpu.dot_dimension_numbers<[1], [0], [0], [1], [0, 0, 1, 1], [], []>} : vector<72x144xf32>, vector<144x24xf32>, vector<72x24xf32> -> vector<72x24xf32>
    %28 = arith.maximumf %25, %27 : vector<72x24xf32>
    %c0_20 = arith.constant 0 : index
    %c0_21 = arith.constant 0 : index
    %29 = vector.load %arg6[%c0_20, %c0_21] : memref<24x12xf32, #tpu.memory_space<vmem>>, vector<24x12xf32>
    %cst_22 = arith.constant dense<0.000000e+00> : vector<72x12xf32>
    %30 = tpu.matmul %28, %29, %cst_22 {dimension_numbers = #tpu.dot_dimension_numbers<[1], [0], [0], [1], [0, 0, 1, 1], [], []>} : vector<72x24xf32>, vector<24x12xf32>, vector<72x12xf32> -> vector<72x12xf32>
    %c0_23 = arith.constant 0 : index
    %c0_24 = arith.constant 0 : index
    %31 = vector.load %arg7[%c0_23, %c0_24] : memref<24x12xf32, #tpu.memory_space<vmem>>, vector<24x12xf32>
    %cst_25 = arith.constant dense<0.000000e+00> : vector<72x12xf32>
    %32 = tpu.matmul %28, %31, %cst_25 {dimension_numbers = #tpu.dot_dimension_numbers<[1], [0], [0], [1], [0, 0, 1, 1], [], []>} : vector<72x24xf32>, vector<24x12xf32>, vector<72x12xf32> -> vector<72x12xf32>
    %33 = arith.maximumf %30, %32 : vector<72x12xf32>
    %c0_26 = arith.constant 0 : index
    %c0_27 = arith.constant 0 : index
    %34 = vector.load %arg9[%c0_26, %c0_27] : memref<128x1xf32, #tpu.memory_space<vmem>>, vector<128x1xf32>
    %c0_28 = arith.constant 0 : index
    %c0_29 = arith.constant 0 : index
    %35 = vector.load %arg8[%c0_28, %c0_29] : memref<640x72xf32, #tpu.memory_space<vmem>>, vector<128x72xf32>
    %36 = vector.extract_strided_slice %33 {offsets = [0, 0], sizes = [72, 8], strides = [1, 1]} : vector<72x12xf32> to vector<72x8xf32>
    %cst_30 = arith.constant dense<0.000000e+00> : vector<128x8xf32>
    %37 = tpu.matmul %35, %36, %cst_30 {dimension_numbers = #tpu.dot_dimension_numbers<[1], [0], [0], [1], [0, 0, 1, 1], [], []>} : vector<128x72xf32>, vector<72x8xf32>, vector<128x8xf32> -> vector<128x8xf32>
    %38 = vector.broadcast %34 : vector<128x1xf32> to vector<128x8xf32>
    %39 = arith.addf %38, %37 : vector<128x8xf32>
    %c128 = arith.constant 128 : index
    %c0_31 = arith.constant 0 : index
    %40 = vector.load %arg8[%c128, %c0_31] : memref<640x72xf32, #tpu.memory_space<vmem>>, vector<128x72xf32>
    %41 = vector.extract_strided_slice %33 {offsets = [0, 1], sizes = [72, 8], strides = [1, 1]} : vector<72x12xf32> to vector<72x8xf32>
    %cst_32 = arith.constant dense<0.000000e+00> : vector<128x8xf32>
    %42 = tpu.matmul %40, %41, %cst_32 {dimension_numbers = #tpu.dot_dimension_numbers<[1], [0], [0], [1], [0, 0, 1, 1], [], []>} : vector<128x72xf32>, vector<72x8xf32>, vector<128x8xf32> -> vector<128x8xf32>
    %43 = arith.addf %39, %42 : vector<128x8xf32>
    %c256 = arith.constant 256 : index
    %c0_33 = arith.constant 0 : index
    %44 = vector.load %arg8[%c256, %c0_33] : memref<640x72xf32, #tpu.memory_space<vmem>>, vector<128x72xf32>
    %45 = vector.extract_strided_slice %33 {offsets = [0, 2], sizes = [72, 8], strides = [1, 1]} : vector<72x12xf32> to vector<72x8xf32>
    %cst_34 = arith.constant dense<0.000000e+00> : vector<128x8xf32>
    %46 = tpu.matmul %44, %45, %cst_34 {dimension_numbers = #tpu.dot_dimension_numbers<[1], [0], [0], [1], [0, 0, 1, 1], [], []>} : vector<128x72xf32>, vector<72x8xf32>, vector<128x8xf32> -> vector<128x8xf32>
    %47 = arith.addf %43, %46 : vector<128x8xf32>
    %c384 = arith.constant 384 : index
    %c0_35 = arith.constant 0 : index
    %48 = vector.load %arg8[%c384, %c0_35] : memref<640x72xf32, #tpu.memory_space<vmem>>, vector<128x72xf32>
    %49 = vector.extract_strided_slice %33 {offsets = [0, 3], sizes = [72, 8], strides = [1, 1]} : vector<72x12xf32> to vector<72x8xf32>
    %cst_36 = arith.constant dense<0.000000e+00> : vector<128x8xf32>
    %50 = tpu.matmul %48, %49, %cst_36 {dimension_numbers = #tpu.dot_dimension_numbers<[1], [0], [0], [1], [0, 0, 1, 1], [], []>} : vector<128x72xf32>, vector<72x8xf32>, vector<128x8xf32> -> vector<128x8xf32>
    %51 = arith.addf %47, %50 : vector<128x8xf32>
    %c512 = arith.constant 512 : index
    %c0_37 = arith.constant 0 : index
    %52 = vector.load %arg8[%c512, %c0_37] : memref<640x72xf32, #tpu.memory_space<vmem>>, vector<128x72xf32>
    %53 = vector.extract_strided_slice %33 {offsets = [0, 4], sizes = [72, 8], strides = [1, 1]} : vector<72x12xf32> to vector<72x8xf32>
    %cst_38 = arith.constant dense<0.000000e+00> : vector<128x8xf32>
    %54 = tpu.matmul %52, %53, %cst_38 {dimension_numbers = #tpu.dot_dimension_numbers<[1], [0], [0], [1], [0, 0, 1, 1], [], []>} : vector<128x72xf32>, vector<72x8xf32>, vector<128x8xf32> -> vector<128x8xf32>
    %55 = arith.addf %51, %54 : vector<128x8xf32>
    %c0_39 = arith.constant 0 : index
    %c0_40 = arith.constant 0 : index
    %56 = vector.load %arg10[%c0_39, %c0_40] : memref<64x128xf32, #tpu.memory_space<vmem>>, vector<64x128xf32>
    %cst_41 = arith.constant dense<0.000000e+00> : vector<64x8xf32>
    %57 = tpu.matmul %56, %55, %cst_41 {dimension_numbers = #tpu.dot_dimension_numbers<[1], [0], [0], [1], [0, 0, 1, 1], [], []>} : vector<64x128xf32>, vector<128x8xf32>, vector<64x8xf32> -> vector<64x8xf32>
    %c0_42 = arith.constant 0 : index
    %c0_43 = arith.constant 0 : index
    %58 = vector.load %arg11[%c0_42, %c0_43] : memref<64x128xf32, #tpu.memory_space<vmem>>, vector<64x128xf32>
    %cst_44 = arith.constant dense<0.000000e+00> : vector<64x8xf32>
    %59 = tpu.matmul %58, %55, %cst_44 {dimension_numbers = #tpu.dot_dimension_numbers<[1], [0], [0], [1], [0, 0, 1, 1], [], []>} : vector<64x128xf32>, vector<128x8xf32>, vector<64x8xf32> -> vector<64x8xf32>
    %60 = arith.maximumf %57, %59 : vector<64x8xf32>
    %c0_45 = arith.constant 0 : index
    %c0_46 = arith.constant 0 : index
    %61 = vector.load %arg12[%c0_45, %c0_46] : memref<8x4xf32, #tpu.memory_space<vmem>>, vector<8x4xf32>
    %cst_47 = arith.constant dense<0.000000e+00> : vector<64x4xf32>
    %62 = tpu.matmul %60, %61, %cst_47 {dimension_numbers = #tpu.dot_dimension_numbers<[1], [0], [0], [1], [0, 0, 1, 1], [], []>} : vector<64x8xf32>, vector<8x4xf32>, vector<64x4xf32> -> vector<64x4xf32>
    %c0_48 = arith.constant 0 : index
    %c0_49 = arith.constant 0 : index
    %63 = vector.load %arg13[%c0_48, %c0_49] : memref<8x4xf32, #tpu.memory_space<vmem>>, vector<8x4xf32>
    %cst_50 = arith.constant dense<0.000000e+00> : vector<64x4xf32>
    %64 = tpu.matmul %60, %63, %cst_50 {dimension_numbers = #tpu.dot_dimension_numbers<[1], [0], [0], [1], [0, 0, 1, 1], [], []>} : vector<64x8xf32>, vector<8x4xf32>, vector<64x4xf32> -> vector<64x4xf32>
    %65 = arith.maximumf %62, %64 : vector<64x4xf32>
    %c0_51 = arith.constant 0 : index
    %c0_52 = arith.constant 0 : index
    %66 = vector.load %arg15[%c0_51, %c0_52] : memref<120x1xf32, #tpu.memory_space<vmem>>, vector<120x1xf32>
    %c0_53 = arith.constant 0 : index
    %c0_54 = arith.constant 0 : index
    %c0_55 = arith.constant 0 : index
    %67 = vector.load %arg14[%c0_53, %c0_54, %c0_55] : memref<4x120x64xf32, #tpu.memory_space<vmem>>, vector<1x120x64xf32>
    %68 = vector.shape_cast %67 : vector<1x120x64xf32> to vector<120x64xf32>
    %69 = vector.extract_strided_slice %65 {offsets = [0, 0], sizes = [64, 1], strides = [1, 1]} : vector<64x4xf32> to vector<64x1xf32>
    %cst_56 = arith.constant dense<0.000000e+00> : vector<120x1xf32>
    %70 = tpu.matmul %68, %69, %cst_56 {dimension_numbers = #tpu.dot_dimension_numbers<[1], [0], [0], [1], [0, 0, 1, 1], [], []>} : vector<120x64xf32>, vector<64x1xf32>, vector<120x1xf32> -> vector<120x1xf32>
    %71 = arith.addf %66, %70 : vector<120x1xf32>
    %c1 = arith.constant 1 : index
    %c0_57 = arith.constant 0 : index
    %c0_58 = arith.constant 0 : index
    %72 = vector.load %arg14[%c1, %c0_57, %c0_58] : memref<4x120x64xf32, #tpu.memory_space<vmem>>, vector<1x120x64xf32>
    %73 = vector.shape_cast %72 : vector<1x120x64xf32> to vector<120x64xf32>
    %74 = vector.extract_strided_slice %65 {offsets = [0, 1], sizes = [64, 1], strides = [1, 1]} : vector<64x4xf32> to vector<64x1xf32>
    %cst_59 = arith.constant dense<0.000000e+00> : vector<120x1xf32>
    %75 = tpu.matmul %73, %74, %cst_59 {dimension_numbers = #tpu.dot_dimension_numbers<[1], [0], [0], [1], [0, 0, 1, 1], [], []>} : vector<120x64xf32>, vector<64x1xf32>, vector<120x1xf32> -> vector<120x1xf32>
    %76 = arith.addf %71, %75 : vector<120x1xf32>
    %c2 = arith.constant 2 : index
    %c0_60 = arith.constant 0 : index
    %c0_61 = arith.constant 0 : index
    %77 = vector.load %arg14[%c2, %c0_60, %c0_61] : memref<4x120x64xf32, #tpu.memory_space<vmem>>, vector<1x120x64xf32>
    %78 = vector.shape_cast %77 : vector<1x120x64xf32> to vector<120x64xf32>
    %79 = vector.extract_strided_slice %65 {offsets = [0, 2], sizes = [64, 1], strides = [1, 1]} : vector<64x4xf32> to vector<64x1xf32>
    %cst_62 = arith.constant dense<0.000000e+00> : vector<120x1xf32>
    %80 = tpu.matmul %78, %79, %cst_62 {dimension_numbers = #tpu.dot_dimension_numbers<[1], [0], [0], [1], [0, 0, 1, 1], [], []>} : vector<120x64xf32>, vector<64x1xf32>, vector<120x1xf32> -> vector<120x1xf32>
    %81 = arith.addf %76, %80 : vector<120x1xf32>
    %c3 = arith.constant 3 : index
    %c0_63 = arith.constant 0 : index
    %c0_64 = arith.constant 0 : index
    %82 = vector.load %arg14[%c3, %c0_63, %c0_64] : memref<4x120x64xf32, #tpu.memory_space<vmem>>, vector<1x120x64xf32>
    %83 = vector.shape_cast %82 : vector<1x120x64xf32> to vector<120x64xf32>
    %84 = vector.extract_strided_slice %65 {offsets = [0, 3], sizes = [64, 1], strides = [1, 1]} : vector<64x4xf32> to vector<64x1xf32>
    %cst_65 = arith.constant dense<0.000000e+00> : vector<120x1xf32>
    %85 = tpu.matmul %83, %84, %cst_65 {dimension_numbers = #tpu.dot_dimension_numbers<[1], [0], [0], [1], [0, 0, 1, 1], [], []>} : vector<120x64xf32>, vector<64x1xf32>, vector<120x1xf32> -> vector<120x1xf32>
    %86 = arith.addf %81, %85 : vector<120x1xf32>
    %cst_66 = arith.constant 0.000000e+00 : f32
    %87 = vector.broadcast %cst_66 : f32 to vector<120x1xf32>
    %88 = arith.maximumf %86, %87 : vector<120x1xf32>
    %c0_67 = arith.constant 0 : index
    %c0_68 = arith.constant 0 : index
    %89 = vector.load %arg16[%c0_67, %c0_68] : memref<84x120xf32, #tpu.memory_space<vmem>>, vector<84x120xf32>
    %cst_69 = arith.constant dense<0.000000e+00> : vector<84x1xf32>
    %90 = tpu.matmul %89, %88, %cst_69 {dimension_numbers = #tpu.dot_dimension_numbers<[1], [0], [0], [1], [0, 0, 1, 1], [], []>} : vector<84x120xf32>, vector<120x1xf32>, vector<84x1xf32> -> vector<84x1xf32>
    %c0_70 = arith.constant 0 : index
    %c0_71 = arith.constant 0 : index
    %91 = vector.load %arg17[%c0_70, %c0_71] : memref<84x1xf32, #tpu.memory_space<vmem>>, vector<84x1xf32>
    %92 = arith.addf %90, %91 : vector<84x1xf32>
    %cst_72 = arith.constant 0.000000e+00 : f32
    %93 = vector.broadcast %cst_72 : f32 to vector<84x1xf32>
    %94 = arith.maximumf %92, %93 : vector<84x1xf32>
    %c0_73 = arith.constant 0 : index
    %c0_74 = arith.constant 0 : index
    %95 = vector.load %arg18[%c0_73, %c0_74] : memref<10x84xf32, #tpu.memory_space<vmem>>, vector<10x84xf32>
    %cst_75 = arith.constant dense<0.000000e+00> : vector<10x1xf32>
    %96 = tpu.matmul %95, %94, %cst_75 {dimension_numbers = #tpu.dot_dimension_numbers<[1], [0], [0], [1], [0, 0, 1, 1], [], []>} : vector<10x84xf32>, vector<84x1xf32>, vector<10x1xf32> -> vector<10x1xf32>
    %c0_76 = arith.constant 0 : index
    %c0_77 = arith.constant 0 : index
    %97 = vector.load %arg19[%c0_76, %c0_77] : memref<10x1xf32, #tpu.memory_space<vmem>>, vector<10x1xf32>
    %98 = arith.addf %96, %97 : vector<10x1xf32>
    %99 = vector.extract_strided_slice %98 {offsets = [0, 0], sizes = [1, 1], strides = [1, 1]} : vector<10x1xf32> to vector<1x1xf32>
    %100 = vector.extract_strided_slice %98 {offsets = [1, 0], sizes = [1, 1], strides = [1, 1]} : vector<10x1xf32> to vector<1x1xf32>
    %101 = arith.maximumf %99, %100 : vector<1x1xf32>
    %102 = vector.extract_strided_slice %98 {offsets = [2, 0], sizes = [1, 1], strides = [1, 1]} : vector<10x1xf32> to vector<1x1xf32>
    %103 = arith.maximumf %101, %102 : vector<1x1xf32>
    %104 = vector.extract_strided_slice %98 {offsets = [3, 0], sizes = [1, 1], strides = [1, 1]} : vector<10x1xf32> to vector<1x1xf32>
    %105 = arith.maximumf %103, %104 : vector<1x1xf32>
    %106 = vector.extract_strided_slice %98 {offsets = [4, 0], sizes = [1, 1], strides = [1, 1]} : vector<10x1xf32> to vector<1x1xf32>
    %107 = arith.maximumf %105, %106 : vector<1x1xf32>
    %108 = vector.extract_strided_slice %98 {offsets = [5, 0], sizes = [1, 1], strides = [1, 1]} : vector<10x1xf32> to vector<1x1xf32>
    %109 = arith.maximumf %107, %108 : vector<1x1xf32>
    %110 = vector.extract_strided_slice %98 {offsets = [6, 0], sizes = [1, 1], strides = [1, 1]} : vector<10x1xf32> to vector<1x1xf32>
    %111 = arith.maximumf %109, %110 : vector<1x1xf32>
    %112 = vector.extract_strided_slice %98 {offsets = [7, 0], sizes = [1, 1], strides = [1, 1]} : vector<10x1xf32> to vector<1x1xf32>
    %113 = arith.maximumf %111, %112 : vector<1x1xf32>
    %114 = vector.extract_strided_slice %98 {offsets = [8, 0], sizes = [1, 1], strides = [1, 1]} : vector<10x1xf32> to vector<1x1xf32>
    %115 = arith.maximumf %113, %114 : vector<1x1xf32>
    %116 = vector.extract_strided_slice %98 {offsets = [9, 0], sizes = [1, 1], strides = [1, 1]} : vector<10x1xf32> to vector<1x1xf32>
    %117 = arith.maximumf %115, %116 : vector<1x1xf32>
    %118 = vector.broadcast %117 : vector<1x1xf32> to vector<10x1xf32>
    %119 = arith.subf %98, %118 : vector<10x1xf32>
    %120 = math.exp %119 : vector<10x1xf32>
    %121 = vector.extract_strided_slice %120 {offsets = [0, 0], sizes = [1, 1], strides = [1, 1]} : vector<10x1xf32> to vector<1x1xf32>
    %122 = vector.extract_strided_slice %120 {offsets = [1, 0], sizes = [1, 1], strides = [1, 1]} : vector<10x1xf32> to vector<1x1xf32>
    %123 = arith.addf %121, %122 : vector<1x1xf32>
    %124 = vector.extract_strided_slice %120 {offsets = [2, 0], sizes = [1, 1], strides = [1, 1]} : vector<10x1xf32> to vector<1x1xf32>
    %125 = arith.addf %123, %124 : vector<1x1xf32>
    %126 = vector.extract_strided_slice %120 {offsets = [3, 0], sizes = [1, 1], strides = [1, 1]} : vector<10x1xf32> to vector<1x1xf32>
    %127 = arith.addf %125, %126 : vector<1x1xf32>
    %128 = vector.extract_strided_slice %120 {offsets = [4, 0], sizes = [1, 1], strides = [1, 1]} : vector<10x1xf32> to vector<1x1xf32>
    %129 = arith.addf %127, %128 : vector<1x1xf32>
    %130 = vector.extract_strided_slice %120 {offsets = [5, 0], sizes = [1, 1], strides = [1, 1]} : vector<10x1xf32> to vector<1x1xf32>
    %131 = arith.addf %129, %130 : vector<1x1xf32>
    %132 = vector.extract_strided_slice %120 {offsets = [6, 0], sizes = [1, 1], strides = [1, 1]} : vector<10x1xf32> to vector<1x1xf32>
    %133 = arith.addf %131, %132 : vector<1x1xf32>
    %134 = vector.extract_strided_slice %120 {offsets = [7, 0], sizes = [1, 1], strides = [1, 1]} : vector<10x1xf32> to vector<1x1xf32>
    %135 = arith.addf %133, %134 : vector<1x1xf32>
    %136 = vector.extract_strided_slice %120 {offsets = [8, 0], sizes = [1, 1], strides = [1, 1]} : vector<10x1xf32> to vector<1x1xf32>
    %137 = arith.addf %135, %136 : vector<1x1xf32>
    %138 = vector.extract_strided_slice %120 {offsets = [9, 0], sizes = [1, 1], strides = [1, 1]} : vector<10x1xf32> to vector<1x1xf32>
    %139 = arith.addf %137, %138 : vector<1x1xf32>
    %140 = math.log %139 : vector<1x1xf32>
    %141 = arith.addf %117, %140 : vector<1x1xf32>
    %142 = vector.broadcast %141 : vector<1x1xf32> to vector<10x1xf32>
    %143 = arith.subf %98, %142 : vector<10x1xf32>
    %c0_78 = arith.constant 0 : index
    %c0_79 = arith.constant 0 : index
    %c0_80 = arith.constant 0 : index
    %144 = vector.load %arg20[%c0_78, %c0_79, %c0_80] : memref<1x10x1xf32, #tpu.memory_space<vmem>>, vector<1x10x1xf32>
    %145 = vector.shape_cast %144 : vector<1x10x1xf32> to vector<10x1xf32>
    %146 = vector.shape_cast %143 : vector<10x1xf32> to vector<1x10x1xf32>
    tpu.vector_store %arg20[%c0_78, %c0_79, %c0_80], %146 {strides = array<i32>} : memref<1x10x1xf32, #tpu.memory_space<vmem>>, vector<1x10x1xf32>,
    return
  }
  func.func @transform_0(%arg0: i32) -> (i32, i32, i32) {
    %c0_i32 = arith.constant 0 : i32
    %c0_i32_0 = arith.constant 0 : i32
    %c0_i32_1 = arith.constant 0 : i32
    return %arg0, %c0_i32, %c0_i32_0 : i32, i32, i32
  }
  func.func @transform_1(%arg0: i32) -> (i32, i32) {
    %c0_i32 = arith.constant 0 : i32
    %c0_i32_0 = arith.constant 0 : i32
    %c0_i32_1 = arith.constant 0 : i32
    return %c0_i32, %c0_i32_0 : i32, i32
  }
  func.func @transform_2(%arg0: i32) -> (i32, i32) {
    %c0_i32 = arith.constant 0 : i32
    %c0_i32_0 = arith.constant 0 : i32
    %c0_i32_1 = arith.constant 0 : i32
    return %c0_i32, %c0_i32_0 : i32, i32
  }
  func.func @transform_3(%arg0: i32) -> (i32, i32) {
    %c0_i32 = arith.constant 0 : i32
    %c0_i32_0 = arith.constant 0 : i32
    %c0_i32_1 = arith.constant 0 : i32
    return %c0_i32, %c0_i32_0 : i32, i32
  }
  func.func @transform_4(%arg0: i32) -> (i32, i32) {
    %c0_i32 = arith.constant 0 : i32
    %c0_i32_0 = arith.constant 0 : i32
    %c0_i32_1 = arith.constant 0 : i32
    return %c0_i32, %c0_i32_0 : i32, i32
  }
  func.func @transform_5(%arg0: i32) -> (i32, i32) {
    %c0_i32 = arith.constant 0 : i32
    %c0_i32_0 = arith.constant 0 : i32
    %c0_i32_1 = arith.constant 0 : i32
    return %c0_i32, %c0_i32_0 : i32, i32
  }
  func.func @transform_6(%arg0: i32) -> (i32, i32) {
    %c0_i32 = arith.constant 0 : i32
    %c0_i32_0 = arith.constant 0 : i32
    %c0_i32_1 = arith.constant 0 : i32
    return %c0_i32, %c0_i32_0 : i32, i32
  }
  func.func @transform_7(%arg0: i32) -> (i32, i32) {
    %c0_i32 = arith.constant 0 : i32
    %c0_i32_0 = arith.constant 0 : i32
    %c0_i32_1 = arith.constant 0 : i32
    return %c0_i32, %c0_i32_0 : i32, i32
  }
  func.func @transform_8(%arg0: i32) -> (i32, i32) {
    %c0_i32 = arith.constant 0 : i32
    %c0_i32_0 = arith.constant 0 : i32
    %c0_i32_1 = arith.constant 0 : i32
    return %c0_i32, %c0_i32_0 : i32, i32
  }
  func.func @transform_9(%arg0: i32) -> (i32, i32) {
    %c0_i32 = arith.constant 0 : i32
    %c0_i32_0 = arith.constant 0 : i32
    %c0_i32_1 = arith.constant 0 : i32
    return %c0_i32, %c0_i32_0 : i32, i32
  }
  func.func @transform_10(%arg0: i32) -> (i32, i32) {
    %c0_i32 = arith.constant 0 : i32
    %c0_i32_0 = arith.constant 0 : i32
    %c0_i32_1 = arith.constant 0 : i32
    return %c0_i32, %c0_i32_0 : i32, i32
  }
  func.func @transform_11(%arg0: i32) -> (i32, i32) {
    %c0_i32 = arith.constant 0 : i32
    %c0_i32_0 = arith.constant 0 : i32
    %c0_i32_1 = arith.constant 0 : i32
    return %c0_i32, %c0_i32_0 : i32, i32
  }
  func.func @transform_12(%arg0: i32) -> (i32, i32) {
    %c0_i32 = arith.constant 0 : i32
    %c0_i32_0 = arith.constant 0 : i32
    %c0_i32_1 = arith.constant 0 : i32
    return %c0_i32, %c0_i32_0 : i32, i32
  }
  func.func @transform_13(%arg0: i32) -> (i32, i32, i32) {
    %c0_i32 = arith.constant 0 : i32
    %c0_i32_0 = arith.constant 0 : i32
    %c0_i32_1 = arith.constant 0 : i32
    %c0_i32_2 = arith.constant 0 : i32
    return %c0_i32, %c0_i32_0, %c0_i32_1 : i32, i32, i32
  }
  func.func @transform_14(%arg0: i32) -> (i32, i32) {
    %c0_i32 = arith.constant 0 : i32
    %c0_i32_0 = arith.constant 0 : i32
    %c0_i32_1 = arith.constant 0 : i32
    return %c0_i32, %c0_i32_0 : i32, i32
  }
  func.func @transform_15(%arg0: i32) -> (i32, i32) {
    %c0_i32 = arith.constant 0 : i32
    %c0_i32_0 = arith.constant 0 : i32
    %c0_i32_1 = arith.constant 0 : i32
    return %c0_i32, %c0_i32_0 : i32, i32
  }
  func.func @transform_16(%arg0: i32) -> (i32, i32) {
    %c0_i32 = arith.constant 0 : i32
    %c0_i32_0 = arith.constant 0 : i32
    %c0_i32_1 = arith.constant 0 : i32
    return %c0_i32, %c0_i32_0 : i32, i32
  }
  func.func @transform_17(%arg0: i32) -> (i32, i32) {
    %c0_i32 = arith.constant 0 : i32
    %c0_i32_0 = arith.constant 0 : i32
    %c0_i32_1 = arith.constant 0 : i32
    return %c0_i32, %c0_i32_0 : i32, i32
  }
  func.func @transform_18(%arg0: i32) -> (i32, i32) {
    %c0_i32 = arith.constant 0 : i32
    %c0_i32_0 = arith.constant 0 : i32
    %c0_i32_1 = arith.constant 0 : i32
    return %c0_i32, %c0_i32_0 : i32, i32
  }
  func.func @transform_19(%arg0: i32) -> (i32, i32, i32) {
    %c0_i32 = arith.constant 0 : i32
    %c0_i32_0 = arith.constant 0 : i32
    %c0_i32_1 = arith.constant 0 : i32
    return %arg0, %c0_i32, %c0_i32_0 : i32, i32, i32
  }
}

</mosaic_0001>

<bundles_post_ra>
// kernel: lenet_forward.1
= control target key start
LH: loop header
LB: loop body
LE: loop exit
PB: predicated region body
PF: predicated region fallthrough
CT: control target
= control target key end

     0   :  { %s9918_s0 = inlined_call_operand.vmem [shape: f32[2,28,28], index: 0, kind: input, shape index: {}]   ;;  %s9919_s1 = inlined_call_operand.vmem [shape: f32[720,28], index: 1, kind: input, shape index: {}]   ;;  %s9920_s2 = inlined_call_operand.vmem [shape: f32[144,1], index: 2, kind: input, shape index: {}]   ;;  %s9921_s3 = inlined_call_operand.vmem [shape: f32[72,144], index: 3, kind: input, shape index: {}]   ;;  %s9922_s4 = inlined_call_operand.vmem [shape: f32[72,144], index: 4, kind: input, shape index: {}]   ;;  %s9923_s5 = inlined_call_operand.vmem [shape: f32[24,12], index: 5, kind: input, shape index: {}]   ;;  %s9924_s6 = inlined_call_operand.vmem [shape: f32[24,12], index: 6, kind: input, shape index: {}]   ;;  %s9925_s7 = inlined_call_operand.vmem [shape: f32[640,72], index: 7, kind: input, shape index: {}]   ;;  %s9926_s8 = inlined_call_operand.vmem [shape: f32[128,1], index: 8, kind: input, shape index: {}]   ;;  %s9927_s9 = inlined_call_operand.vmem [shape: f32[64,128], index: 9, kind: input, shape index: {}]   ;;  %s9928_s10 = inlined_call_operand.vmem [shape: f32[64,128], index: 10, kind: input, shape index: {}]   ;;  %s9929_s11 = inlined_call_operand.vmem [shape: f32[8,4], index: 11, kind: input, shape index: {}]   ;;  %s9930_s12 = inlined_call_operand.vmem [shape: f32[8,4], index: 12, kind: input, shape index: {}]   ;;  %s9931_s13 = inlined_call_operand.vmem [shape: f32[4,120,64], index: 13, kind: input, shape index: {}]   ;;  %s9932_s14 = inlined_call_operand.vmem [shape: f32[120,1], index: 14, kind: input, shape index: {}]   ;;  %s9933_s15 = inlined_call_operand.vmem [shape: f32[84,120], index: 15, kind: input, shape index: {}]   ;;  %s9934_s16 = inlined_call_operand.vmem [shape: f32[84,1], index: 16, kind: input, shape index: {}]   ;;  %s9935_s17 = inlined_call_operand.vmem [shape: f32[10,84], index: 17, kind: input, shape index: {}]   ;;  %s9936_s18 = inlined_call_operand.vmem [shape: f32[10,1], index: 18, kind: input, shape index: {}]   ;;  %s9937_s19 = inlined_call_operand.vmem [shape: f32[2,10,1], index: 19, kind: output, shape index: {}]  }
   0x1   :  { %9953 = sst [smem:[#allocation32_spill]] %s9918_s0  ;;  %s7643_s0 = smov 0  }
   0x2   :  { %9954 = sst [smem:[#allocation33_spill]] %s9919_s1 }
   0x3   :  { %9955 = sst [smem:[#allocation34_spill]] %s9920_s2 }
   0x4   :  { %9956 = sst [smem:[#allocation35_spill]] %s9921_s3 }
   0x5   :  { %9957 = sst [smem:[#allocation36_spill]] %s9922_s4 }
   0x6   :  { %9958 = sst [smem:[#allocation37_spill]] %s9923_s5 }
   0x7 LB: > { %s5783_s30 = sadd.s32 4294967295, %s7534_s0   ;;  %p5787_p0 = scmp.ge.s32.totalorder %s7534_s0, 1  ;;  %s7534_s0 = sphi %s7643_s0, %s29_s0  }
   0x8   : > { %p537_p1 = scmp.lt.s32.totalorder %s7534_s0, 3 }
   0xa   : > { %p538_p2 = pnand %p5787_p0, %p537_p1 }
   0xc   : > { %541 = sbr.rel (%p538_p2) target bundleno = 2735 (0xaaf), region = 96 }
  0x11   : > { %p593_p3 = scmp.lt.s32.totalorder %s5783_s30, 1  ;;  %s9959_s1 = sld [smem:[#allocation33_spill]]  ;;  %vm643_vm0 = vcmask 228352   ;;  %vm698_vm1 = vcmask 1043456   ;;  %v7536_v3 = vmov 0   ;;  %vm2018_vm2 = vcmask 130048  }
  0x12   : > { %s9960_s24 = sld [smem:[#allocation32_spill]]  ;;  %7521 = vset.pattern.permute.xlu1 %v7536_v3  ;;  %7520 = vset.pattern.permute.xlu0 %v7536_v3  ;;  %s9949_s3 = smov 127   ;;  %vm7542_vm3 = vmmov 0   ;;  %vm2323_vm4 = vcmask 195584   ;;  %vm2615_vm5 = vcmask 588800   ;;  %vm4157_vm6 = vcmask 64512  }
  0x13   : > { %s10088_s30 = smov (!%p593_p3, %s5783_s30), 1  ;;  %s9945_s28 = smov 126   ;;  %vm4431_vm7 = vcmask 523264   ;;  %vm5397_vm8 = vcmask 982016   ;;  %vm5566_vm9 = vcmask 687104   ;;  %vm5724_vm10 = vcmask 7168  }
  0x14   : > { %s6140_s22 = sshll.u32 %s10088_s30, 5  ;;  %s9941_s26 = smov 125   ;;  %vm5726_vm11 = vcmask 1024  }
  0x15   : > { %s9961_s20 = sld [smem:[#allocation34_spill]]  ;;  %s10028_s29 = smov 125  }
  0x16   : > { %s9964_s21 = sld [smem:[#allocation35_spill]] }
  0x17   : > { %v625_v0 = vld [vmem:[%s9959_s1] sm:$0xff]  ;;  %v973_v6 = vld [vmem:[%s9959_s1 + $0xd0] sm:$0xff]  ;;  %v626_v7 = vld [vmem:[%s9959_s1 + $0x8] sm:$0xff]  ;;  %s9965_s4 = sld [smem:[#allocation36_spill]] }
  0x18   : > { %6606 = vmatprep.mubr.msk.f32.mxu0 %vm643_vm0, %v625_v0  ;;  %s597_s25 = scalar_lea.vmem %s9960_s24, %s6140_s22  ;;  %6653 = vmatprep.mubr.msk.f32.mxu1 %vm643_vm0, %v973_v6  ;;  %v627_v8 = vld [vmem:[%s9959_s1 + $0x10] sm:$0xff]  ;;  %v628_v9 = vld [vmem:[%s9959_s1 + $0x18] sm:$0xff]  ;;  %v629_v10 = vld [vmem:[%s9959_s1 + $0x20] sm:$0xff]  ;;  %s9943_s22 = smov 124  }
  0x19   : > { %v606_v1 = vld [vmem:[%s597_s25 + $0x18] sm:$0xf]  ;;  %v604_v2 = vld [vmem:[%s597_s25 + $0x8] sm:$0xff]  ;;  %v605_v4 = vld [vmem:[%s597_s25 + $0x10] sm:$0xff]  ;;  %s10025_s5 = sld [smem:[#allocation37_spill]] }
  0x1a   : > { %992 = vrot.lane.b32.xlu0 %v606_v1, %s9949_s3  ;;  %988 = vrot.lane.b32.xlu1 %v604_v2, %s9949_s3  ;;  %v603_v5 = vld [vmem:[%s597_s25] sm:$0xff]  ;;  %v630_v11 = vld [vmem:[%s9959_s1 + $0x28] sm:$0xff] }
  0x1b   : > { %6598 = vmatprep.subr.msk.mxu0 %vm698_vm1, %v606_v1  ;;  %v631_v12 = vld [vmem:[%s9959_s1 + $0x30] sm:$0xff]  ;;  %v632_v13 = vld [vmem:[%s9959_s1 + $0x38] sm:$0xff]  ;;  %v633_v14 = vld [vmem:[%s9959_s1 + $0x40] sm:$0xff] }
  0x1c   : > { %6599 = vmatpush3.msk.msra.mxu0 %vm698_vm1, %v606_v1  ;;  %v634_v15 = vld [vmem:[%s9959_s1 + $0x48] sm:$0xff]  ;;  %v635_v16 = vld [vmem:[%s9959_s1 + $0x50] sm:$0xff]  ;;  %v636_v17 = vld [vmem:[%s9959_s1 + $0x58] sm:$0xff] }
  0x1d   : > { %6600 = vmatprep.subr.mxu0 %v605_v4  ;;  %v637_v18 = vld [vmem:[%s9959_s1 + $0x60] sm:$0xff]  ;;  %v622_v19 = vld [vmem:[%s9961_s20 + $0x78] sm:$0xff]  ;;  %v621_v20 = vld [vmem:[%s9961_s20 + $0x70] sm:$0xff] }
  0x1e   : > { %990 = vrot.lane.b32.xlu0 %v605_v4, %s9949_s3  ;;  %986 = vrot.lane.b32.xlu1 %v603_v5, %s9949_s3  ;;  %v638_v21 = vld [vmem:[%s9959_s1 + $0x68] sm:$0xff]  ;;  %v639_v22 = vld [vmem:[%s9959_s1 + $0x70] sm:$0xff]  ;;  %s10026_s3 = smov 127  }
  0x1f   : > { %6601 = vmatpush3.msra.mxu0 %v605_v4  ;;  %v619_v23 = vld [vmem:[%s9961_s20 + $0x60] sm:$0xff]  ;;  %v620_v24 = vld [vmem:[%s9961_s20 + $0x68] sm:$0xff]  ;;  %v640_v25 = vld [vmem:[%s9959_s1 + $0x78] sm:$0xff] }
  0x20   : > { %6602 = vmatprep.subr.mxu0 %v604_v2  ;;  %v641_v26 = vld [vmem:[%s9959_s1 + $0x80] sm:$0xff]  ;;  %v617_v27 = vld [vmem:[%s9961_s20 + $0x50] sm:$0xff]  ;;  %v618_v28 = vld [vmem:[%s9961_s20 + $0x58] sm:$0xff] }
  0x21   : > { %6603 = vmatpush3.msra.mxu0 %v604_v2  ;;  %v642_v29 = vld [vmem:[%s9959_s1 + $0x88] sm:$0xff]  ;;  %v965_v30 = vld [vmem:[%s9959_s1 + $0x90] sm:$0xff]  ;;  %v615_v31 = vld [vmem:[%s9961_s20 + $0x40] sm:$0xff] }
  0x22   : > { %1248 = vrot.lane.b32.xlu1 %v605_v4, %s9945_s28  ;;  %1250 = vrot.lane.b32.xlu0 %v606_v1, %s9945_s28  ;;  %v616_v32 = vld [vmem:[%s9961_s20 + $0x48] sm:$0xff]  ;;  %v613_v33 = vld [vmem:[%s9961_s20 + $0x30] sm:$0xff] }
  0x23   : > { %6604 = vmatprep.subr.mxu0 %v603_v5  ;;  %v614_v34 = vld [vmem:[%s9961_s20 + $0x38] sm:$0xff]  ;;  %v611_v35 = vld [vmem:[%s9961_s20 + $0x20] sm:$0xff]  ;;  %v612_v36 = vld [vmem:[%s9961_s20 + $0x28] sm:$0xff] }
  0x24   : > { %6605 = vmatpush3.msra.mxu0 %v603_v5  ;;  %v609_v37 = vld [vmem:[%s9961_s20 + $0x10] sm:$0xff]  ;;  %v610_v38 = vld [vmem:[%s9961_s20 + $0x18] sm:$0xff]  ;;  %v607_v39 = vld [vmem:[%s9961_s20] sm:$0xff] }
  0x25   : > { %6607 = vmatmul.mubr.msk.f32.vlgmr.msra.gmra.mxu0 %vm643_vm0, %v626_v7  ;;  %v608_v40 = vld [vmem:[%s9961_s20 + $0x8] sm:$0xff]  ;;  %v623_v41 = vld [vmem:[%s9961_s20 + $0x80] sm:$0xff]  ;;  %v966_v47 = vld [vmem:[%s9959_s1 + $0x98] sm:$0xff] }
  0x26   : > { %1244 = vrot.lane.b32.xlu1 %v603_v5, %s9945_s28  ;;  %1246 = vrot.lane.b32.xlu0 %v604_v2, %s9945_s28  ;;  %v624_v42 = vld [vmem:[%s9961_s20 + $0x88] sm:$0xff]  ;;  %v974_v48 = vld [vmem:[%s9959_s1 + $0xd8] sm:$0xff]  ;;  %s10027_s28 = smov 126  }
  0x27   : > { %6609 = vmatprep.mubr.msk.f32.mxu0 %vm643_vm0, %v627_v8  ;;  %v967_v51 = vld [vmem:[%s9959_s1 + $0xa0] sm:$0xff]  ;;  %v968_v53 = vld [vmem:[%s9959_s1 + $0xa8] sm:$0xff]  ;;  %v969_v57 = vld [vmem:[%s9959_s1 + $0xb0] sm:$0xff] }
  0x28   : > { %v975_v52 = vld [vmem:[%s9959_s1 + $0xe0] sm:$0xff]  ;;  %v976_v54 = vld [vmem:[%s9959_s1 + $0xe8] sm:$0xff]  ;;  %v977_v58 = vld [vmem:[%s9959_s1 + $0xf0] sm:$0xff] }
  0x29   : > { %6610 = vmatmul.mubr.msk.f32.gmra.mxu0 %vm643_vm0, %v628_v9  ;;  %v970_v59 = vld [vmem:[%s9959_s1 + $0xb8] sm:$0xff]  ;;  %v971_v63 = vld [vmem:[%s9959_s1 + $0xc0] sm:$0xff]  ;;  %v1227_v8 = vld [vmem:[%s9959_s1 + $0x128] sm:$0xff] }
  0x2a   : > { %1506 = vrot.lane.b32.xlu1 %v605_v4, %s9941_s26  ;;  %1508 = vrot.lane.b32.xlu0 %v606_v1, %s9941_s26  ;;  %v978_v60 = vld [vmem:[%s9959_s1 + $0xf8] sm:$0xff]  ;;  %v979_v0 = vld [vmem:[%s9959_s1 + $0x100] sm:$0xff] }
  0x2b   : > { %6612 = vmatprep.mubr.msk.f32.mxu0 %vm643_vm0, %v629_v10  ;;  %v982_v7 = vld [vmem:[%s9959_s1 + $0x118] sm:$0xff]  ;;  %v1228_v9 = vld [vmem:[%s9959_s1 + $0x130] sm:$0xff] }
  0x2d   : > { %6613 = vmatmul.mubr.msk.f32.gmra.mxu0 %vm643_vm0, %v630_v11  ;;  %v1484_v11 = vld [vmem:[%s9959_s1 + $0x1b0] sm:$0xff] }
  0x2e   : > { %1504 = vrot.lane.b32.xlu1 %v604_v2, %s9941_s26  ;;  %1766 = vrot.lane.b32.xlu0 %v606_v1, %s9943_s22  ;;  %v972_v1 = vld [vmem:[%s9959_s1 + $0xc8] sm:$0xff] }
  0x2f   : > { %6615 = vmatprep.mubr.msk.f32.mxu0 %vm643_vm0, %v631_v12  ;;  %v1229_v12 = vld [vmem:[%s9959_s1 + $0x138] sm:$0xff] }
  0x31   : > { %6616 = vmatmul.mubr.msk.f32.gmra.mxu0 %vm643_vm0, %v632_v13  ;;  %v1485_v13 = vld [vmem:[%s9959_s1 + $0x1b8] sm:$0xff] }
  0x32   : > { %1502 = vrot.lane.b32.xlu1 %v603_v5, %s9941_s26  ;;  %1764 = vrot.lane.b32.xlu0 %v605_v4, %s9943_s22  ;;  %v981_v4 = vld [vmem:[%s9959_s1 + $0x110] sm:$0xff]  ;;  %s10029_s26 = smov 124  }
  0x33   : > { %6618 = vmatprep.mubr.msk.f32.mxu0 %vm643_vm0, %v633_v14 }
  0x35   : > { %6619 = vmatmul.mubr.msk.f32.gmra.mxu0 %vm643_vm0, %v634_v15  ;;  %v1230_v15 = vld [vmem:[%s9959_s1 + $0x140] sm:$0xff] }
  0x36   : > { %1762 = vrot.lane.b32.xlu0 %v604_v2, %s9943_s22  ;;  %1760 = vrot.lane.b32.xlu1 %v603_v5, %s9943_s22  ;;  %v980_v2 = vld [vmem:[%s9959_s1 + $0x108] sm:$0xff]  ;;  %v1226_v5 = vld [vmem:[%s9959_s1 + $0x120] sm:$0xff] }
  0x37   : > { %6621 = vmatprep.mubr.msk.f32.mxu0 %vm643_vm0, %v635_v16  ;;  %v1486_v16 = vld [vmem:[%s9959_s1 + $0x1c0] sm:$0xff] }
  0x39   : > { %6622 = vmatmul.mubr.msk.f32.gmra.mxu0 %vm643_vm0, %v636_v17  ;;  %v1231_v17 = vld [vmem:[%s9959_s1 + $0x148] sm:$0xff] }
  0x3a   : > { %6624 = vmatprep.mubr.msk.f32.mxu0 %vm643_vm0, %v637_v18  ;;  %934 = vperm.xlu0 %7520, %v622_v19   ;;  %v1487_v18 = vld [vmem:[%s9959_s1 + $0x1c8] sm:$0xff]  ;;  %v1232_v19 = vld [vmem:[%s9959_s1 + $0x150] sm:$0xff] }
  0x3b   : > { %929 = vperm.xlu1 %7521, %v621_v20   ;;  %v1488_v20 = vld [vmem:[%s9959_s1 + $0x1d0] sm:$0xff] }
  0x3d   : > { %6625 = vmatmul.mubr.msk.f32.gmra.mxu0 %vm643_vm0, %v638_v21 }
  0x3e   : > { %6627 = vmatprep.mubr.msk.f32.mxu0 %vm643_vm0, %v639_v22  ;;  %919 = vperm.xlu0 %7520, %v619_v23   ;;  %v1233_v22 = vld [vmem:[%s9959_s1 + $0x158] sm:$0xff] }
  0x3f   : > { %924 = vperm.xlu1 %7521, %v620_v24   ;;  %v1489_v23 = vld [vmem:[%s9959_s1 + $0x1d8] sm:$0xff]  ;;  %v1234_v24 = vld [vmem:[%s9959_s1 + $0x160] sm:$0xff] }
  0x41   : > { %6628 = vmatmul.mubr.msk.f32.gmra.mxu0 %vm643_vm0, %v640_v25  ;;  %v1490_v25 = vld [vmem:[%s9959_s1 + $0x1e0] sm:$0xff] }
  0x42   : > { %6630 = vmatprep.mubr.msk.f32.mxu0 %vm643_vm0, %v641_v26  ;;  %909 = vperm.xlu0 %7520, %v617_v27   ;;  %v1235_v27 = vld [vmem:[%s9959_s1 + $0x168] sm:$0xff] }
  0x43   : > { %914 = vperm.xlu1 %7521, %v618_v28   ;;  %v1491_v28 = vld [vmem:[%s9959_s1 + $0x1e8] sm:$0xff] }
  0x45   : > { %6631 = vmatmul.mubr.msk.f32.gmra.mxu0 %vm643_vm0, %v642_v29  ;;  %v1236_v29 = vld [vmem:[%s9959_s1 + $0x170] sm:$0xff] }
  0x46   : > { %6641 = vmatprep.mubr.msk.f32.mxu0 %vm643_vm0, %v965_v30  ;;  %899 = vperm.xlu0 %7520, %v615_v31   ;;  %v1492_v30 = vld [vmem:[%s9959_s1 + $0x1f0] sm:$0xff]  ;;  %v1237_v31 = vld [vmem:[%s9959_s1 + $0x178] sm:$0xff] }
  0x47   : > { %904 = vperm.xlu1 %7521, %v616_v32   ;;  %v1493_v32 = vld [vmem:[%s9959_s1 + $0x1f8] sm:$0xff] }
  0x4a   : > { %889 = vperm.xlu0 %7520, %v613_v33   ;;  %v1238_v33 = vld [vmem:[%s9959_s1 + $0x180] sm:$0xff] }
  0x4b   : > { %894 = vperm.xlu1 %7521, %v614_v34   ;;  %v1494_v34 = vld [vmem:[%s9959_s1 + $0x200] sm:$0xff] }
  0x4e   : > { %879 = vperm.xlu0 %7520, %v611_v35   ;;  %v1239_v35 = vld [vmem:[%s9959_s1 + $0x188] sm:$0xff] }
  0x4f   : > { %884 = vperm.xlu1 %7521, %v612_v36   ;;  %v1495_v36 = vld [vmem:[%s9959_s1 + $0x208] sm:$0xff] }
  0x52   : > { %869 = vperm.xlu0 %7520, %v609_v37   ;;  %v1240_v37 = vld [vmem:[%s9959_s1 + $0x190] sm:$0xff] }
  0x53   : > { %874 = vperm.xlu1 %7521, %v610_v38   ;;  %v1496_v38 = vld [vmem:[%s9959_s1 + $0x210] sm:$0xff] }
  0x56   : > { %859 = vperm.xlu0 %7520, %v607_v39   ;;  %v1241_v39 = vld [vmem:[%s9959_s1 + $0x198] sm:$0xff] }
  0x57   : > { %864 = vperm.xlu1 %7521, %v608_v40   ;;  %v1497_v40 = vld [vmem:[%s9959_s1 + $0x218] sm:$0xff] }
  0x5a   : > { %939 = vperm.xlu0 %7520, %v623_v41   ;;  %v1242_v41 = vld [vmem:[%s9959_s1 + $0x1a0] sm:$0xff] }
  0x5b   : > { %944 = vperm.xlu1 %7521, %v624_v42   ;;  %v1498_v42 = vld [vmem:[%s9959_s1 + $0x220] sm:$0xff] }
  0x8c   : > { %v993_v43 = vpop.permute.xlu0 %992  ;;  %v989_v44 = vpop.permute.xlu1 %988 }
  0x8d   : > { %6633 = vmatprep.subr.msk.mxu0 %vm698_vm1, %v993_v43  ;;  %7497 = vmatprep.subr.msk.mxu1 %vm698_vm1, %v993_v43 }
  0x8e   : > { %6634 = vmatpush3.msk.msra.mxu0 %vm698_vm1, %v993_v43  ;;  %7501 = vmatpush3.msk.msra.mxu1 %vm698_vm1, %v993_v43  ;;  %v1499_v43 = vld [vmem:[%s9959_s1 + $0x228] sm:$0xff] }
  0x90   : > { %v991_v45 = vpop.permute.xlu0 %990  ;;  %v987_v46 = vpop.permute.xlu1 %986 }
  0x91   : > { %6635 = vmatprep.subr.mxu0 %v991_v45  ;;  %7498 = vmatprep.subr.mxu1 %v991_v45 }
  0x92   : > { %6636 = vmatpush3.msra.mxu0 %v991_v45  ;;  %7502 = vmatpush3.msra.mxu1 %v991_v45  ;;  %v1500_v45 = vld [vmem:[%s9959_s1 + $0x230] sm:$0xff] }
  0x93   : > { %6637 = vmatprep.subr.mxu0 %v989_v44  ;;  %7499 = vmatprep.subr.mxu1 %v989_v44 }
  0x94   : > { %7503 = vmatpush3.msra.mxu1 %v989_v44  ;;  %6638 = vmatpush3.msra.mxu0 %v989_v44  ;;  %v1249_v49 = vpop.permute.xlu1 %1248  ;;  %v1251_v50 = vpop.permute.xlu0 %1250  ;;  %v1243_v44 = vld [vmem:[%s9959_s1 + $0x1a8] sm:$0xff] }
  0x95   : > { %6639 = vmatprep.subr.mxu0 %v987_v46  ;;  %7500 = vmatprep.subr.mxu1 %v987_v46 }
  0x96   : > { %6640 = vmatpush3.msra.mxu0 %v987_v46  ;;  %7504 = vmatpush3.msra.mxu1 %v987_v46  ;;  %v1742_v46 = vld [vmem:[%s9959_s1 + $0x240] sm:$0xff] }
  0x97   : > { %6642 = vmatmul.mubr.msk.f32.vlgmr.msra.gmra.mxu0 %vm643_vm0, %v966_v47  ;;  %6654 = vmatmul.mubr.msk.f32.vlgmr.msra.gmra.mxu1 %vm643_vm0, %v974_v48  ;;  %v1501_v47 = vld [vmem:[%s9959_s1 + $0x238] sm:$0xff]  ;;  %v1743_v48 = vld [vmem:[%s9959_s1 + $0x248] sm:$0xff] }
  0x98   : > { %6644 = vmatprep.mubr.msk.f32.mxu0 %vm643_vm0, %v967_v51  ;;  %6656 = vmatprep.mubr.msk.f32.mxu1 %vm643_vm0, %v975_v52  ;;  %v1245_v55 = vpop.permute.xlu1 %1244  ;;  %v1247_v56 = vpop.permute.xlu0 %1246  ;;  %v1746_v51 = vld [vmem:[%s9959_s1 + $0x260] sm:$0xff]  ;;  %v1747_v52 = vld [vmem:[%s9959_s1 + $0x268] sm:$0xff] }
  0x99   : > { %6668 = vmatprep.subr.msk.mxu0 %vm698_vm1, %v1251_v50 }
  0x9a   : > { %6669 = vmatpush3.msk.msra.mxu0 %vm698_vm1, %v1251_v50  ;;  %v1745_v50 = vld [vmem:[%s9959_s1 + $0x258] sm:$0xff] }
  0x9b   : > { %6645 = vmatmul.mubr.msk.f32.gmra.mxu0 %vm643_vm0, %v968_v53  ;;  %6657 = vmatmul.mubr.msk.f32.gmra.mxu1 %vm643_vm0, %v976_v54  ;;  %v1748_v53 = vld [vmem:[%s9959_s1 + $0x270] sm:$0xff]  ;;  %v1749_v54 = vld [vmem:[%s9959_s1 + $0x278] sm:$0xff] }
  0x9c   : > { %6647 = vmatprep.mubr.msk.f32.mxu0 %vm643_vm0, %v969_v57  ;;  %6659 = vmatprep.mubr.msk.f32.mxu1 %vm643_vm0, %v977_v58  ;;  %v1507_v61 = vpop.permute.xlu1 %1506  ;;  %v1509_v62 = vpop.permute.xlu0 %1508  ;;  %v1752_v57 = vld [vmem:[%s9959_s1 + $0x290] sm:$0xff]  ;;  %v1753_v58 = vld [vmem:[%s9959_s1 + $0x298] sm:$0xff] }
  0x9d   : > { %6670 = vmatprep.subr.mxu0 %v1249_v49  ;;  %6703 = vmatprep.subr.msk.mxu1 %vm698_vm1, %v1509_v62 }
  0x9e   : > { %6671 = vmatpush3.msra.mxu0 %v1249_v49  ;;  %6704 = vmatpush3.msk.msra.mxu1 %vm698_vm1, %v1509_v62  ;;  %v1744_v49 = vld [vmem:[%s9959_s1 + $0x250] sm:$0xff]  ;;  %v1757_v62 = vld [vmem:[%s9959_s1 + $0x2b8] sm:$0xff] }
  0x9f   : > { %6648 = vmatmul.mubr.msk.f32.gmra.mxu0 %vm643_vm0, %v970_v59  ;;  %6660 = vmatmul.mubr.msk.f32.gmra.mxu1 %vm643_vm0, %v978_v60  ;;  %v1754_v59 = vld [vmem:[%s9959_s1 + $0x2a0] sm:$0xff]  ;;  %v1755_v60 = vld [vmem:[%s9959_s1 + $0x2a8] sm:$0xff] }
  0xa0   : > { %6650 = vmatprep.mubr.msk.f32.mxu0 %vm643_vm0, %v971_v63  ;;  %6662 = vmatprep.mubr.msk.f32.mxu1 %vm643_vm0, %v979_v0  ;;  %v1505_v3 = vpop.permute.xlu1 %1504  ;;  %v1767_v6 = vpop.permute.xlu0 %1766  ;;  %v1758_v63 = vld [vmem:[%s9959_s1 + $0x2c0] sm:$0xff]  ;;  %v1759_v0 = vld [vmem:[%s9959_s1 + $0x2c8] sm:$0xff] }
  0xa1   : > { %6672 = vmatprep.subr.mxu0 %v1247_v56  ;;  %6705 = vmatprep.subr.mxu1 %v1507_v61 }
  0xa2   : > { %6673 = vmatpush3.msra.mxu0 %v1247_v56  ;;  %6706 = vmatpush3.msra.mxu1 %v1507_v61  ;;  %v1751_v56 = vld [vmem:[%s9959_s1 + $0x288] sm:$0xff]  ;;  %v1756_v61 = vld [vmem:[%s9959_s1 + $0x2b0] sm:$0xff] }
  0xa3   : > { %6651 = vmatmul.mubr.msk.f32.gmra.mxu0 %vm643_vm0, %v972_v1  ;;  %6663 = vmatmul.mubr.msk.f32.gmra.mxu1 %vm643_vm0, %v980_v2 }
  0xa4   : > { %6674 = vmatprep.subr.mxu0 %v1245_v55  ;;  %6665 = vmatprep.mubr.msk.f32.mxu1 %vm643_vm0, %v981_v4  ;;  %v1503_v10 = vpop.permute.xlu1 %1502  ;;  %v1765_v14 = vpop.permute.xlu0 %1764 }
  0xa5   : > { %6675 = vmatpush3.msra.mxu0 %v1245_v55  ;;  %6676 = vmatprep.mubr.msk.f32.mxu0 %vm643_vm0, %v1226_v5  ;;  %v1750_v55 = vld [vmem:[%s9959_s1 + $0x280] sm:$0xff]  ;;  %s6141_s1 = sshll.u32 %s10088_s30, 4 }
  0xa6   : > { %6707 = vmatprep.subr.mxu1 %v1505_v3  ;;  %6738 = vmatprep.subr.msk.mxu0 %vm698_vm1, %v1767_v6  ;;  %s602_s27 = scalar_lea.vmem %s9937_s19, %s6141_s1 }
  0xa7   : > { %6666 = vmatmul.mubr.msk.f32.gmra.mxu1 %vm643_vm0, %v982_v7  ;;  %6677 = vmatmul.mubr.msk.f32.vlgmr.msra.gmra.mxu0 %vm643_vm0, %v1227_v8 }
  0xa8   : > { %6708 = vmatpush3.msra.mxu1 %v1505_v3  ;;  %6679 = vmatprep.mubr.msk.f32.mxu0 %vm643_vm0, %v1228_v9  ;;  %v1763_v21 = vpop.permute.xlu0 %1762  ;;  %v1761_v26 = vpop.permute.xlu1 %1760  ;;  %v9947_v9 = vmov 0.0  }
  0xa9   : > { %6709 = vmatprep.subr.mxu1 %v1503_v10  ;;  %6711 = vmatprep.mubr.msk.f32.mxu1 %vm643_vm0, %v1484_v11 }
  0xaa   : > { %6710 = vmatpush3.msra.mxu1 %v1503_v10  ;;  %6739 = vmatpush3.msk.msra.mxu0 %vm698_vm1, %v1767_v6 }
  0xab   : > { %6680 = vmatmul.mubr.msk.f32.gmra.mxu0 %vm643_vm0, %v1229_v12  ;;  %6712 = vmatmul.mubr.msk.f32.vlgmr.msra.gmra.mxu1 %vm643_vm0, %v1485_v13 }
  0xac   : > { %6682 = vmatprep.mubr.msk.f32.mxu0 %vm643_vm0, %v1230_v15  ;;  %6714 = vmatprep.mubr.msk.f32.mxu1 %vm643_vm0, %v1486_v16 }
  0xad   : > { %6740 = vmatprep.subr.mxu0 %v1765_v14  ;;  %2046 = vmatprep.subr.mxu1 %v9947_v9 }
  0xae   : > { %6741 = vmatpush3.msra.mxu0 %v1765_v14 }
  0xaf   : > { %6683 = vmatmul.mubr.msk.f32.gmra.mxu0 %vm643_vm0, %v1231_v17  ;;  %6715 = vmatmul.mubr.msk.f32.gmra.mxu1 %vm643_vm0, %v1487_v18 }
  0xb0   : > { %6685 = vmatprep.mubr.msk.f32.mxu0 %vm643_vm0, %v1232_v19  ;;  %6717 = vmatprep.mubr.msk.f32.mxu1 %vm643_vm0, %v1488_v20 }
  0xb1   : > { %6742 = vmatprep.subr.mxu0 %v1763_v21 }
  0xb2   : > { %6743 = vmatpush3.msra.mxu0 %v1763_v21 }
  0xb3   : > { %6686 = vmatmul.mubr.msk.f32.gmra.mxu0 %vm643_vm0, %v1233_v22  ;;  %6718 = vmatmul.mubr.msk.f32.gmra.mxu1 %vm643_vm0, %v1489_v23  ;;  %v2001_v23 = vld [vmem:[%s9964_s21 + $0x8] sm:$0xff] }
  0xb4   : > { %6688 = vmatprep.mubr.msk.f32.mxu0 %vm643_vm0, %v1234_v24  ;;  %6720 = vmatprep.mubr.msk.f32.mxu1 %vm643_vm0, %v1490_v25  ;;  %v2157_v24 = vld [vmem:[%s9965_s4 + $0x8] sm:$0xff] }
  0xb5   : > { %6744 = vmatprep.subr.mxu0 %v1761_v26 }
  0xb6   : > { %6745 = vmatpush3.msra.mxu0 %v1761_v26  ;;  %v8105_v7 = vpop.permute.xlu1 %929 }
  0xb7   : > { %6689 = vmatmul.mubr.msk.f32.gmra.mxu0 %vm643_vm0, %v1235_v27  ;;  %6721 = vmatmul.mubr.msk.f32.gmra.mxu1 %vm643_vm0, %v1491_v28 }
  0xb8   : > { %6691 = vmatprep.mubr.msk.f32.mxu0 %vm643_vm0, %v1236_v29  ;;  %6723 = vmatprep.mubr.msk.f32.mxu1 %vm643_vm0, %v1492_v30 }
  0xb9   : > { %2201 = vmatprep.subr.mxu0 %v9947_v9  ;;  %v935_v9 = vpop.permute.xlu0 %934 }
  0xba   : > { %v8111_v11 = vpop.permute.xlu1 %924 }
  0xbb   : > { %6692 = vmatmul.mubr.msk.f32.gmra.mxu0 %vm643_vm0, %v1237_v31  ;;  %6724 = vmatmul.mubr.msk.f32.gmra.mxu1 %vm643_vm0, %v1493_v32 }
  0xbc   : > { %6694 = vmatprep.mubr.msk.f32.mxu0 %vm643_vm0, %v1238_v33  ;;  %6726 = vmatprep.mubr.msk.f32.mxu1 %vm643_vm0, %v1494_v34 }
  0xbe   : > { %v8115_v13 = vpop.permute.xlu1 %914 }
  0xbf   : > { %6695 = vmatmul.mubr.msk.f32.gmra.mxu0 %vm643_vm0, %v1239_v35  ;;  %6727 = vmatmul.mubr.msk.f32.gmra.mxu1 %vm643_vm0, %v1495_v36 }
  0xc0   : > { %6697 = vmatprep.mubr.msk.f32.mxu0 %vm643_vm0, %v1240_v37  ;;  %6729 = vmatprep.mubr.msk.f32.mxu1 %vm643_vm0, %v1496_v38 }
  0xc2   : > { %v8121_v16 = vpop.permute.xlu1 %904 }
  0xc3   : > { %6698 = vmatmul.mubr.msk.f32.gmra.mxu0 %vm643_vm0, %v1241_v39  ;;  %6730 = vmatmul.mubr.msk.f32.gmra.mxu1 %vm643_vm0, %v1497_v40 }
  0xc4   : > { %6700 = vmatprep.mubr.msk.f32.mxu0 %vm643_vm0, %v1242_v41  ;;  %6732 = vmatprep.mubr.msk.f32.mxu1 %vm643_vm0, %v1498_v42 }
  0xc6   : > { %v895_v18 = vpop.permute.xlu1 %894 }
  0xc7   : > { %6733 = vmatmul.mubr.msk.f32.gmra.mxu1 %vm643_vm0, %v1499_v43  ;;  %6701 = vmatmul.mubr.msk.f32.gmra.mxu0 %vm643_vm0, %v1243_v44 }
  0xc8   : > { %6735 = vmatprep.mubr.msk.f32.mxu1 %vm643_vm0, %v1500_v45  ;;  %6746 = vmatprep.mubr.msk.f32.mxu0 %vm643_vm0, %v1742_v46 }
  0xca   : > { %v885_v21 = vpop.permute.xlu1 %884 }
  0xcb   : > { %6736 = vmatmul.mubr.msk.f32.gmra.mxu1 %vm643_vm0, %v1501_v47  ;;  %6747 = vmatmul.mubr.msk.f32.vlgmr.msra.gmra.mxu0 %vm643_vm0, %v1743_v48 }
  0xcc   : > { %6749 = vmatprep.mubr.msk.f32.mxu0 %vm643_vm0, %v1744_v49  ;;  %5887 = vmatprep.mubr.msk.f32.mxu1 %vm2018_vm2, %v2001_v23 }
  0xce   : > { %v875_v25 = vpop.permute.xlu1 %874 }
  0xcf   : > { %6750 = vmatmul.mubr.msk.f32.gmra.mxu0 %vm643_vm0, %v1745_v50 }
  0xd0   : > { %6752 = vmatprep.mubr.msk.f32.mxu0 %vm643_vm0, %v1746_v51 }
  0xd2   : > { %v865_v28 = vpop.permute.xlu1 %864 }
  0xd3   : > { %6753 = vmatmul.mubr.msk.f32.gmra.mxu0 %vm643_vm0, %v1747_v52 }
  0xd4   : > { %6755 = vmatprep.mubr.msk.f32.mxu0 %vm643_vm0, %v1748_v53 }
  0xd7   : > { %6756 = vmatmul.mubr.msk.f32.gmra.mxu0 %vm643_vm0, %v1749_v54 }
  0xd8   : > { %6758 = vmatprep.mubr.msk.f32.mxu0 %vm643_vm0, %v1750_v55 }
  0xdb   : > { %6759 = vmatmul.mubr.msk.f32.gmra.mxu0 %vm643_vm0, %v1751_v56 }
  0xdc   : > { %6761 = vmatprep.mubr.msk.f32.mxu0 %vm643_vm0, %v1752_v57 }
  0xdf   : > { %6762 = vmatmul.mubr.msk.f32.gmra.mxu0 %vm643_vm0, %v1753_v58 }
  0xe0   : > { %6764 = vmatprep.mubr.msk.f32.mxu0 %vm643_vm0, %v1754_v59 }
  0xe3   : > { %6765 = vmatmul.mubr.msk.f32.gmra.mxu0 %vm643_vm0, %v1755_v60 }
  0xe4   : > { %6767 = vmatprep.mubr.msk.f32.mxu0 %vm643_vm0, %v1756_v61 }
  0xe5   : > { %v6608_v1 = vpop.f32.mrf.mxu0 }
  0xe6   : > { %v948_v30 = vadd.f32 %v6608_v1, %v865_v28 }
  0xe7   : > { %6768 = vmatmul.mubr.msk.f32.gmra.mxu0 %vm643_vm0, %v1757_v62  ;;  %v8099_v2 = vpop.f32.mrf.mxu0 }
  0xe8   : > { %6770 = vmatprep.mubr.msk.f32.mxu0 %vm643_vm0, %v1758_v63  ;;  %9962 = vst [vmem:[#allocation2_spill] sm:$0xff] %v8099_v2 }
  0xe9   : > { %v6611_v3 = vpop.f32.mrf.mxu0 }
  0xea   : > { %v950_v36 = vadd.f32 %v6611_v3, %v875_v25 }
  0xeb   : > { %6771 = vmatmul.mubr.msk.f32.gmra.mxu0 %vm643_vm0, %v1759_v0  ;;  %v8101_v4 = vpop.f32.mrf.mxu0 }
  0xec   : > { %9963 = vst [vmem:[#allocation3_spill] sm:$0xff] %v8101_v4  ;;  %5896 = vmatprep.mubr.msk.f32.mxu0 %vm2018_vm2, %v2157_v24 }
  0xed   : > { %v6614_v5 = vpop.f32.mrf.mxu0 }
  0xee   : > { %v952_v42 = vadd.f32 %v6614_v5, %v885_v21 }
  0xef   : > { %v8103_v6 = vpop.f32.mrf.mxu0 }
  0xf1   : > { %v6617_v8 = vpop.f32.mrf.mxu0 }
  0xf2   : > { %v954_v48 = vadd.f32 %v6617_v8, %v895_v18 }
  0xf3   : > { %v8109_v10 = vpop.f32.mrf.mxu0 }
  0xf5   : > { %v8113_v12 = vpop.f32.mrf.mxu0 }
  0xf7   : > { %v8117_v14 = vpop.f32.mrf.mxu0 }
  0xf9   : > { %v8119_v15 = vpop.f32.mrf.mxu0 }
  0xfa   : > { %v958_v4 = vadd.f32 %v8119_v15, %v8115_v13  ;;  %v956_v13 = vadd.f32 %v8113_v12, %v8121_v16 }
  0xfb   : > { %v8123_v17 = vpop.f32.mrf.mxu0 }
  0xfd   : > { %v8125_v19 = vpop.f32.mrf.mxu0 }
  0xff   : > { %v8127_v20 = vpop.f32.mrf.mxu0 }
 0x101   : > { %v8129_v22 = vpop.f32.mrf.mxu0 }
 0x103   : > { %v8139_v26 = vpop.f32.mrf.mxu0 }
 0x105   : > { %v8141_v27 = vpop.f32.mrf.mxu0 }
 0x106   : > { %9966 = vst [vmem:[#allocation4_spill] sm:$0xff] %v8141_v27 }
 0x107   : > { %v8143_v29 = vpop.f32.mrf.mxu0 }
 0x108   : > { %9967 = vst [vmem:[#allocation5_spill] sm:$0xff] %v8143_v29 }
 0x157   : > { %v6643_v31 = vpop.f32.mrf.mxu0  ;;  %v8145_v32 = vpop.f32.mrf.mxu1 }
 0x158   : > { %v1209_v33 = vadd.f32 %v6643_v31, %v948_v30 }
 0x159   : > { %v8147_v34 = vpop.f32.mrf.mxu0  ;;  %v8149_v35 = vpop.f32.mrf.mxu1 }
 0x15a   : > { %9968 = vst [vmem:[#allocation6_spill] sm:$0xff] %v8147_v34 }
 0x15b   : > { %v6646_v37 = vpop.f32.mrf.mxu0  ;;  %v8151_v38 = vpop.f32.mrf.mxu1 }
 0x15c   : > { %v1211_v39 = vadd.f32 %v6646_v37, %v950_v36 }
 0x15d   : > { %v8153_v40 = vpop.f32.mrf.mxu0  ;;  %v8155_v41 = vpop.f32.mrf.mxu1 }
 0x15e   : > { %9969 = vst [vmem:[#allocation7_spill] sm:$0xff] %v8153_v40 }
 0x15f   : > { %v6649_v43 = vpop.f32.mrf.mxu0  ;;  %v8157_v44 = vpop.f32.mrf.mxu1 }
 0x160   : > { %v1213_v45 = vadd.f32 %v6649_v43, %v952_v42 }
 0x161   : > { %v8159_v46 = vpop.f32.mrf.mxu0  ;;  %v8161_v47 = vpop.f32.mrf.mxu1 }
 0x163   : > { %v6652_v49 = vpop.f32.mrf.mxu0  ;;  %v6664_v50 = vpop.f32.mrf.mxu1 }
 0x164   : > { %v1215_v51 = vadd.f32 %v6652_v49, %v954_v48 }
 0x165   : > { %v8163_v52 = vpop.f32.mrf.mxu0  ;;  %v1189_v53 = vpop.f32.mrf.mxu1 }
 0x167   : > { %v8165_v54 = vpop.f32.mrf.mxu1  ;;  %v6678_v55 = vpop.f32.mrf.mxu0 }
 0x168   : > { %9970 = vst [vmem:[#allocation8_spill] sm:$0xff] %v8165_v54  ;;  %v8167_v56 = vadd.f32 %v6678_v55, %v1209_v33 }
 0x169   : > { %v8169_v57 = vpop.f32.mrf.mxu1  ;;  %v8171_v58 = vpop.f32.mrf.mxu0 }
 0x16a   : > { %9971 = vst [vmem:[#allocation9_spill] sm:$0xff] %v8167_v56  ;;  %9972 = vst [vmem:[#allocation10_spill] sm:$0xff] %v8169_v57 }
 0x16b   : > { %9973 = vst [vmem:[#allocation11_spill] sm:$0xff] %v8171_v58  ;;  %v6681_v59 = vpop.f32.mrf.mxu0  ;;  %v8173_v60 = vpop.f32.mrf.mxu1 }
 0x16c   : > { %9974 = vst [vmem:[#allocation12_spill] sm:$0xff] %v8173_v60  ;;  %v8175_v61 = vadd.f32 %v6681_v59, %v1211_v39  ;;  %v920_v58 = vpop.permute.xlu0 %919 }
 0x16d   : > { %v8177_v62 = vpop.f32.mrf.mxu0  ;;  %v8179_v63 = vpop.f32.mrf.mxu1 }
 0x16e   : > { %9975 = vst [vmem:[#allocation13_spill] sm:$0xff] %v8175_v61  ;;  %9976 = vst [vmem:[#allocation14_spill] sm:$0xff] %v8177_v62 }
 0x16f   : > { %9977 = vst [vmem:[#allocation15_spill] sm:$0xff] %v8179_v63  ;;  %v6684_v0 = vpop.f32.mrf.mxu0  ;;  %v8183_v3 = vpop.f32.mrf.mxu1 }
 0x170   : > { %v8181_v1 = vadd.f32 %v6684_v0, %v1213_v45  ;;  %9979 = vst [vmem:[#allocation17_spill] sm:$0xff] %v8183_v3 }
 0x171   : > { %v8185_v5 = vpop.f32.mrf.mxu0  ;;  %v8189_v21 = vpop.f32.mrf.mxu1 }
 0x172   : > { %9978 = vst [vmem:[#allocation16_spill] sm:$0xff] %v8181_v1  ;;  %9980 = vst [vmem:[#allocation18_spill] sm:$0xff] %v8185_v5  ;;  %v959_v1 = vadd.f32 %v920_v58, %v8127_v20 }
 0x173   : > { %v6687_v8 = vpop.f32.mrf.mxu0  ;;  %9981 = vst [vmem:[#allocation19_spill] sm:$0xff] %v8189_v21  ;;  %v8195_v25 = vpop.f32.mrf.mxu1 }
 0x174   : > { %v8187_v18 = vadd.f32 %v6687_v8, %v1215_v51  ;;  %9982 = vst [vmem:[#allocation20_spill] sm:$0xff] %v8195_v25 }
 0x175   : > { %v8191_v23 = vpop.f32.mrf.mxu0  ;;  %v8201_v31 = vpop.f32.mrf.mxu1 }
 0x176   : > { %9983 = vst [vmem:[#allocation21_spill] sm:$0xff] %v8201_v31 }
 0x177   : > { %v8193_v24 = vpop.f32.mrf.mxu0  ;;  %v8205_v37 = vpop.f32.mrf.mxu1 }
 0x179   : > { %v8197_v28 = vpop.f32.mrf.mxu0  ;;  %v8207_v43 = vpop.f32.mrf.mxu1 }
 0x17b   : > { %v8199_v30 = vpop.f32.mrf.mxu0  ;;  %v8211_v49 = vpop.f32.mrf.mxu1 }
 0x17d   : > { %v8203_v33 = vpop.f32.mrf.mxu0  ;;  %v8217_v59 = vpop.f32.mrf.mxu1 }
 0x17f   : > { %v6696_v36 = vpop.f32.mrf.mxu0  ;;  %v6728_v63 = vpop.f32.mrf.mxu1 }
 0x181   : > { %v1437_v39 = vpop.f32.mrf.mxu0  ;;  %v8227_v56 = vpop.f32.mrf.mxu1 }
 0x183   : > { %v6699_v42 = vpop.f32.mrf.mxu0 }
 0x185   : > { %v1447_v45 = vpop.f32.mrf.mxu0 }
 0x187   : > { %v8209_v48 = vpop.f32.mrf.mxu0 }
 0x188   : > { %9984 = vst [vmem:[#allocation22_spill] sm:$0xff] %v8209_v48 }
 0x189   : > { %v8213_v51 = vpop.f32.mrf.mxu0 }
 0x18a   : > { %9985 = vst [vmem:[#allocation23_spill] sm:$0xff] %v8213_v51 }
 0x18b   : > { %v8215_v55 = vpop.f32.mrf.mxu0 }
 0x18c   : > { %9986 = vst [vmem:[#allocation24_spill] sm:$0xff] %v8215_v55  ;;  %v6731_v55 = vpop.f32.mrf.mxu1 }
 0x18d   : > { %v8219_v0 = vpop.f32.mrf.mxu0 }
 0x18e   : > { %9987 = vst [vmem:[#allocation25_spill] sm:$0xff] %v8219_v0  ;;  %v910_v0 = vpop.permute.xlu0 %909 }
 0x18f   : > { %v8221_v8 = vpop.f32.mrf.mxu0 }
 0x190   : > { %9988 = vst [vmem:[#allocation26_spill] sm:$0xff] %v8221_v8  ;;  %v1695_v8 = vpop.f32.mrf.mxu1 }
 0x191   : > { %v8223_v57 = vpop.f32.mrf.mxu0 }
 0x192   : > { %9989 = vst [vmem:[#allocation27_spill] sm:$0xff] %v8223_v57  ;;  %v962_v57 = vadd.f32 %v8129_v22, %v935_v9  ;;  %v6734_v27 = vpop.f32.mrf.mxu1  ;;  %v900_v61 = vpop.permute.xlu0 %899 }
 0x193   : > { %v8225_v60 = vpop.f32.mrf.mxu0 }
 0x194   : > { %9990 = vst [vmem:[#allocation28_spill] sm:$0xff] %v8225_v60  ;;  %v1223_v62 = vadd.f32 %v6664_v50, %v962_v57  ;;  %v960_v60 = vadd.f32 %v8125_v19, %v8111_v11  ;;  %v957_v19 = vadd.f32 %v910_v0, %v8123_v17  ;;  %v10004_v0 = vld [vmem:[#allocation2_spill] sm:$0xff] }
 0x195   : > { %v8229_v48 = vpop.f32.mrf.mxu0 }
 0x196   : > { %9991 = vst [vmem:[#allocation29_spill] sm:$0xff] %v8229_v48  ;;  %v961_v48 = vadd.f32 %v8105_v7, %v8139_v26  ;;  %v1481_v40 = vadd.f32 %v6699_v42, %v1223_v62  ;;  %v1221_v5 = vadd.f32 %v8157_v44, %v960_v60  ;;  %v890_v7 = vpop.permute.xlu0 %889  ;;  %v1220_v26 = vadd.f32 %v8161_v47, %v959_v1 }
 0x197   : > { %v8231_v51 = vpop.f32.mrf.mxu0  ;;  %v1218_v15 = vadd.f32 %v8155_v41, %v957_v19 }
 0x198   : > { %9992 = vst [vmem:[#allocation30_spill] sm:$0xff] %v8231_v51  ;;  %v1222_v31 = vadd.f32 %v1189_v53, %v961_v48  ;;  %v1739_v22 = vadd.f32 %v6734_v27, %v1481_v40  ;;  %v1479_v50 = vadd.f32 %v6696_v36, %v1221_v5  ;;  %v1219_v53 = vadd.f32 %v8151_v38, %v958_v4  ;;  %v9998_v36 = vld [vmem:[#allocation16_spill] sm:$0xff] }
 0x199   : > { %v8233_v54 = vpop.f32.mrf.mxu0  ;;  %v1478_v20 = vadd.f32 %v1437_v39, %v1220_v26  ;;  %v9994_v27 = vmov 0.0   ;;  %v955_v4 = vadd.f32 %v900_v61, %v8117_v14  ;;  %v1217_v38 = vadd.f32 %v8145_v32, %v956_v13  ;;  %v10006_v26 = vld [vmem:[#allocation13_spill] sm:$0xff] }
 0x19a   : > { %9993 = vst [vmem:[#allocation31_spill] sm:$0xff] %v8233_v54  ;;  %v1705_v54 = vpop.f32.mrf.mxu1  ;;  %v1480_v9 = vadd.f32 %v1447_v45, %v1222_v31  ;;  %v1737_v58 = vadd.f32 %v6731_v55, %v1479_v50  ;;  %v1477_v40 = vadd.f32 %v8199_v30, %v1219_v53  ;;  %v880_v12 = vpop.permute.xlu0 %879  ;;  %v1476_v16 = vadd.f32 %v8203_v33, %v1218_v15  ;;  %v10001_v45 = vld [vmem:[#allocation7_spill] sm:$0xff]  ;;  %v10007_v50 = vld [vmem:[#allocation17_spill] sm:$0xff]  ;;  %v10009_v53 = vld [vmem:[#allocation4_spill] sm:$0xff] }
 0x19b   : > { %v8235_v29 = vpop.f32.mrf.mxu0  ;;  %v1736_v17 = vadd.f32 %v1695_v8, %v1478_v20  ;;  %v1216_v60 = vadd.f32 %v8149_v35, %v955_v4  ;;  %v953_v61 = vadd.f32 %v890_v7, %v8109_v10  ;;  %v10003_v55 = vld [vmem:[#allocation28_spill] sm:$0xff]  ;;  %v10010_v20 = vld [vmem:[#allocation6_spill] sm:$0xff] }
 0x19c   : > { %v1738_v57 = vadd.f32 %v1705_v54, %v1480_v9  ;;  %v1735_v41 = vadd.f32 %v6728_v63, %v1477_v40  ;;  %v1734_v14 = vadd.f32 %v8227_v56, %v1476_v16  ;;  %v10012_v15 = vld [vmem:[#allocation26_spill] sm:$0xff]  ;;  %v10014_v4 = vld [vmem:[#allocation8_spill] sm:$0xff]  ;;  %v10015_v16 = vld [vmem:[#allocation11_spill] sm:$0xff] }
 0x19d   : > { %v8237_v21 = vpop.f32.mrf.mxu0  ;;  %v1474_v63 = vadd.f32 %v8197_v28, %v1216_v60  ;;  %v1214_v56 = vadd.f32 %v8163_v52, %v953_v61  ;;  %v10017_v60 = vld [vmem:[#allocation12_spill] sm:$0xff]  ;;  %v10019_v61 = vld [vmem:[#allocation10_spill] sm:$0xff] }
 0x19f   : > { %v6763_v34 = vpop.f32.mrf.mxu0  ;;  %v1732_v10 = vadd.f32 %v8217_v59, %v1474_v63  ;;  %v9995_v52 = vld [vmem:[#allocation30_spill] sm:$0xff] }
 0x1a0   : > { %v1993_v32 = vadd.f32 %v6763_v34, %v1735_v41  ;;  %v870_v34 = vpop.permute.xlu0 %869 }
 0x1a1   : > { %v1943_v3 = vpop.f32.mrf.mxu0  ;;  %v1990_v28 = vadd.f32 %v8237_v21, %v1732_v10  ;;  %v9997_v21 = vld [vmem:[#allocation18_spill] sm:$0xff]  ;;  %v10000_v42 = vld [vmem:[#allocation31_spill] sm:$0xff] }
 0x1a2   : > { %v1992_v1 = vadd.f32 %v1943_v3, %v1734_v14  ;;  %v1472_v3 = vadd.f32 %v8191_v23, %v1214_v56  ;;  %v9996_v23 = vld [vmem:[#allocation3_spill] sm:$0xff]  ;;  %v10021_v56 = vld [vmem:[#allocation22_spill] sm:$0xff] }
 0x1a3   : > { %v6766_v2 = vpop.f32.mrf.mxu0  ;;  %v949_v31 = vadd.f32 %v870_v34, %v9996_v23  ;;  %v10018_v14 = vld [vmem:[#allocation27_spill] sm:$0xff] }
 0x1a4   : > { %v1995_v47 = vadd.f32 %v6766_v2, %v1737_v58  ;;  %v1475_v2 = vadd.f32 %v8193_v24, %v1217_v38  ;;  %v951_v24 = vadd.f32 %v880_v12, %v8103_v6  ;;  %v1730_v6 = vadd.f32 %v8207_v43, %v1472_v3  ;;  %v945_v43 = vpop.permute.xlu1 %944  ;;  %v6737_v12 = vpop.f32.mrf.mxu1 }
 0x1a5   : > { %v1953_v25 = vpop.f32.mrf.mxu0  ;;  %v1210_v48 = vadd.f32 %v10001_v45, %v949_v31  ;;  %v2005_v45 = vld [vmem:[%s9964_s21 + $0x28] sm:$0xff] }
 0x1a6   : > { %v1994_v54 = vadd.f32 %v1953_v25, %v1736_v17  ;;  %v1733_v35 = vadd.f32 %v8211_v49, %v1475_v2  ;;  %v1731_v25 = vadd.f32 %v8205_v37, %v8187_v18  ;;  %v860_v18 = vpop.permute.xlu0 %859  ;;  %v9999_v37 = vld [vmem:[#allocation20_spill] sm:$0xff]  ;;  %v10002_v49 = vld [vmem:[#allocation21_spill] sm:$0xff]  ;;  %v1715_v3 = vpop.f32.mrf.mxu1 }
 0x1a7   : > { %v6769_v51 = vpop.f32.mrf.mxu0  ;;  %v1729_v39 = vadd.f32 %v9999_v37, %v9998_v36  ;;  %v947_v8 = vadd.f32 %v860_v18, %v10004_v0  ;;  %v10013_v17 = vld [vmem:[#allocation5_spill] sm:$0xff]  ;;  %v2006_v0 = vld [vmem:[%s9964_s21 + $0x30] sm:$0xff] }
 0x1a8   : > { %v1997_v11 = vadd.f32 %v6769_v51, %v1739_v22  ;;  %v1991_v5 = vadd.f32 %v8235_v29, %v1733_v35  ;;  %v1212_v29 = vadd.f32 %v8159_v46, %v951_v24  ;;  %v1989_v30 = vadd.f32 %v9995_v52, %v1731_v25  ;;  %v10005_v22 = vld [vmem:[#allocation14_spill] sm:$0xff]  ;;  %v10023_v25 = vld [vmem:[#allocation23_spill] sm:$0xff]  ;;  %v2003_v36 = vld [vmem:[%s9964_s21 + $0x18] sm:$0xff] }
 0x1a9   : > { %v1963_v62 = vpop.f32.mrf.mxu0  ;;  %v1988_v46 = vadd.f32 %v10000_v42, %v1730_v6  ;;  %v1987_v59 = vadd.f32 %v10003_v55, %v1729_v39  ;;  %v1468_v7 = vadd.f32 %v10005_v22, %v1210_v48  ;;  %v1208_v58 = vadd.f32 %v10010_v20, %v947_v8  ;;  %v10024_v6 = vld [vmem:[#allocation25_spill] sm:$0xff]  ;;  %v2322_v39 = vld [vmem:[%s10025_s5 + $0x10] sm:$0xff]  ;;  %v2161_v48 = vld [vmem:[%s9965_s4 + $0x28] sm:$0xff] }
 0x1aa   : > { %v1996_v44 = vadd.f32 %v1963_v62, %v1738_v57  ;;  %2047 = vmatpush1.msra.mxu1 %v1997_v11  ;;  %2202 = vmatpush1.msra.mxu0 %v1997_v11  ;;  %v1470_v33 = vadd.f32 %v9997_v21, %v1212_v29  ;;  %v940_v9 = vpop.permute.xlu0 %939  ;;  %v1727_v57 = vadd.f32 %v10007_v50, %v10006_v26  ;;  %v10008_v11 = vld [vmem:[#allocation29_spill] sm:$0xff]  ;;  %v2000_v21 = vld [vmem:[%s9964_s21] sm:$0xff]  ;;  %v2463_v42 = vld [vmem:[%s9924_s6 + $0x10] sm:$0xff] }
 0x1ab   : > { %2048 = vmatprep.subr.mxu1 %v9994_v27  ;;  %2203 = vmatprep.subr.mxu0 %v9994_v27  ;;  %v964_v62 = vadd.f32 %v10009_v53, %v945_v43  ;;  %v1466_v41 = vadd.f32 %v10015_v16, %v1208_v58  ;;  %v6772_v35 = vpop.f32.mrf.mxu0  ;;  %v2159_v37 = vld [vmem:[%s9965_s4 + $0x18] sm:$0xff]  ;;  %v2158_v43 = vld [vmem:[%s9965_s4 + $0x10] sm:$0xff]  ;;  %v2165_v22 = vld [vmem:[%s9965_s4 + $0x48] sm:$0xff] }
 0x1ac   : > { %2049 = vmatpush1.msra.mxu1 %v1996_v44  ;;  %2204 = vmatpush1.msra.mxu0 %v1996_v44  ;;  %v1728_v51 = vadd.f32 %v10002_v49, %v1470_v33  ;;  %v10011_v44 = vld [vmem:[#allocation19_spill] sm:$0xff]  ;;  %v1985_v40 = vadd.f32 %v10012_v15, %v1727_v57  ;;  %v2156_v33 = vld [vmem:[%s9965_s4] sm:$0xff]  ;;  %v2007_v55 = vld [vmem:[%s9964_s21 + $0x38] sm:$0xff] }
 0x1ad   : > { %2050 = vmatprep.subr.mxu1 %v9994_v27  ;;  %2205 = vmatprep.subr.mxu0 %v9994_v27  ;;  %v1726_v13 = vadd.f32 %v10011_v44, %v1468_v7  ;;  %v1225_v38 = vadd.f32 %v10014_v4, %v964_v62  ;;  %v2004_v49 = vld [vmem:[%s9964_s21 + $0x20] sm:$0xff]  ;;  %v2162_v8 = vld [vmem:[%s9965_s4 + $0x30] sm:$0xff]  ;;  %v2011_v50 = vld [vmem:[%s9964_s21 + $0x58] sm:$0xff] }
 0x1ae   : > { %2051 = vmatpush1.msra.mxu1 %v1995_v47  ;;  %2206 = vmatpush1.msra.mxu0 %v1995_v47  ;;  %v1986_v19 = vadd.f32 %v10008_v11, %v1728_v51  ;;  %v963_v47 = vadd.f32 %v940_v9, %v10013_v17  ;;  %v2160_v51 = vld [vmem:[%s9965_s4 + $0x20] sm:$0xff]  ;;  %v2009_v9 = vld [vmem:[%s9964_s21 + $0x48] sm:$0xff]  ;;  %v2167_v57 = vld [vmem:[%s9965_s4 + $0x58] sm:$0xff] }
 0x1af   : > { %2052 = vmatprep.subr.mxu1 %v9994_v27  ;;  %2207 = vmatprep.subr.mxu0 %v9994_v27  ;;  %v1483_v10 = vadd.f32 %v10021_v56, %v1225_v38  ;;  %v2008_v7 = vld [vmem:[%s9964_s21 + $0x40] sm:$0xff]  ;;  %v2010_v11 = vld [vmem:[%s9964_s21 + $0x50] sm:$0xff]  ;;  %v2013_v53 = vld [vmem:[%s9964_s21 + $0x68] sm:$0xff] }
 0x1b0   : > { %2053 = vmatpush1.msra.mxu1 %v1994_v54  ;;  %2208 = vmatpush1.msra.mxu0 %v1994_v54  ;;  %v10016_v54 = vld [vmem:[#allocation9_spill] sm:$0xff]  ;;  %v1224_v63 = vadd.f32 %v10019_v61, %v963_v47  ;;  %v2164_v26 = vld [vmem:[%s9965_s4 + $0x40] sm:$0xff]  ;;  %v2169_v62 = vld [vmem:[%s9965_s4 + $0x68] sm:$0xff] }
 0x1b1   : > { %2054 = vmatprep.subr.mxu1 %v9994_v27  ;;  %2209 = vmatprep.subr.mxu0 %v9994_v27  ;;  %v1725_v2 = vadd.f32 %v10017_v60, %v10016_v54  ;;  %v1741_v29 = vadd.f32 %v6737_v12, %v1483_v10  ;;  %v2012_v20 = vld [vmem:[%s9964_s21 + $0x60] sm:$0xff]  ;;  %v2015_v44 = vld [vmem:[%s9964_s21 + $0x78] sm:$0xff]  ;;  %v2014_v15 = vld [vmem:[%s9964_s21 + $0x70] sm:$0xff] }
 0x1b2   : > { %2055 = vmatpush1.msra.mxu1 %v1993_v32  ;;  %2210 = vmatpush1.msra.mxu0 %v1993_v32  ;;  %v1984_v32 = vadd.f32 %v10018_v14, %v1726_v13  ;;  %v2168_v58 = vld [vmem:[%s9965_s4 + $0x60] sm:$0xff]  ;;  %v2171_v13 = vld [vmem:[%s9965_s4 + $0x78] sm:$0xff]  ;;  %v2017_v17 = vld [vmem:[%s9964_s21 + $0x88] sm:$0xff] }
 0x1b3   : > { %2056 = vmatprep.subr.mxu1 %v9994_v27  ;;  %2211 = vmatprep.subr.mxu0 %v9994_v27  ;;  %v1999_v31 = vadd.f32 %v6772_v35, %v1741_v29  ;;  %v2173_v47 = vld [vmem:[%s9965_s4 + $0x88] sm:$0xff]  ;;  %v2016_v4 = vld [vmem:[%s9964_s21 + $0x80] sm:$0xff] }
 0x1b4   : > { %2057 = vmatpush1.msra.mxu1 %v1992_v1  ;;  %2212 = vmatpush1.msra.mxu0 %v1992_v1  ;;  %v10020_v1 = vld [vmem:[#allocation15_spill] sm:$0xff]  ;;  %v2172_v38 = vld [vmem:[%s9965_s4 + $0x80] sm:$0xff] }
 0x1b5   : > { %2058 = vmatprep.subr.mxu1 %v9994_v27  ;;  %2213 = vmatprep.subr.mxu0 %v9994_v27  ;;  %v1724_v34 = vadd.f32 %v10020_v1, %v1466_v41  ;;  %v2321_v12 = vld [vmem:[%s10025_s5 + $0x8] sm:$0xff]  ;;  %v2320_v41 = vld [vmem:[%s10025_s5] sm:$0xff] }
 0x1b6   : > { %2059 = vmatpush1.msra.mxu1 %v1991_v5  ;;  %2214 = vmatpush1.msra.mxu0 %v1991_v5  ;;  %v10022_v5 = vld [vmem:[#allocation24_spill] sm:$0xff]  ;;  %v2462_v16 = vld [vmem:[%s9924_s6 + $0x8] sm:$0xff]  ;;  %v2461_v54 = vld [vmem:[%s9924_s6] sm:$0xff] }
 0x1b7   : > { %2060 = vmatprep.subr.mxu1 %v9994_v27  ;;  %2215 = vmatprep.subr.mxu0 %v9994_v27  ;;  %v1983_v24 = vadd.f32 %v10022_v5, %v1725_v2  ;;  %v1982_v52 = vadd.f32 %v10024_v6, %v1724_v34 }
 0x1b8   : > { %2061 = vmatpush1.msra.mxu1 %v1990_v28  ;;  %2216 = vmatpush1.msra.mxu0 %v1990_v28  ;;  %v1482_v28 = vadd.f32 %v10023_v25, %v1224_v63 }
 0x1b9   : > { %2062 = vmatprep.subr.mxu1 %v9994_v27  ;;  %2217 = vmatprep.subr.mxu0 %v9994_v27 }
 0x1ba   : > { %2063 = vmatpush1.msra.mxu1 %v1989_v30  ;;  %2218 = vmatpush1.msra.mxu0 %v1989_v30  ;;  %v1973_v30 = vpop.f32.mrf.mxu0  ;;  %v1740_v23 = vadd.f32 %v1715_v3, %v1482_v28 }
 0x1bb   : > { %2064 = vmatprep.subr.mxu1 %v9994_v27  ;;  %2219 = vmatprep.subr.mxu0 %v9994_v27 }
 0x1bc   : > { %2065 = vmatpush1.msra.mxu1 %v1988_v46  ;;  %2220 = vmatpush1.msra.mxu0 %v1988_v46  ;;  %v1998_v18 = vadd.f32 %v1973_v30, %v1740_v23  ;;  %v2002_v46 = vld [vmem:[%s9964_s21 + $0x10] sm:$0xff] }
 0x1bd   : > { %2066 = vmatprep.subr.mxu1 %v9994_v27  ;;  %2221 = vmatprep.subr.mxu0 %v9994_v27 }
 0x1be   : > { %2067 = vmatpush1.msra.mxu1 %v1987_v59  ;;  %2222 = vmatpush1.msra.mxu0 %v1987_v59  ;;  %v2163_v59 = vld [vmem:[%s9965_s4 + $0x38] sm:$0xff] }
 0x1bf   : > { %2068 = vmatprep.subr.mxu1 %v9994_v27  ;;  %2223 = vmatprep.subr.mxu0 %v9994_v27 }
 0x1c0   : > { %2069 = vmatpush1.msra.mxu1 %v1986_v19  ;;  %2224 = vmatpush1.msra.mxu0 %v1986_v19  ;;  %v2166_v19 = vld [vmem:[%s9965_s4 + $0x50] sm:$0xff] }
 0x1c1   : > { %2070 = vmatprep.subr.mxu1 %v9994_v27  ;;  %2225 = vmatprep.subr.mxu0 %v9994_v27 }
 0x1c2   : > { %2071 = vmatpush1.msra.mxu1 %v1985_v40  ;;  %2226 = vmatpush1.msra.mxu0 %v1985_v40  ;;  %v2170_v40 = vld [vmem:[%s9965_s4 + $0x70] sm:$0xff] }
 0x1c3   : > { %2072 = vmatprep.subr.mxu1 %v9994_v27  ;;  %2227 = vmatprep.subr.mxu0 %v9994_v27 }
 0x1c4   : > { %2073 = vmatpush1.msra.mxu1 %v1984_v32  ;;  %2228 = vmatpush1.msra.mxu0 %v1984_v32 }
 0x1c5   : > { %2074 = vmatprep.subr.mxu1 %v9994_v27  ;;  %2229 = vmatprep.subr.mxu0 %v9994_v27 }
 0x1c6   : > { %2075 = vmatpush1.msra.mxu1 %v1983_v24  ;;  %2230 = vmatpush1.msra.mxu0 %v1983_v24 }
 0x1c7   : > { %2076 = vmatprep.subr.mxu1 %v9994_v27  ;;  %2231 = vmatprep.subr.mxu0 %v9994_v27 }
 0x1c8   : > { %2077 = vmatpush1.msra.mxu1 %v1982_v52  ;;  %2232 = vmatpush1.msra.mxu0 %v1982_v52 }
 0x1c9   : > { %2106 = vmatprep.subr.mxu1 %v9994_v27  ;;  %2261 = vmatprep.subr.mxu0 %v9994_v27 }
 0x1ca   : > { %2107 = vmatpush2.msra.mxu1 %v1999_v31  ;;  %2262 = vmatpush2.msra.mxu0 %v1999_v31 }
 0x1cb   : > { %2108 = vmatprep.subr.mxu1 %v9994_v27  ;;  %2263 = vmatprep.subr.mxu0 %v9994_v27 }
 0x1cc   : > { %2109 = vmatpush2.msra.mxu1 %v1998_v18  ;;  %2264 = vmatpush2.msra.mxu0 %v1998_v18 }
 0x1cd   : > { %2111 = vmatmul.mubr.f32.vlgmr.msra.gmra.mxu1 %v2000_v21  ;;  %2266 = vmatmul.mubr.f32.vlgmr.msra.gmra.mxu0 %v2156_v33 }
 0x1ce   : > { %5888 = vmatprep.mubr.msk.f32.mxu1 %vm2018_vm2, %v2003_v36  ;;  %5897 = vmatprep.mubr.msk.f32.mxu0 %vm2018_vm2, %v2159_v37 }
 0x1cf   : > { %6773 = vmatprep.subr.mxu1 %v9994_v27  ;;  %6806 = vmatprep.subr.mxu0 %v9994_v27 }
 0x1d0   : > { %6774 = vmatpush3.msra.mxu1 %v2322_v39  ;;  %6807 = vmatpush3.msra.mxu0 %v2463_v42 }
 0x1d1   : > { %2116 = vmatmul.mubr.f32.gmra.mxu1 %v2002_v46  ;;  %2271 = vmatmul.mubr.f32.gmra.mxu0 %v2158_v43 }
 0x1d2   : > { %5889 = vmatprep.mubr.msk.f32.mxu1 %vm2018_vm2, %v2005_v45  ;;  %5898 = vmatprep.mubr.msk.f32.mxu0 %vm2018_vm2, %v2161_v48 }
 0x1d3   : > { %6775 = vmatprep.subr.mxu1 %v9994_v27  ;;  %6808 = vmatprep.subr.mxu0 %v9994_v27 }
 0x1d4   : > { %6776 = vmatpush3.msra.mxu1 %v2321_v12  ;;  %6809 = vmatpush3.msra.mxu0 %v2462_v16 }
 0x1d5   : > { %2121 = vmatmul.mubr.f32.gmra.mxu1 %v2004_v49  ;;  %2276 = vmatmul.mubr.f32.gmra.mxu0 %v2160_v51 }
 0x1d6   : > { %5890 = vmatprep.mubr.msk.f32.mxu1 %vm2018_vm2, %v2007_v55  ;;  %5899 = vmatprep.mubr.msk.f32.mxu0 %vm2018_vm2, %v2163_v59 }
 0x1d7   : > { %6777 = vmatprep.subr.mxu1 %v9994_v27  ;;  %6810 = vmatprep.subr.mxu0 %v9994_v27 }
 0x1d8   : > { %6778 = vmatpush3.msra.mxu1 %v2320_v41  ;;  %6811 = vmatpush3.msra.mxu0 %v2461_v54 }
 0x1d9   : > { %2126 = vmatmul.mubr.f32.gmra.mxu1 %v2006_v0  ;;  %2281 = vmatmul.mubr.f32.gmra.mxu0 %v2162_v8 }
 0x1da   : > { %5891 = vmatprep.mubr.msk.f32.mxu1 %vm2018_vm2, %v2009_v9  ;;  %5900 = vmatprep.mubr.msk.f32.mxu0 %vm2018_vm2, %v2165_v22 }
 0x1dd   : > { %2131 = vmatmul.mubr.f32.gmra.mxu1 %v2008_v7  ;;  %2286 = vmatmul.mubr.f32.gmra.mxu0 %v2164_v26 }
 0x1de   : > { %5892 = vmatprep.mubr.msk.f32.mxu1 %vm2018_vm2, %v2011_v50  ;;  %5901 = vmatprep.mubr.msk.f32.mxu0 %vm2018_vm2, %v2167_v57 }
 0x1e1   : > { %2136 = vmatmul.mubr.f32.gmra.mxu1 %v2010_v11  ;;  %2291 = vmatmul.mubr.f32.gmra.mxu0 %v2166_v19  ;;  %v2599_v11 = vld [vmem:[%s9925_s7] sm:$0xff] }
 0x1e2   : > { %5893 = vmatprep.mubr.msk.f32.mxu1 %vm2018_vm2, %v2013_v53  ;;  %5902 = vmatprep.mubr.msk.f32.mxu0 %vm2018_vm2, %v2169_v62 }
 0x1e5   : > { %2141 = vmatmul.mubr.f32.gmra.mxu1 %v2012_v20  ;;  %2296 = vmatmul.mubr.f32.gmra.mxu0 %v2168_v58 }
 0x1e6   : > { %5894 = vmatprep.mubr.msk.f32.mxu1 %vm2018_vm2, %v2015_v44  ;;  %5903 = vmatprep.mubr.msk.f32.mxu0 %vm2018_vm2, %v2171_v13 }
 0x1e9   : > { %2146 = vmatmul.mubr.f32.gmra.mxu1 %v2014_v15  ;;  %2301 = vmatmul.mubr.f32.gmra.mxu0 %v2170_v40 }
 0x1ea   : > { %5895 = vmatprep.mubr.msk.f32.mxu1 %vm2018_vm2, %v2017_v17  ;;  %5904 = vmatprep.mubr.msk.f32.mxu0 %vm2018_vm2, %v2173_v47 }
 0x1ed   : > { %2151 = vmatmul.mubr.f32.gmra.mxu1 %v2016_v4  ;;  %2306 = vmatmul.mubr.f32.gmra.mxu0 %v2172_v38 }
 0x1ee   : > { %6779 = vmatprep.mubr.msk.f32.mxu1 %vm7542_vm3, %v9994_v27  ;;  %6812 = vmatprep.mubr.msk.f32.mxu0 %vm7542_vm3, %v9994_v27 }
 0x28d   : > { %v2112_v60 = vpop.f32.mrf.mxu1  ;;  %v2267_v2 = vpop.f32.mrf.mxu0 }
 0x28e   : > { %v2311_v14 = vmax.f32 %v2112_v60, %v2267_v2 }
 0x28f   : > { %v2114_v32 = vpop.f32.mrf.mxu1  ;;  %v2269_v61 = vpop.f32.mrf.mxu0 }
 0x290   : > { %6780 = vmatmul.mubr.msk.f32.vlgmr.msra.gmra.mxu1 %vm2323_vm4, %v2311_v14  ;;  %6813 = vmatmul.mubr.msk.f32.vlgmr.msra.gmra.mxu0 %vm2323_vm4, %v2311_v14 }
 0x291   : > { %v2117_v63 = vpop.f32.mrf.mxu1  ;;  %v2272_v35 = vpop.f32.mrf.mxu0  ;;  %6782 = vmatprep.mubr.msk.f32.mxu1 %vm7542_vm3, %v9994_v27  ;;  %6815 = vmatprep.mubr.msk.f32.mxu0 %vm7542_vm3, %v9994_v27 }
 0x292   : > { %v2312_v1 = vmax.f32 %v2117_v63, %v2272_v35 }
 0x293   : > { %v2119_v34 = vpop.f32.mrf.mxu1  ;;  %v2274_v56 = vpop.f32.mrf.mxu0 }
 0x294   : > { %6783 = vmatmul.mubr.msk.f32.gmra.mxu1 %vm2323_vm4, %v2312_v1  ;;  %6816 = vmatmul.mubr.msk.f32.gmra.mxu0 %vm2323_vm4, %v2312_v1 }
 0x295   : > { %v2122_v10 = vpop.f32.mrf.mxu1  ;;  %v2277_v5 = vpop.f32.mrf.mxu0  ;;  %6785 = vmatprep.mubr.msk.f32.mxu1 %vm7542_vm3, %v9994_v27  ;;  %6818 = vmatprep.mubr.msk.f32.mxu0 %vm7542_vm3, %v9994_v27 }
 0x296   : > { %v2313_v24 = vmax.f32 %v2122_v10, %v2277_v5 }
 0x297   : > { %v2124_v3 = vpop.f32.mrf.mxu1  ;;  %v2279_v25 = vpop.f32.mrf.mxu0 }
 0x298   : > { %6786 = vmatmul.mubr.msk.f32.gmra.mxu1 %vm2323_vm4, %v2313_v24  ;;  %6819 = vmatmul.mubr.msk.f32.gmra.mxu0 %vm2323_vm4, %v2313_v24 }
 0x299   : > { %v2127_v28 = vpop.f32.mrf.mxu1  ;;  %v2282_v29 = vpop.f32.mrf.mxu0  ;;  %6788 = vmatprep.mubr.msk.f32.mxu1 %vm7542_vm3, %v9994_v27  ;;  %6821 = vmatprep.mubr.msk.f32.mxu0 %vm7542_vm3, %v9994_v27 }
 0x29a   : > { %v2314_v6 = vmax.f32 %v2127_v28, %v2282_v29 }
 0x29b   : > { %v2129_v52 = vpop.f32.mrf.mxu1  ;;  %v2284_v30 = vpop.f32.mrf.mxu0 }
 0x29c   : > { %6789 = vmatmul.mubr.msk.f32.gmra.mxu1 %vm2323_vm4, %v2314_v6  ;;  %6822 = vmatmul.mubr.msk.f32.gmra.mxu0 %vm2323_vm4, %v2314_v6 }
 0x29d   : > { %v2132_v23 = vpop.f32.mrf.mxu1  ;;  %v2287_v31 = vpop.f32.mrf.mxu0  ;;  %6791 = vmatprep.mubr.msk.f32.mxu1 %vm7542_vm3, %v9994_v27  ;;  %6824 = vmatprep.mubr.msk.f32.mxu0 %vm7542_vm3, %v9994_v27 }
 0x29e   : > { %v2315_v18 = vmax.f32 %v2132_v23, %v2287_v31 }
 0x29f   : > { %v2134_v21 = vpop.f32.mrf.mxu1  ;;  %v2289_v33 = vpop.f32.mrf.mxu0 }
 0x2a0   : > { %6792 = vmatmul.mubr.msk.f32.gmra.mxu1 %vm2323_vm4, %v2315_v18  ;;  %6825 = vmatmul.mubr.msk.f32.gmra.mxu0 %vm2323_vm4, %v2315_v18 }
 0x2a1   : > { %v2137_v36 = vpop.f32.mrf.mxu1  ;;  %v2292_v37 = vpop.f32.mrf.mxu0  ;;  %6794 = vmatprep.mubr.msk.f32.mxu1 %vm7542_vm3, %v9994_v27  ;;  %6827 = vmatprep.mubr.msk.f32.mxu0 %vm7542_vm3, %v9994_v27 }
 0x2a2   : > { %v2316_v39 = vmax.f32 %v2137_v36, %v2292_v37 }
 0x2a3   : > { %v2139_v42 = vpop.f32.mrf.mxu1  ;;  %v2294_v46 = vpop.f32.mrf.mxu0 }
 0x2a4   : > { %6795 = vmatmul.mubr.msk.f32.gmra.mxu1 %vm2323_vm4, %v2316_v39  ;;  %6828 = vmatmul.mubr.msk.f32.gmra.mxu0 %vm2323_vm4, %v2316_v39  ;;  %v3166_v42 = vld [vmem:[%s9925_s7 + $0x100] sm:$0xff]  ;;  %v2600_v46 = vld [vmem:[%s9925_s7 + $0x8] sm:$0xff] }
 0x2a5   : > { %v2142_v43 = vpop.f32.mrf.mxu1  ;;  %v2297_v45 = vpop.f32.mrf.mxu0  ;;  %6797 = vmatprep.mubr.msk.f32.mxu1 %vm7542_vm3, %v9994_v27  ;;  %6830 = vmatprep.mubr.msk.f32.mxu0 %vm7542_vm3, %v9994_v27 }
 0x2a6   : > { %v2317_v48 = vmax.f32 %v2142_v43, %v2297_v45  ;;  %v2601_v43 = vld [vmem:[%s9925_s7 + $0x10] sm:$0xff]  ;;  %v2602_v45 = vld [vmem:[%s9925_s7 + $0x18] sm:$0xff] }
 0x2a7   : > { %v2144_v49 = vpop.f32.mrf.mxu1  ;;  %v2299_v51 = vpop.f32.mrf.mxu0 }
 0x2a8   : > { %6798 = vmatmul.mubr.msk.f32.gmra.mxu1 %vm2323_vm4, %v2317_v48  ;;  %6831 = vmatmul.mubr.msk.f32.gmra.mxu0 %vm2323_vm4, %v2317_v48  ;;  %v2603_v48 = vld [vmem:[%s9925_s7 + $0x20] sm:$0xff]  ;;  %v2604_v49 = vld [vmem:[%s9925_s7 + $0x28] sm:$0xff]  ;;  %v2605_v51 = vld [vmem:[%s9925_s7 + $0x30] sm:$0xff] }
 0x2a9   : > { %v2147_v55 = vpop.f32.mrf.mxu1  ;;  %v2302_v59 = vpop.f32.mrf.mxu0  ;;  %6800 = vmatprep.mubr.msk.f32.mxu1 %vm7542_vm3, %v9994_v27  ;;  %6833 = vmatprep.mubr.msk.f32.mxu0 %vm7542_vm3, %v9994_v27 }
 0x2aa   : > { %v2318_v0 = vmax.f32 %v2147_v55, %v2302_v59  ;;  %v2606_v55 = vld [vmem:[%s9925_s7 + $0x38] sm:$0xff]  ;;  %v2607_v59 = vld [vmem:[%s9925_s7 + $0x40] sm:$0xff] }
 0x2ab   : > { %v2149_v8 = vpop.f32.mrf.mxu1  ;;  %v2304_v9 = vpop.f32.mrf.mxu0 }
 0x2ac   : > { %6801 = vmatmul.mubr.msk.f32.gmra.mxu1 %vm2323_vm4, %v2318_v0  ;;  %6834 = vmatmul.mubr.msk.f32.gmra.mxu0 %vm2323_vm4, %v2318_v0  ;;  %v2608_v0 = vld [vmem:[%s9925_s7 + $0x48] sm:$0xff]  ;;  %v2609_v8 = vld [vmem:[%s9925_s7 + $0x50] sm:$0xff]  ;;  %v2610_v9 = vld [vmem:[%s9925_s7 + $0x58] sm:$0xff] }
 0x2ad   : > { %v2152_v22 = vpop.f32.mrf.mxu1  ;;  %v2307_v7 = vpop.f32.mrf.mxu0  ;;  %6803 = vmatprep.mubr.msk.f32.mxu1 %vm7542_vm3, %v9994_v27  ;;  %6836 = vmatprep.mubr.msk.f32.mxu0 %vm7542_vm3, %v9994_v27 }
 0x2ae   : > { %v2319_v26 = vmax.f32 %v2152_v22, %v2307_v7  ;;  %v2611_v22 = vld [vmem:[%s9925_s7 + $0x60] sm:$0xff]  ;;  %v2612_v7 = vld [vmem:[%s9925_s7 + $0x68] sm:$0xff] }
 0x2af   : > { %v2154_v50 = vpop.f32.mrf.mxu1  ;;  %v2309_v57 = vpop.f32.mrf.mxu0 }
 0x2b0   : > { %6804 = vmatmul.mubr.msk.f32.gmra.mxu1 %vm2323_vm4, %v2319_v26  ;;  %6837 = vmatmul.mubr.msk.f32.gmra.mxu0 %vm2323_vm4, %v2319_v26  ;;  %v2613_v26 = vld [vmem:[%s9925_s7 + $0x70] sm:$0xff]  ;;  %v2614_v50 = vld [vmem:[%s9925_s7 + $0x78] sm:$0xff] }
 0x2b1   : > { %6857 = vmatprep.mubr.msk.f32.mxu1 %vm2615_vm5, %v2599_v11  ;;  %6941 = vmatprep.mubr.msk.f32.mxu0 %vm2615_vm5, %v3166_v42  ;;  %v2597_v57 = vld [vmem:[%s9926_s8 + $0x70] sm:$0xff]  ;;  %v2905_v11 = vld [vmem:[%s9925_s7 + $0x80] sm:$0xff]  ;;  %v3169_v42 = vld [vmem:[%s9925_s7 + $0x118] sm:$0xff] }
 0x350   : > { %v2417_v19 = vpop.f32.mrf.mxu1  ;;  %v2530_v53 = vpop.f32.mrf.mxu0 }
 0x351   : > { %v8571_v39 = vmax.f32 %v2417_v19, %v2530_v53  ;;  %v2595_v19 = vld [vmem:[%s9926_s8 + $0x60] sm:$0xff]  ;;  %v2593_v53 = vld [vmem:[%s9926_s8 + $0x50] sm:$0xff] }
 0x352   : > { %v6781_v62 = vpop.f32.mrf.mxu1  ;;  %v6814_v20 = vpop.f32.mrf.mxu0 }
 0x353   : > { %v2598_v62 = vld [vmem:[%s9926_s8 + $0x78] sm:$0xff]  ;;  %v2591_v20 = vld [vmem:[%s9926_s8 + $0x40] sm:$0xff] }
 0x354   : > { %v2422_v58 = vpop.f32.mrf.mxu1  ;;  %v2535_v44 = vpop.f32.mrf.mxu0 }
 0x355   : > { %v8562_v21 = vmax.f32 %v2422_v58, %v2535_v44  ;;  %v2596_v58 = vld [vmem:[%s9926_s8 + $0x68] sm:$0xff]  ;;  %v2589_v44 = vld [vmem:[%s9926_s8 + $0x30] sm:$0xff] }
 0x356   : > { %v6784_v13 = vpop.f32.mrf.mxu1  ;;  %v6817_v15 = vpop.f32.mrf.mxu0 }
 0x357   : > { %v2594_v13 = vld [vmem:[%s9926_s8 + $0x58] sm:$0xff]  ;;  %v2587_v15 = vld [vmem:[%s9926_s8 + $0x20] sm:$0xff] }
 0x358   : > { %v2427_v40 = vpop.f32.mrf.mxu1  ;;  %v2540_v17 = vpop.f32.mrf.mxu0 }
 0x359   : > { %v8538_v47 = vmax.f32 %v2427_v40, %v2540_v17  ;;  %v2592_v40 = vld [vmem:[%s9926_s8 + $0x48] sm:$0xff]  ;;  %v2585_v17 = vld [vmem:[%s9926_s8 + $0x10] sm:$0xff] }
 0x35a   : > { %v6787_v4 = vpop.f32.mrf.mxu1  ;;  %v6820_v38 = vpop.f32.mrf.mxu0 }
 0x35b   : > { %2934 = vrot.lane.b32.xlu0 %v8538_v47, %s10026_s3  ;;  %v2583_v4 = vld [vmem:[%s9926_s8] sm:$0xff]  ;;  %v2588_v38 = vld [vmem:[%s9926_s8 + $0x28] sm:$0xff] }
 0x35c   : > { %v2432_v12 = vpop.f32.mrf.mxu1  ;;  %v2545_v16 = vpop.f32.mrf.mxu0 }
 0x35d   : > { %v8542_v41 = vmax.f32 %v2432_v12, %v2545_v16  ;;  %v2586_v12 = vld [vmem:[%s9926_s8 + $0x18] sm:$0xff]  ;;  %v2584_v16 = vld [vmem:[%s9926_s8 + $0x8] sm:$0xff] }
 0x35e   : > { %v6790_v54 = vpop.f32.mrf.mxu1  ;;  %v6823_v60 = vpop.f32.mrf.mxu0 }
 0x35f   : > { %2936 = vrot.lane.b32.xlu0 %v8542_v41, %s10026_s3 }
 0x360   : > { %v2437_v2 = vpop.f32.mrf.mxu1  ;;  %v2550_v14 = vpop.f32.mrf.mxu0 }
 0x361   : > { %v8546_v32 = vmax.f32 %v2437_v2, %v2550_v14 }
 0x362   : > { %v6793_v61 = vpop.f32.mrf.mxu1  ;;  %v6826_v63 = vpop.f32.mrf.mxu0 }
 0x363   : > { %3190 = vrot.lane.b32.xlu1 %v8546_v32, %s10027_s28  ;;  %2938 = vrot.lane.b32.xlu0 %v8546_v32, %s10026_s3 }
 0x364   : > { %v2442_v35 = vpop.f32.mrf.mxu1  ;;  %v2555_v1 = vpop.f32.mrf.mxu0 }
 0x365   : > { %v8552_v34 = vmax.f32 %v2442_v35, %v2555_v1 }
 0x366   : > { %v6796_v56 = vpop.f32.mrf.mxu1  ;;  %v6829_v10 = vpop.f32.mrf.mxu0 }
 0x367   : > { %3192 = vrot.lane.b32.xlu1 %v8552_v34, %s10027_s28  ;;  %2940 = vrot.lane.b32.xlu0 %v8552_v34, %s10026_s3 }
 0x368   : > { %v2447_v5 = vpop.f32.mrf.mxu1  ;;  %v2560_v24 = vpop.f32.mrf.mxu0 }
 0x369   : > { %v2580_v3 = vmax.f32 %v2447_v5, %v2560_v24 }
 0x36a   : > { %v6799_v25 = vpop.f32.mrf.mxu1  ;;  %v6832_v28 = vpop.f32.mrf.mxu0 }
 0x36b   : > { %3194 = vrot.lane.b32.xlu1 %v2580_v3, %s10027_s28  ;;  %2942 = vrot.lane.b32.xlu0 %v2580_v3, %s10026_s3 }
 0x36c   : > { %v2452_v29 = vpop.f32.mrf.mxu1  ;;  %v2565_v6 = vpop.f32.mrf.mxu0 }
 0x36d   : > { %v2581_v52 = vmax.f32 %v2452_v29, %v2565_v6  ;;  %v2906_v29 = vld [vmem:[%s9925_s7 + $0x88] sm:$0xff] }
 0x36e   : > { %v6802_v30 = vpop.f32.mrf.mxu1  ;;  %v6835_v23 = vpop.f32.mrf.mxu0 }
 0x36f   : > { %3196 = vrot.lane.b32.xlu1 %v2581_v52, %s10027_s28  ;;  %2944 = vrot.lane.b32.xlu0 %v2581_v52, %s10026_s3  ;;  %v2908_v23 = vld [vmem:[%s9925_s7 + $0x98] sm:$0xff] }
 0x370   : > { %v2457_v31 = vpop.f32.mrf.mxu1  ;;  %v2570_v18 = vpop.f32.mrf.mxu0 }
 0x371   : > { %v8564_v33 = vmax.f32 %v2457_v31, %v2570_v18  ;;  %v3167_v18 = vld [vmem:[%s9925_s7 + $0x108] sm:$0xff] }
 0x372   : > { %v6805_v36 = vpop.f32.mrf.mxu1  ;;  %v6838_v37 = vpop.f32.mrf.mxu0 }
 0x373   : > { %2932 = vrot.lane.b32.xlu0 %v8562_v21, %s10026_s3  ;;  %2946 = vrot.lane.b32.xlu1 %v8564_v33, %s10026_s3  ;;  %v2910_v36 = vld [vmem:[%s9925_s7 + $0xa8] sm:$0xff] }
 0x374   : > { %6839 = vmatprep.subr.mxu1 %v8564_v33 }
 0x375   : > { %6840 = vmatpush3.msra.mxu1 %v8564_v33 }
 0x376   : > { %6841 = vmatprep.subr.mxu1 %v2581_v52 }
 0x377   : > { %6842 = vmatpush3.msra.mxu1 %v2581_v52  ;;  %2930 = vrot.lane.b32.xlu0 %v8571_v39, %s10026_s3 }
 0x378   : > { %3198 = vrot.lane.b32.xlu1 %v8564_v33, %s10027_s28  ;;  %6843 = vmatprep.subr.mxu1 %v2580_v3 }
 0x379   : > { %6844 = vmatpush3.msra.mxu1 %v2580_v3 }
 0x37a   : > { %6845 = vmatprep.subr.mxu1 %v8552_v34 }
 0x37b   : > { %6846 = vmatpush3.msra.mxu1 %v8552_v34  ;;  %3182 = vrot.lane.b32.xlu0 %v8571_v39, %s10027_s28 }
 0x37c   : > { %3188 = vrot.lane.b32.xlu1 %v8542_v41, %s10027_s28  ;;  %6847 = vmatprep.subr.mxu1 %v8546_v32 }
 0x37d   : > { %6848 = vmatpush3.msra.mxu1 %v8546_v32 }
 0x37e   : > { %6849 = vmatprep.subr.mxu1 %v8542_v41 }
 0x37f   : > { %6850 = vmatpush3.msra.mxu1 %v8542_v41  ;;  %3448 = vrot.lane.b32.xlu0 %v2581_v52, %s10028_s29 }
 0x380   : > { %3186 = vrot.lane.b32.xlu1 %v8538_v47, %s10027_s28  ;;  %6851 = vmatprep.subr.mxu1 %v8538_v47 }
 0x381   : > { %6852 = vmatpush3.msra.mxu1 %v8538_v47 }
 0x382   : > { %6853 = vmatprep.subr.mxu1 %v8562_v21 }
 0x383   : > { %6854 = vmatpush3.msra.mxu1 %v8562_v21  ;;  %3446 = vrot.lane.b32.xlu0 %v2580_v3, %s10028_s29 }
 0x384   : > { %3184 = vrot.lane.b32.xlu1 %v8562_v21, %s10027_s28  ;;  %6855 = vmatprep.subr.mxu1 %v8571_v39 }
 0x385   : > { %6856 = vmatpush3.msra.mxu1 %v8571_v39 }
 0x386   : > { %6858 = vmatmul.mubr.msk.f32.vlgmr.msra.gmra.mxu1 %vm2615_vm5, %v2600_v46  ;;  %v2911_v46 = vld [vmem:[%s9925_s7 + $0xb0] sm:$0xff] }
 0x387   : > { %3444 = vrot.lane.b32.xlu0 %v8552_v34, %s10028_s29  ;;  %6860 = vmatprep.mubr.msk.f32.mxu1 %vm2615_vm5, %v2601_v43  ;;  %v3170_v43 = vld [vmem:[%s9925_s7 + $0x120] sm:$0xff] }
 0x388   : > { %3700 = vrot.lane.b32.xlu1 %v2581_v52, %s10029_s26  ;;  %v2907_v52 = vld [vmem:[%s9925_s7 + $0x90] sm:$0xff] }
 0x38a   : > { %6861 = vmatmul.mubr.msk.f32.gmra.mxu1 %vm2615_vm5, %v2602_v45  ;;  %v2912_v45 = vld [vmem:[%s9925_s7 + $0xb8] sm:$0xff] }
 0x38b   : > { %3442 = vrot.lane.b32.xlu0 %v8546_v32, %s10028_s29  ;;  %6863 = vmatprep.mubr.msk.f32.mxu1 %vm2615_vm5, %v2603_v48 }
 0x38c   : > { %3698 = vrot.lane.b32.xlu1 %v2580_v3, %s10029_s26 }
 0x38e   : > { %6864 = vmatmul.mubr.msk.f32.gmra.mxu1 %vm2615_vm5, %v2604_v49  ;;  %v3171_v49 = vld [vmem:[%s9925_s7 + $0x128] sm:$0xff] }
 0x38f   : > { %3440 = vrot.lane.b32.xlu0 %v8542_v41, %s10028_s29  ;;  %6866 = vmatprep.mubr.msk.f32.mxu1 %vm2615_vm5, %v2605_v51  ;;  %v2913_v51 = vld [vmem:[%s9925_s7 + $0xc0] sm:$0xff] }
 0x390   : > { %3696 = vrot.lane.b32.xlu1 %v8552_v34, %s10029_s26 }
 0x392   : > { %6867 = vmatmul.mubr.msk.f32.gmra.mxu1 %vm2615_vm5, %v2606_v55  ;;  %v3172_v55 = vld [vmem:[%s9925_s7 + $0x130] sm:$0xff] }
 0x393   : > { %3438 = vrot.lane.b32.xlu0 %v8538_v47, %s10028_s29  ;;  %6869 = vmatprep.mubr.msk.f32.mxu1 %vm2615_vm5, %v2607_v59 }
 0x394   : > { %3450 = vrot.lane.b32.xlu1 %v8564_v33, %s10028_s29 }
 0x396   : > { %6870 = vmatmul.mubr.msk.f32.gmra.mxu1 %vm2615_vm5, %v2608_v0 }
 0x397   : > { %3436 = vrot.lane.b32.xlu0 %v8562_v21, %s10028_s29  ;;  %6872 = vmatprep.mubr.msk.f32.mxu1 %vm2615_vm5, %v2609_v8  ;;  %v2914_v8 = vld [vmem:[%s9925_s7 + $0xc8] sm:$0xff] }
 0x398   : > { %3702 = vrot.lane.b32.xlu1 %v8564_v33, %s10029_s26  ;;  %v3168_v33 = vld [vmem:[%s9925_s7 + $0x110] sm:$0xff] }
 0x39a   : > { %6873 = vmatmul.mubr.msk.f32.gmra.mxu1 %vm2615_vm5, %v2610_v9  ;;  %v3173_v9 = vld [vmem:[%s9925_s7 + $0x138] sm:$0xff] }
 0x39b   : > { %3434 = vrot.lane.b32.xlu0 %v8571_v39, %s10028_s29  ;;  %6875 = vmatprep.mubr.msk.f32.mxu1 %vm2615_vm5, %v2611_v22  ;;  %v2915_v22 = vld [vmem:[%s9925_s7 + $0xd0] sm:$0xff] }
 0x39c   : > { %3694 = vrot.lane.b32.xlu1 %v8546_v32, %s10029_s26 }
 0x39e   : > { %6876 = vmatmul.mubr.msk.f32.gmra.mxu1 %vm2615_vm5, %v2612_v7  ;;  %v3174_v7 = vld [vmem:[%s9925_s7 + $0x140] sm:$0xff] }
 0x39f   : > { %3686 = vrot.lane.b32.xlu0 %v8571_v39, %s10029_s26  ;;  %6878 = vmatprep.mubr.msk.f32.mxu1 %vm2615_vm5, %v2613_v26 }
 0x3a0   : > { %3692 = vrot.lane.b32.xlu1 %v8542_v41, %s10029_s26 }
 0x3a2   : > { %6879 = vmatmul.mubr.msk.f32.gmra.mxu1 %vm2615_vm5, %v2614_v50 }
 0x3a3   : > { %2881 = vperm.xlu0 %7520, %v2597_v57   ;;  %6899 = vmatprep.mubr.msk.f32.mxu1 %vm2615_vm5, %v2905_v11  ;;  %v2916_v57 = vld [vmem:[%s9925_s7 + $0xd8] sm:$0xff]  ;;  %v3175_v11 = vld [vmem:[%s9925_s7 + $0x148] sm:$0xff] }
 0x3a4   : > { %3690 = vrot.lane.b32.xlu1 %v8538_v47, %s10029_s26  ;;  %v2590_v47 = vld [vmem:[%s9926_s8 + $0x38] sm:$0xff] }
 0x3a7   : > { %2871 = vperm.xlu0 %7520, %v2595_v19  }
 0x3a8   : > { %3688 = vrot.lane.b32.xlu1 %v8562_v21, %s10029_s26  ;;  %v2909_v21 = vld [vmem:[%s9925_s7 + $0xa0] sm:$0xff] }
 0x3ab   : > { %2861 = vperm.xlu0 %7520, %v2593_v53   ;;  %v2917_v53 = vld [vmem:[%s9925_s7 + $0xe0] sm:$0xff] }
 0x3ac   : > { %2886 = vperm.xlu1 %7521, %v2598_v62   ;;  %v3176_v62 = vld [vmem:[%s9925_s7 + $0x150] sm:$0xff] }
 0x3af   : > { %2851 = vperm.xlu0 %7520, %v2591_v20  }
 0x3b0   : > { %2876 = vperm.xlu1 %7521, %v2596_v58   ;;  %v2918_v58 = vld [vmem:[%s9925_s7 + $0xe8] sm:$0xff] }
 0x3b3   : > { %2841 = vperm.xlu0 %7520, %v2589_v44   ;;  %v3177_v44 = vld [vmem:[%s9925_s7 + $0x158] sm:$0xff] }
 0x3b4   : > { %2866 = vperm.xlu1 %7521, %v2594_v13  }
 0x3b7   : > { %2831 = vperm.xlu0 %7520, %v2587_v15   ;;  %v2919_v15 = vld [vmem:[%s9925_s7 + $0xf0] sm:$0xff] }
 0x3b8   : > { %2856 = vperm.xlu1 %7521, %v2592_v40   ;;  %v3178_v40 = vld [vmem:[%s9925_s7 + $0x160] sm:$0xff] }
 0x3bb   : > { %2821 = vperm.xlu0 %7520, %v2585_v17  }
 0x3bc   : > { %2846 = vperm.xlu1 %7521, %v2590_v47   ;;  %v2920_v47 = vld [vmem:[%s9925_s7 + $0xf8] sm:$0xff] }
 0x3bf   : > { %2811 = vperm.xlu0 %7520, %v2583_v4   ;;  %v3179_v4 = vld [vmem:[%s9925_s7 + $0x168] sm:$0xff] }
 0x3c0   : > { %2836 = vperm.xlu1 %7521, %v2588_v38  }
 0x3c4   : > { %2826 = vperm.xlu1 %7521, %v2586_v12   ;;  %v3180_v12 = vld [vmem:[%s9925_s7 + $0x170] sm:$0xff] }
 0x3c8   : > { %2816 = vperm.xlu1 %7521, %v2584_v16  }
 0x3cd   : > { %v2935_v41 = vpop.permute.xlu0 %2934 }
 0x3d1   : > { %v2937_v54 = vpop.permute.xlu0 %2936 }
 0x3d5   : > { %v3191_v60 = vpop.permute.xlu1 %3190  ;;  %v2939_v2 = vpop.permute.xlu0 %2938 }
 0x3d9   : > { %v3193_v14 = vpop.permute.xlu1 %3192  ;;  %v2941_v32 = vpop.permute.xlu0 %2940 }
 0x3dd   : > { %v3195_v61 = vpop.permute.xlu1 %3194  ;;  %v2943_v63 = vpop.permute.xlu0 %2942 }
 0x3e1   : > { %v3197_v35 = vpop.permute.xlu1 %3196  ;;  %v2945_v1 = vpop.permute.xlu0 %2944 }
 0x3e5   : > { %v2933_v34 = vpop.permute.xlu0 %2932  ;;  %v2947_v56 = vpop.permute.xlu1 %2946 }
 0x3e6   : > { %6881 = vmatprep.subr.mxu1 %v2947_v56 }
 0x3e7   : > { %6882 = vmatpush3.msra.mxu1 %v2947_v56  ;;  %v3423_v56 = vld [vmem:[%s9925_s7 + $0x1a8] sm:$0xff] }
 0x3e8   : > { %6883 = vmatprep.subr.mxu1 %v2945_v1 }
 0x3e9   : > { %v2931_v10 = vpop.permute.xlu0 %2930  ;;  %6884 = vmatpush3.msra.mxu1 %v2945_v1  ;;  %v3422_v1 = vld [vmem:[%s9925_s7 + $0x1a0] sm:$0xff] }
 0x3ea   : > { %v3199_v5 = vpop.permute.xlu1 %3198  ;;  %6885 = vmatprep.subr.mxu1 %v2943_v63 }
 0x3eb   : > { %6923 = vmatprep.subr.mxu0 %v3199_v5  ;;  %6886 = vmatpush3.msra.mxu1 %v2943_v63 }
 0x3ec   : > { %6924 = vmatpush3.msra.mxu0 %v3199_v5  ;;  %6887 = vmatprep.subr.mxu1 %v2941_v32  ;;  %v3424_v5 = vld [vmem:[%s9925_s7 + $0x1b0] sm:$0xff] }
 0x3ed   : > { %6925 = vmatprep.subr.mxu0 %v3197_v35  ;;  %v3183_v24 = vpop.permute.xlu0 %3182  ;;  %6888 = vmatpush3.msra.mxu1 %v2941_v32  ;;  %v3670_v32 = vld [vmem:[%s9925_s7 + $0x200] sm:$0xff] }
 0x3ee   : > { %6926 = vmatpush3.msra.mxu0 %v3197_v35  ;;  %v3189_v3 = vpop.permute.xlu1 %3188  ;;  %6889 = vmatprep.subr.mxu1 %v2939_v2  ;;  %v3671_v35 = vld [vmem:[%s9925_s7 + $0x208] sm:$0xff] }
 0x3ef   : > { %6927 = vmatprep.subr.mxu0 %v3195_v61  ;;  %6890 = vmatpush3.msra.mxu1 %v2939_v2 }
 0x3f0   : > { %6928 = vmatpush3.msra.mxu0 %v3195_v61  ;;  %6891 = vmatprep.subr.mxu1 %v2937_v54  ;;  %v3421_v61 = vld [vmem:[%s9925_s7 + $0x198] sm:$0xff] }
 0x3f1   : > { %6929 = vmatprep.subr.mxu0 %v3193_v14  ;;  %6892 = vmatpush3.msra.mxu1 %v2937_v54  ;;  %v8746_v25 = vpop.permute.xlu0 %3448  ;;  %v3181_v54 = vld [vmem:[%s9925_s7 + $0x178] sm:$0xff] }
 0x3f2   : > { %6930 = vmatpush3.msra.mxu0 %v3193_v14  ;;  %v3187_v28 = vpop.permute.xlu1 %3186  ;;  %6893 = vmatprep.subr.mxu1 %v2935_v41  ;;  %v3420_v14 = vld [vmem:[%s9925_s7 + $0x190] sm:$0xff] }
 0x3f3   : > { %6931 = vmatprep.subr.mxu0 %v3191_v60  ;;  %6894 = vmatpush3.msra.mxu1 %v2935_v41  ;;  %v3418_v41 = vld [vmem:[%s9925_s7 + $0x180] sm:$0xff] }
 0x3f4   : > { %6932 = vmatpush3.msra.mxu0 %v3191_v60  ;;  %6895 = vmatprep.subr.mxu1 %v2933_v34  ;;  %v3419_v60 = vld [vmem:[%s9925_s7 + $0x188] sm:$0xff] }
 0x3f5   : > { %6933 = vmatprep.subr.mxu0 %v3189_v3  ;;  %6896 = vmatpush3.msra.mxu1 %v2933_v34  ;;  %v3447_v30 = vpop.permute.xlu0 %3446  ;;  %v3672_v34 = vld [vmem:[%s9925_s7 + $0x210] sm:$0xff] }
 0x3f6   : > { %6934 = vmatpush3.msra.mxu0 %v3189_v3  ;;  %v3185_v6 = vpop.permute.xlu1 %3184  ;;  %6897 = vmatprep.subr.mxu1 %v2931_v10  ;;  %v3425_v3 = vld [vmem:[%s9925_s7 + $0x1b8] sm:$0xff] }
 0x3f7   : > { %6935 = vmatprep.subr.mxu0 %v3187_v28  ;;  %6898 = vmatpush3.msra.mxu1 %v2931_v10  ;;  %v3673_v10 = vld [vmem:[%s9925_s7 + $0x218] sm:$0xff] }
 0x3f8   : > { %6936 = vmatpush3.msra.mxu0 %v3187_v28  ;;  %6900 = vmatmul.mubr.msk.f32.vlgmr.msra.gmra.mxu1 %vm2615_vm5, %v2906_v29  ;;  %v3426_v28 = vld [vmem:[%s9925_s7 + $0x1c0] sm:$0xff]  ;;  %v3676_v29 = vld [vmem:[%s9925_s7 + $0x230] sm:$0xff] }
 0x3f9   : > { %6937 = vmatprep.subr.mxu0 %v3185_v6  ;;  %6902 = vmatprep.mubr.msk.f32.mxu1 %vm2615_vm5, %v2907_v52  ;;  %v3445_v37 = vpop.permute.xlu0 %3444  ;;  %v3677_v52 = vld [vmem:[%s9925_s7 + $0x238] sm:$0xff] }
 0x3fa   : > { %6938 = vmatpush3.msra.mxu0 %v3185_v6  ;;  %v3701_v31 = vpop.permute.xlu1 %3700  ;;  %v3427_v6 = vld [vmem:[%s9925_s7 + $0x1c8] sm:$0xff] }
 0x3fb   : > { %6939 = vmatprep.subr.mxu0 %v3183_v24 }
 0x3fc   : > { %6940 = vmatpush3.msra.mxu0 %v3183_v24  ;;  %6903 = vmatmul.mubr.msk.f32.gmra.mxu1 %vm2615_vm5, %v2908_v23  ;;  %v3674_v24 = vld [vmem:[%s9925_s7 + $0x220] sm:$0xff] }
 0x3fd   : > { %6942 = vmatmul.mubr.msk.f32.vlgmr.msra.gmra.mxu0 %vm2615_vm5, %v3167_v18  ;;  %6905 = vmatprep.mubr.msk.f32.mxu1 %vm2615_vm5, %v2909_v21  ;;  %v3443_v59 = vpop.permute.xlu0 %3442  ;;  %v3678_v23 = vld [vmem:[%s9925_s7 + $0x240] sm:$0xff]  ;;  %v3679_v18 = vld [vmem:[%s9925_s7 + $0x248] sm:$0xff] }
 0x3fe   : > { %v3699_v39 = vpop.permute.xlu1 %3698  ;;  %6944 = vmatprep.mubr.msk.f32.mxu0 %vm2615_vm5, %v3168_v33  ;;  %v3430_v21 = vld [vmem:[%s9925_s7 + $0x1e0] sm:$0xff]  ;;  %v3680_v33 = vld [vmem:[%s9925_s7 + $0x250] sm:$0xff] }
 0x400   : > { %6906 = vmatmul.mubr.msk.f32.gmra.mxu1 %vm2615_vm5, %v2910_v36  ;;  %v3431_v36 = vld [vmem:[%s9925_s7 + $0x1e8] sm:$0xff] }
 0x401   : > { %6945 = vmatmul.mubr.msk.f32.gmra.mxu0 %vm2615_vm5, %v3169_v42  ;;  %6908 = vmatprep.mubr.msk.f32.mxu1 %vm2615_vm5, %v2911_v46  ;;  %v3441_v26 = vpop.permute.xlu0 %3440  ;;  %v3682_v42 = vld [vmem:[%s9925_s7 + $0x260] sm:$0xff]  ;;  %v3433_v46 = vld [vmem:[%s9925_s7 + $0x1f8] sm:$0xff] }
 0x402   : > { %v3697_v48 = vpop.permute.xlu1 %3696  ;;  %6947 = vmatprep.mubr.msk.f32.mxu0 %vm2615_vm5, %v3170_v43  ;;  %v3683_v43 = vld [vmem:[%s9925_s7 + $0x268] sm:$0xff] }
 0x404   : > { %6909 = vmatmul.mubr.msk.f32.gmra.mxu1 %vm2615_vm5, %v2912_v45  ;;  %v3684_v45 = vld [vmem:[%s9925_s7 + $0x270] sm:$0xff] }
 0x405   : > { %6948 = vmatmul.mubr.msk.f32.gmra.mxu0 %vm2615_vm5, %v3171_v49  ;;  %6911 = vmatprep.mubr.msk.f32.mxu1 %vm2615_vm5, %v2913_v51  ;;  %v3439_v20 = vpop.permute.xlu0 %3438 }
 0x406   : > { %v3451_v0 = vpop.permute.xlu1 %3450  ;;  %6950 = vmatprep.mubr.msk.f32.mxu0 %vm2615_vm5, %v3172_v55 }
 0x407   : > { %6965 = vmatprep.subr.mxu1 %v3451_v0 }
 0x408   : > { %6966 = vmatpush3.msra.mxu1 %v3451_v0 }
 0x409   : > { %6912 = vmatmul.mubr.msk.f32.gmra.mxu1 %vm2615_vm5, %v2914_v8  ;;  %6951 = vmatmul.mubr.msk.f32.gmra.mxu0 %vm2615_vm5, %v3173_v9  ;;  %v3437_v17 = vpop.permute.xlu0 %3436 }
 0x40a   : > { %6967 = vmatprep.subr.mxu1 %v8746_v25  ;;  %v3703_v50 = vpop.permute.xlu1 %3702  ;;  %6914 = vmatprep.mubr.msk.f32.mxu1 %vm2615_vm5, %v2915_v22 }
 0x40b   : > { %6968 = vmatpush3.msra.mxu1 %v8746_v25  ;;  %7007 = vmatprep.subr.mxu0 %v3703_v50  ;;  %v3675_v25 = vld [vmem:[%s9925_s7 + $0x228] sm:$0xff] }
 0x40c   : > { %6969 = vmatprep.subr.mxu1 %v3447_v30  ;;  %6953 = vmatprep.mubr.msk.f32.mxu0 %vm2615_vm5, %v3174_v7 }
 0x40d   : > { %6970 = vmatpush3.msra.mxu1 %v3447_v30  ;;  %7008 = vmatpush3.msra.mxu0 %v3703_v50  ;;  %v3435_v16 = vpop.permute.xlu0 %3434  ;;  %v3428_v30 = vld [vmem:[%s9925_s7 + $0x1d0] sm:$0xff] }
 0x40e   : > { %6915 = vmatmul.mubr.msk.f32.gmra.mxu1 %vm2615_vm5, %v2916_v57  ;;  %6954 = vmatmul.mubr.msk.f32.gmra.mxu0 %vm2615_vm5, %v3175_v11  ;;  %v3695_v19 = vpop.permute.xlu1 %3694 }
 0x40f   : > { %6971 = vmatprep.subr.mxu1 %v3445_v37  ;;  %7009 = vmatprep.subr.mxu0 %v3701_v31 }
 0x410   : > { %7010 = vmatpush3.msra.mxu0 %v3701_v31  ;;  %6972 = vmatpush3.msra.mxu1 %v3445_v37  ;;  %v3429_v31 = vld [vmem:[%s9925_s7 + $0x1d8] sm:$0xff] }
 0x411   : > { %6973 = vmatprep.subr.mxu1 %v3443_v59  ;;  %7011 = vmatprep.subr.mxu0 %v3699_v39  ;;  %v3687_v63 = vpop.permute.xlu0 %3686  ;;  %v3681_v37 = vld [vmem:[%s9925_s7 + $0x258] sm:$0xff] }
 0x412   : > { %6917 = vmatprep.mubr.msk.f32.mxu1 %vm2615_vm5, %v2917_v53  ;;  %6956 = vmatprep.mubr.msk.f32.mxu0 %vm2615_vm5, %v3176_v62  ;;  %v3693_v13 = vpop.permute.xlu1 %3692  ;;  %v3922_v62 = vld [vmem:[%s9927_s9] sm:$0xff] }
 0x413   : > { %6974 = vmatpush3.msra.mxu1 %v3443_v59  ;;  %7012 = vmatpush3.msra.mxu0 %v3699_v39  ;;  %v3432_v39 = vld [vmem:[%s9925_s7 + $0x1f0] sm:$0xff] }
 0x414   : > { %6918 = vmatmul.mubr.msk.f32.gmra.mxu1 %vm2615_vm5, %v2918_v58  ;;  %6957 = vmatmul.mubr.msk.f32.gmra.mxu0 %vm2615_vm5, %v3177_v44 }
 0x415   : > { %6975 = vmatprep.subr.mxu1 %v3441_v26  ;;  %7013 = vmatprep.subr.mxu0 %v3697_v48 }
 0x416   : > { %7014 = vmatpush3.msra.mxu0 %v3697_v48  ;;  %6976 = vmatpush3.msra.mxu1 %v3441_v26  ;;  %v3691_v38 = vpop.permute.xlu1 %3690  ;;  %v3685_v48 = vld [vmem:[%s9925_s7 + $0x278] sm:$0xff] }
 0x417   : > { %6977 = vmatprep.subr.mxu1 %v3439_v20  ;;  %7015 = vmatprep.subr.mxu0 %v3695_v19 }
 0x418   : > { %6920 = vmatprep.mubr.msk.f32.mxu1 %vm2615_vm5, %v2919_v15  ;;  %6959 = vmatprep.mubr.msk.f32.mxu0 %vm2615_vm5, %v3178_v40 }
 0x419   : > { %6978 = vmatpush3.msra.mxu1 %v3439_v20  ;;  %7016 = vmatpush3.msra.mxu0 %v3695_v19  ;;  %v4035_v20 = vld [vmem:[%s9928_s10] sm:$0xff] }
 0x41a   : > { %6921 = vmatmul.mubr.msk.f32.gmra.mxu1 %vm2615_vm5, %v2920_v47  ;;  %6960 = vmatmul.mubr.msk.f32.gmra.mxu0 %vm2615_vm5, %v3179_v4  ;;  %v3689_v2 = vpop.permute.xlu1 %3688 }
 0x41b   : > { %6979 = vmatprep.subr.mxu1 %v3437_v17  ;;  %7017 = vmatprep.subr.mxu0 %v3693_v13 }
 0x41c   : > { %7018 = vmatpush3.msra.mxu0 %v3693_v13  ;;  %6980 = vmatpush3.msra.mxu1 %v3437_v17 }
 0x41d   : > { %6981 = vmatprep.subr.mxu1 %v3435_v16  ;;  %7019 = vmatprep.subr.mxu0 %v3691_v38 }
 0x41e   : > { %6962 = vmatprep.mubr.msk.f32.mxu0 %vm2615_vm5, %v3180_v12  ;;  %6982 = vmatpush3.msra.mxu1 %v3435_v16 }
 0x41f   : > { %6983 = vmatprep.mubr.msk.f32.mxu1 %vm2615_vm5, %v3418_v41  ;;  %7020 = vmatpush3.msra.mxu0 %v3691_v38 }
 0x420   : > { %6963 = vmatmul.mubr.msk.f32.gmra.mxu0 %vm2615_vm5, %v3181_v54  ;;  %6984 = vmatmul.mubr.msk.f32.vlgmr.msra.gmra.mxu1 %vm2615_vm5, %v3419_v60 }
 0x421   : > { %7021 = vmatprep.subr.mxu0 %v3689_v2  ;;  %6986 = vmatprep.mubr.msk.f32.mxu1 %vm2615_vm5, %v3420_v14 }
 0x422   : > { %7022 = vmatpush3.msra.mxu0 %v3689_v2  ;;  %7025 = vmatprep.mubr.msk.f32.mxu0 %vm2615_vm5, %v3670_v32 }
 0x423   : > { %7023 = vmatprep.subr.mxu0 %v3687_v63 }
 0x424   : > { %6987 = vmatmul.mubr.msk.f32.gmra.mxu1 %vm2615_vm5, %v3421_v61  ;;  %7024 = vmatpush3.msra.mxu0 %v3687_v63 }
 0x425   : > { %7026 = vmatmul.mubr.msk.f32.vlgmr.msra.gmra.mxu0 %vm2615_vm5, %v3671_v35  ;;  %6989 = vmatprep.mubr.msk.f32.mxu1 %vm2615_vm5, %v3422_v1 }
 0x426   : > { %7028 = vmatprep.mubr.msk.f32.mxu0 %vm2615_vm5, %v3672_v34 }
 0x427   : > { %v9002_v8 = vpop.permute.xlu1 %2886 }
 0x428   : > { %6990 = vmatmul.mubr.msk.f32.gmra.mxu1 %vm2615_vm5, %v3423_v56 }
 0x429   : > { %7029 = vmatmul.mubr.msk.f32.gmra.mxu0 %vm2615_vm5, %v3673_v10  ;;  %6992 = vmatprep.mubr.msk.f32.mxu1 %vm2615_vm5, %v3424_v5 }
 0x42a   : > { %7031 = vmatprep.mubr.msk.f32.mxu0 %vm2615_vm5, %v3674_v24 }
 0x42b   : > { %v9006_v22 = vpop.permute.xlu1 %2876 }
 0x42c   : > { %6993 = vmatmul.mubr.msk.f32.gmra.mxu1 %vm2615_vm5, %v3425_v3 }
 0x42d   : > { %7032 = vmatmul.mubr.msk.f32.gmra.mxu0 %vm2615_vm5, %v3675_v25  ;;  %6995 = vmatprep.mubr.msk.f32.mxu1 %vm2615_vm5, %v3426_v28 }
 0x42e   : > { %7034 = vmatprep.mubr.msk.f32.mxu0 %vm2615_vm5, %v3676_v29 }
 0x42f   : > { %v9012_v50 = vpop.permute.xlu1 %2866 }
 0x430   : > { %6996 = vmatmul.mubr.msk.f32.gmra.mxu1 %vm2615_vm5, %v3427_v6 }
 0x431   : > { %7035 = vmatmul.mubr.msk.f32.gmra.mxu0 %vm2615_vm5, %v3677_v52  ;;  %6998 = vmatprep.mubr.msk.f32.mxu1 %vm2615_vm5, %v3428_v30 }
 0x432   : > { %7037 = vmatprep.mubr.msk.f32.mxu0 %vm2615_vm5, %v3678_v23 }
 0x433   : > { %v9016_v11 = vpop.permute.xlu1 %2856 }
 0x434   : > { %6999 = vmatmul.mubr.msk.f32.gmra.mxu1 %vm2615_vm5, %v3429_v31 }
 0x435   : > { %7038 = vmatmul.mubr.msk.f32.gmra.mxu0 %vm2615_vm5, %v3679_v18  ;;  %7001 = vmatprep.mubr.msk.f32.mxu1 %vm2615_vm5, %v3430_v21 }
 0x436   : > { %7040 = vmatprep.mubr.msk.f32.mxu0 %vm2615_vm5, %v3680_v33 }
 0x437   : > { %v9028_v58 = vpop.permute.xlu1 %2846 }
 0x438   : > { %7002 = vmatmul.mubr.msk.f32.gmra.mxu1 %vm2615_vm5, %v3431_v36 }
 0x439   : > { %7041 = vmatmul.mubr.msk.f32.gmra.mxu0 %vm2615_vm5, %v3681_v37  ;;  %7004 = vmatprep.mubr.msk.f32.mxu1 %vm2615_vm5, %v3432_v39 }
 0x43a   : > { %7043 = vmatprep.mubr.msk.f32.mxu0 %vm2615_vm5, %v3682_v42 }
 0x43b   : > { %v2837_v13 = vpop.permute.xlu1 %2836 }
 0x43c   : > { %7005 = vmatmul.mubr.msk.f32.gmra.mxu1 %vm2615_vm5, %v3433_v46 }
 0x43d   : > { %7044 = vmatmul.mubr.msk.f32.gmra.mxu0 %vm2615_vm5, %v3683_v43  ;;  %7081 = vmatprep.mubr.f32.mxu1 %v3922_v62 }
 0x43e   : > { %7046 = vmatprep.mubr.msk.f32.mxu0 %vm2615_vm5, %v3684_v45 }
 0x43f   : > { %v2827_v17 = vpop.permute.xlu1 %2826 }
 0x441   : > { %7047 = vmatmul.mubr.msk.f32.gmra.mxu0 %vm2615_vm5, %v3685_v48 }
 0x442   : > { %7125 = vmatprep.mubr.f32.mxu0 %v4035_v20 }
 0x443   : > { %v2817_v4 = vpop.permute.xlu1 %2816 }
 0x446   : > { %v6859_v49 = vpop.f32.mrf.mxu1 }
 0x447   : > { %v2890_v12 = vadd.f32 %v6859_v49, %v2817_v4 }
 0x448   : > { %v8998_v51 = vpop.f32.mrf.mxu1 }
 0x449   : > { %10030 = vst [vmem:[#allocation30_spill] sm:$0xff] %v8998_v51 }
 0x44a   : > { %v6862_v55 = vpop.f32.mrf.mxu1 }
 0x44b   : > { %v2892_v60 = vadd.f32 %v6862_v55, %v2827_v17 }
 0x44c   : > { %v9000_v59 = vpop.f32.mrf.mxu1 }
 0x44d   : > { %10031 = vst [vmem:[#allocation3_spill] sm:$0xff] %v9000_v59 }
 0x44e   : > { %v6865_v0 = vpop.f32.mrf.mxu1 }
 0x44f   : > { %v2894_v35 = vadd.f32 %v6865_v0, %v2837_v13 }
 0x450   : > { %v9004_v9 = vpop.f32.mrf.mxu1 }
 0x452   : > { %v9008_v7 = vpop.f32.mrf.mxu1 }
 0x454   : > { %v9010_v26 = vpop.f32.mrf.mxu1 }
 0x456   : > { %v9014_v57 = vpop.f32.mrf.mxu1 }
 0x458   : > { %v9018_v19 = vpop.f32.mrf.mxu1 }
 0x45a   : > { %v9020_v53 = vpop.f32.mrf.mxu1 }
 0x45c   : > { %v9030_v44 = vpop.f32.mrf.mxu1 }
 0x45e   : > { %v9032_v15 = vpop.f32.mrf.mxu1 }
 0x460   : > { %v9034_v40 = vpop.f32.mrf.mxu1 }
 0x462   : > { %v9036_v47 = vpop.f32.mrf.mxu1 }
 0x464   : > { %v9038_v38 = vpop.f32.mrf.mxu1 }
 0x4b8   : > { %v6901_v16 = vpop.f32.mrf.mxu1 }
 0x4b9   : > { %v3151_v41 = vadd.f32 %v6901_v16, %v2890_v12 }
 0x4ba   : > { %v9040_v54 = vpop.f32.mrf.mxu1 }
 0x4bb   : > { %10032 = vst [vmem:[#allocation18_spill] sm:$0xff] %v9040_v54 }
 0x4bc   : > { %v6904_v2 = vpop.f32.mrf.mxu1 }
 0x4bd   : > { %v3153_v14 = vadd.f32 %v6904_v2, %v2892_v60  ;;  %v6943_v32 = vpop.f32.mrf.mxu0 }
 0x4be   : > { %v9042_v61 = vadd.f32 %v6943_v32, %v3151_v41  ;;  %v9044_v63 = vpop.f32.mrf.mxu1  ;;  %v2882_v32 = vpop.permute.xlu0 %2881 }
 0x4bf   : > { %10034 = vst [vmem:[#allocation20_spill] sm:$0xff] %v9044_v63  ;;  %v9046_v1 = vpop.f32.mrf.mxu0 }
 0x4c0   : > { %10033 = vst [vmem:[#allocation16_spill] sm:$0xff] %v9042_v61  ;;  %10035 = vst [vmem:[#allocation31_spill] sm:$0xff] %v9046_v1  ;;  %v6907_v34 = vpop.f32.mrf.mxu1 }
 0x4c1   : > { %v3155_v56 = vadd.f32 %v6907_v34, %v2894_v35  ;;  %v6946_v10 = vpop.f32.mrf.mxu0 }
 0x4c2   : > { %v9048_v5 = vadd.f32 %v6946_v10, %v3153_v14  ;;  %v9050_v24 = vpop.f32.mrf.mxu1 }
 0x4c3   : > { %10037 = vst [vmem:[#allocation21_spill] sm:$0xff] %v9050_v24  ;;  %v9052_v3 = vpop.f32.mrf.mxu0  ;;  %v2900_v24 = vadd.f32 %v9020_v53, %v9012_v50 }
 0x4c4   : > { %10036 = vst [vmem:[#allocation7_spill] sm:$0xff] %v9048_v5  ;;  %10038 = vst [vmem:[#allocation28_spill] sm:$0xff] %v9052_v3  ;;  %v9054_v25 = vpop.f32.mrf.mxu1  ;;  %v2903_v3 = vadd.f32 %v2882_v32, %v9038_v38 }
 0x4c5   : > { %v6949_v28 = vpop.f32.mrf.mxu0 }
 0x4c6   : > { %v9056_v29 = vadd.f32 %v6949_v28, %v3155_v56  ;;  %v9058_v6 = vpop.f32.mrf.mxu1 }
 0x4c7   : > { %v9060_v52 = vpop.f32.mrf.mxu0 }
 0x4c8   : > { %10039 = vst [vmem:[#allocation2_spill] sm:$0xff] %v9056_v29  ;;  %10040 = vst [vmem:[#allocation14_spill] sm:$0xff] %v9060_v52 }
 0x4c9   : > { %v9062_v30 = vpop.f32.mrf.mxu1  ;;  %v9064_v23 = vpop.f32.mrf.mxu0 }
 0x4cb   : > { %v9066_v31 = vpop.f32.mrf.mxu1  ;;  %v9068_v18 = vpop.f32.mrf.mxu0 }
 0x4ce   : > { %v9070_v21 = vpop.f32.mrf.mxu1  ;;  %v9072_v33 = vpop.f32.mrf.mxu0 }
 0x4d0   : > { %v9074_v36 = vpop.f32.mrf.mxu1  ;;  %v9076_v37 = vpop.f32.mrf.mxu0 }
 0x4d4   : > { %v6919_v39 = vpop.f32.mrf.mxu1  ;;  %v9078_v42 = vpop.f32.mrf.mxu0 }
 0x4d6   : > { %v3131_v46 = vpop.f32.mrf.mxu1  ;;  %v9080_v43 = vpop.f32.mrf.mxu0 }
 0x4da   : > { %v6922_v45 = vpop.f32.mrf.mxu1  ;;  %v6961_v48 = vpop.f32.mrf.mxu0 }
 0x4dc   : > { %v3141_v49 = vpop.f32.mrf.mxu1  ;;  %v3383_v55 = vpop.f32.mrf.mxu0 }
 0x4e0   : > { %v6964_v0 = vpop.f32.mrf.mxu0  ;;  %v9082_v62 = vpop.f32.mrf.mxu1 }
 0x4e1   : > { %10041 = vst [vmem:[#allocation13_spill] sm:$0xff] %v9082_v62 }
 0x4e2   : > { %v9084_v20 = vpop.f32.mrf.mxu1  ;;  %v3393_v13 = vpop.f32.mrf.mxu0 }
 0x4e3   : > { %10042 = vst [vmem:[#allocation17_spill] sm:$0xff] %v9084_v20 }
 0x4e4   : > { %v9086_v17 = vpop.f32.mrf.mxu1 }
 0x4e5   : > { %10043 = vst [vmem:[#allocation29_spill] sm:$0xff] %v9086_v17  ;;  %v9088_v4 = vpop.f32.mrf.mxu0 }
 0x4e6   : > { %10044 = vst [vmem:[#allocation4_spill] sm:$0xff] %v9088_v4  ;;  %v9090_v12 = vpop.f32.mrf.mxu1 }
 0x4e7   : > { %10045 = vst [vmem:[#allocation6_spill] sm:$0xff] %v9090_v12  ;;  %v9092_v16 = vpop.f32.mrf.mxu0 }
 0x4e8   : > { %10046 = vst [vmem:[#allocation19_spill] sm:$0xff] %v9092_v16  ;;  %v9094_v41 = vpop.f32.mrf.mxu1  ;;  %v2872_v16 = vpop.permute.xlu0 %2871 }
 0x4e9   : > { %10047 = vst [vmem:[#allocation26_spill] sm:$0xff] %v9094_v41  ;;  %v9096_v60 = vpop.f32.mrf.mxu0  ;;  %v3164_v41 = vadd.f32 %v3141_v49, %v2903_v3 }
 0x4ea   : > { %10048 = vst [vmem:[#allocation5_spill] sm:$0xff] %v9096_v60  ;;  %v9098_v2 = vpop.f32.mrf.mxu1 }
 0x4eb   : > { %10049 = vst [vmem:[#allocation8_spill] sm:$0xff] %v9098_v2  ;;  %v9100_v14 = vpop.f32.mrf.mxu0 }
 0x4ec   : > { %10050 = vst [vmem:[#allocation11_spill] sm:$0xff] %v9100_v14  ;;  %v9102_v35 = vpop.f32.mrf.mxu1  ;;  %v2862_v60 = vpop.permute.xlu0 %2861 }
 0x4ed   : > { %10051 = vst [vmem:[#allocation9_spill] sm:$0xff] %v9102_v35  ;;  %v9104_v34 = vpop.f32.mrf.mxu0  ;;  %v2899_v35 = vadd.f32 %v2862_v60, %v9030_v44 }
 0x4ee   : > { %10052 = vst [vmem:[#allocation12_spill] sm:$0xff] %v9104_v34  ;;  %v9106_v56 = vpop.f32.mrf.mxu1 }
 0x4ef   : > { %10053 = vst [vmem:[#allocation27_spill] sm:$0xff] %v9106_v56  ;;  %v9108_v10 = vpop.f32.mrf.mxu0  ;;  %v3160_v50 = vadd.f32 %v9074_v36, %v2899_v35  ;;  %v10068_v35 = vld [vmem:[#allocation20_spill] sm:$0xff] }
 0x4f0   : > { %10054 = vst [vmem:[#allocation10_spill] sm:$0xff] %v9108_v10  ;;  %v9110_v28 = vpop.f32.mrf.mxu1  ;;  %v2904_v10 = vadd.f32 %v9036_v47, %v9002_v8  ;;  %v2852_v63 = vpop.permute.xlu0 %2851  ;;  %v3416_v8 = vadd.f32 %v3393_v13, %v3164_v41 }
 0x4f1   : > { %v9112_v27 = vpop.f32.mrf.mxu0 }
 0x4f2   : > { %10055 = vst [vmem:[#allocation15_spill] sm:$0xff] %v9112_v27  ;;  %v9114_v4 = vpop.f32.mrf.mxu1  ;;  %v3165_v51 = vadd.f32 %v6922_v45, %v2904_v10  ;;  %v2901_v27 = vadd.f32 %v2872_v16, %v9034_v40  ;;  %v10066_v16 = vld [vmem:[#allocation26_spill] sm:$0xff] }
 0x4f3   : > { %v9116_v20 = vpop.f32.mrf.mxu0 }
 0x4f4   : > { %10056 = vst [vmem:[#allocation22_spill] sm:$0xff] %v9116_v20  ;;  %v7000_v62 = vpop.f32.mrf.mxu1  ;;  %v2902_v20 = vadd.f32 %v9032_v15, %v9006_v22  ;;  %v3417_v29 = vadd.f32 %v6964_v0, %v3165_v51  ;;  %v3162_v45 = vadd.f32 %v3131_v46, %v2901_v27  ;;  %v3161_v22 = vadd.f32 %v9070_v21, %v2900_v24  ;;  %v2842_v15 = vpop.permute.xlu0 %2841 }
 0x4f5   : > { %v9118_v14 = vpop.f32.mrf.mxu0  ;;  %v2897_v24 = vadd.f32 %v2852_v63, %v9018_v19  ;;  %v3412_v21 = vadd.f32 %v9080_v43, %v3160_v50  ;;  %v10077_v50 = vld [vmem:[#allocation6_spill] sm:$0xff] }
 0x4f6   : > { %v3625_v61 = vpop.f32.mrf.mxu1  ;;  %v3163_v56 = vadd.f32 %v6919_v39, %v2902_v20  ;;  %v3414_v3 = vadd.f32 %v3383_v55, %v3162_v45  ;;  %v3413_v27 = vadd.f32 %v9078_v42, %v3161_v22  ;;  %v2895_v42 = vadd.f32 %v2842_v15, %v9010_v26  ;;  %v10061_v0 = vld [vmem:[#allocation27_spill] sm:$0xff] }
 0x4f7   : > { %v9120_v1 = vpop.f32.mrf.mxu0  ;;  %v3664_v63 = vadd.f32 %v3625_v61, %v3412_v21  ;;  %v10073_v22 = vld [vmem:[#allocation7_spill] sm:$0xff]  ;;  %v10080_v21 = vld [vmem:[#allocation16_spill] sm:$0xff] }
 0x4f8   : > { %10057 = vst [vmem:[#allocation24_spill] sm:$0xff] %v9120_v1  ;;  %v7003_v12 = vpop.f32.mrf.mxu1  ;;  %v3415_v32 = vadd.f32 %v6961_v48, %v3163_v56  ;;  %v3665_v39 = vadd.f32 %v7000_v62, %v3413_v27  ;;  %v2832_v36 = vpop.permute.xlu0 %2831  ;;  %v10069_v56 = vld [vmem:[#allocation8_spill] sm:$0xff] }
 0x4f9   : > { %v7042_v54 = vpop.f32.mrf.mxu0  ;;  %v10062_v20 = vld [vmem:[#allocation15_spill] sm:$0xff] }
 0x4fa   : > { %v3635_v17 = vpop.f32.mrf.mxu1  ;;  %v3667_v49 = vadd.f32 %v7003_v12, %v3415_v32  ;;  %v10065_v12 = vld [vmem:[#allocation2_spill] sm:$0xff]  ;;  %v10072_v32 = vld [vmem:[#allocation28_spill] sm:$0xff] }
 0x4fb   : > { %v9124_v5 = vpop.f32.mrf.mxu0  ;;  %v3666_v53 = vadd.f32 %v3635_v17, %v3414_v3  ;;  %v3659_v41 = vadd.f32 %v10066_v16, %v10065_v12  ;;  %v10067_v60 = vld [vmem:[#allocation22_spill] sm:$0xff] }
 0x4fc   : > { %v7006_v34 = vpop.f32.mrf.mxu1  ;;  %v10075_v3 = vld [vmem:[#allocation10_spill] sm:$0xff] }
 0x4fd   : > { %v7045_v2 = vpop.f32.mrf.mxu0  ;;  %v3669_v47 = vadd.f32 %v7006_v34, %v3417_v29  ;;  %v2898_v29 = vadd.f32 %v9014_v57, %v9016_v11  ;;  %v2896_v11 = vadd.f32 %v9008_v7, %v9028_v58  ;;  %v3916_v58 = vadd.f32 %v9124_v5, %v3664_v63  ;;  %v10084_v63 = vld [vmem:[#allocation4_spill] sm:$0xff] }
 0x4fe   : > { %v3645_v52 = vpop.f32.mrf.mxu1  ;;  %v3919_v44 = vadd.f32 %v7045_v2, %v3667_v49 }
 0x4ff   : > { %v3887_v59 = vpop.f32.mrf.mxu0  ;;  %v3668_v10 = vadd.f32 %v3645_v52, %v3416_v8  ;;  %v3159_v52 = vadd.f32 %v9062_v30, %v2898_v29  ;;  %v3917_v30 = vadd.f32 %v7042_v54, %v3665_v39  ;;  %v10070_v8 = vld [vmem:[#allocation12_spill] sm:$0xff]  ;;  %v10081_v39 = vld [vmem:[#allocation13_spill] sm:$0xff] }
 0x500   : > { %v3918_v57 = vadd.f32 %v3887_v59, %v3666_v53  ;;  %v3157_v59 = vadd.f32 %v9054_v25, %v2896_v11  ;;  %v2893_v25 = vadd.f32 %v2832_v36, %v9004_v9  ;;  %v10063_v9 = vld [vmem:[#allocation3_spill] sm:$0xff]  ;;  %v10078_v53 = vld [vmem:[#allocation5_spill] sm:$0xff] }
 0x501   : > { %v7048_v38 = vpop.f32.mrf.mxu0  ;;  %v3411_v19 = vadd.f32 %v9072_v33, %v3159_v52  ;;  %v2822_v33 = vpop.permute.xlu0 %2821  ;;  %v10082_v11 = vld [vmem:[#allocation11_spill] sm:$0xff]  ;;  %v10083_v36 = vld [vmem:[#allocation17_spill] sm:$0xff] }
 0x502   : > { %v3921_v1 = vadd.f32 %v7048_v38, %v3669_v47  ;;  %v3409_v54 = vadd.f32 %v9064_v23, %v3157_v59  ;;  %v10060_v23 = vld [vmem:[#allocation21_spill] sm:$0xff]  ;;  %v2891_v17 = vadd.f32 %v2822_v33, %v10063_v9  ;;  %v3911_v47 = vadd.f32 %v10070_v8, %v3659_v41  ;;  %v10071_v38 = vld [vmem:[#allocation30_spill] sm:$0xff]  ;;  %v3927_v33 = vld [vmem:[%s9927_s9 + $0x28] sm:$0xff] }
 0x503   : > { %v3897_v51 = vpop.f32.mrf.mxu0  ;;  %v3663_v7 = vadd.f32 %v9110_v28, %v3411_v19  ;;  %v3154_v55 = vadd.f32 %v10060_v23, %v2893_v25  ;;  %v4039_v25 = vld [vmem:[%s9928_s10 + $0x20] sm:$0xff] }
 0x504   : > { %v3920_v40 = vadd.f32 %v3897_v51, %v3668_v10  ;;  %7049 = vmatprep.subr.mxu1 %v3921_v1  ;;  %7093 = vmatprep.subr.mxu0 %v3921_v1  ;;  %v3152_v34 = vadd.f32 %v10068_v35, %v2891_v17  ;;  %v10074_v51 = vld [vmem:[#allocation29_spill] sm:$0xff]  ;;  %v4156_v23 = vld [vmem:[%s9929_s11] sm:$0xff] }
 0x505   : > { %7050 = vmatpush3.msra.mxu1 %v3921_v1  ;;  %7094 = vmatpush3.msra.mxu0 %v3921_v1  ;;  %v3158_v1 = vadd.f32 %v9066_v31, %v2897_v24  ;;  %v3156_v31 = vadd.f32 %v9058_v6, %v2895_v42  ;;  %v3915_v61 = vadd.f32 %v9118_v14, %v3663_v7  ;;  %v10059_v6 = vld [vmem:[#allocation24_spill] sm:$0xff]  ;;  %v2812_v14 = vpop.permute.xlu0 %2811  ;;  %v10079_v24 = vld [vmem:[#allocation31_spill] sm:$0xff] }
 0x506   : > { %7051 = vmatprep.subr.mxu1 %v3920_v40  ;;  %7095 = vmatprep.subr.mxu0 %v3920_v40  ;;  %v2889_v45 = vadd.f32 %v2812_v14, %v10071_v38  ;;  %v3404_v10 = vadd.f32 %v10072_v32, %v3152_v34  ;;  %v3657_v15 = vadd.f32 %v10074_v51, %v10073_v22  ;;  %v10085_v42 = vld [vmem:[#allocation19_spill] sm:$0xff] }
 0x507   : > { %7052 = vmatpush3.msra.mxu1 %v3920_v40  ;;  %7096 = vmatpush3.msra.mxu0 %v3920_v40  ;;  %v3410_v46 = vadd.f32 %v9076_v37, %v3158_v1  ;;  %v3408_v5 = vadd.f32 %v9068_v18, %v3156_v31  ;;  %v10058_v37 = vld [vmem:[#allocation9_spill] sm:$0xff]  ;;  %v10064_v18 = vld [vmem:[#allocation14_spill] sm:$0xff]  ;;  %v4036_v7 = vld [vmem:[%s9928_s10 + $0x8] sm:$0xff] }
 0x508   : > { %7053 = vmatprep.subr.mxu1 %v3919_v44  ;;  %7097 = vmatprep.subr.mxu0 %v3919_v44  ;;  %v3661_v43 = vadd.f32 %v10058_v37, %v3409_v54  ;;  %v10076_v40 = vld [vmem:[#allocation18_spill] sm:$0xff]  ;;  %v3656_v27 = vadd.f32 %v10077_v50, %v3404_v10  ;;  %v4037_v31 = vld [vmem:[%s9928_s10 + $0x10] sm:$0xff]  ;;  %v3925_v54 = vld [vmem:[%s9927_s9 + $0x18] sm:$0xff] }
 0x509   : > { %7054 = vmatpush3.msra.mxu1 %v3919_v44  ;;  %7098 = vmatpush3.msra.mxu0 %v3919_v44  ;;  %v3662_v26 = vadd.f32 %v9114_v4, %v3410_v46  ;;  %v3660_v62 = vadd.f32 %v10061_v0, %v3408_v5  ;;  %v3406_v4 = vadd.f32 %v10064_v18, %v3154_v55  ;;  %v3923_v46 = vld [vmem:[%s9927_s9 + $0x8] sm:$0xff]  ;;  %v3928_v37 = vld [vmem:[%s9927_s9 + $0x30] sm:$0xff]  ;;  %v4287_v55 = vld [vmem:[%s9930_s12] sm:$0xff]  ;;  %v10086_v0 = vmov 0.0  }
 0x50a   : > { %7055 = vmatprep.subr.mxu1 %v3918_v57  ;;  %7099 = vmatprep.subr.mxu0 %v3918_v57  ;;  %v3913_v13 = vadd.f32 %v10062_v20, %v3661_v43  ;;  %v3150_v29 = vadd.f32 %v10076_v40, %v2889_v45  ;;  %v3909_v44 = vadd.f32 %v10078_v53, %v3657_v15  ;;  %v4040_v5 = vld [vmem:[%s9928_s10 + $0x28] sm:$0xff]  ;;  %v4041_v43 = vld [vmem:[%s9928_s10 + $0x30] sm:$0xff] }
 0x50b   : > { %7056 = vmatpush3.msra.mxu1 %v3918_v57  ;;  %7100 = vmatpush3.msra.mxu0 %v3918_v57  ;;  %v3914_v48 = vadd.f32 %v10059_v6, %v3662_v26  ;;  %v3912_v2 = vadd.f32 %v10067_v60, %v3660_v62  ;;  %v3658_v28 = vadd.f32 %v10069_v56, %v3406_v4  ;;  %v4038_v26 = vld [vmem:[%s9928_s10 + $0x18] sm:$0xff] }
 0x50c   : > { %7057 = vmatprep.subr.mxu1 %v3917_v30  ;;  %7101 = vmatprep.subr.mxu0 %v3917_v30  ;;  %v3402_v52 = vadd.f32 %v10079_v24, %v3150_v29  ;;  %v3655_v57 = vadd.f32 %v10081_v39, %v10080_v21  ;;  %v3908_v1 = vadd.f32 %v10082_v11, %v3656_v27  ;;  %v3929_v6 = vld [vmem:[%s9927_s9 + $0x38] sm:$0xff] }
 0x50d   : > { %7058 = vmatpush3.msra.mxu1 %v3917_v30  ;;  %7102 = vmatpush3.msra.mxu0 %v3917_v30  ;;  %v3910_v49 = vadd.f32 %v10075_v3, %v3658_v28 }
 0x50e   : > { %7059 = vmatprep.subr.mxu1 %v3916_v58  ;;  %7103 = vmatprep.subr.mxu0 %v3916_v58  ;;  %v3654_v19 = vadd.f32 %v10083_v36, %v3402_v52  ;;  %v3907_v30 = vadd.f32 %v10084_v63, %v3655_v57 }
 0x50f   : > { %7060 = vmatpush3.msra.mxu1 %v3916_v58  ;;  %7104 = vmatpush3.msra.mxu0 %v3916_v58  ;;  %v3924_v58 = vld [vmem:[%s9927_s9 + $0x10] sm:$0xff] }
 0x510   : > { %7061 = vmatprep.subr.mxu1 %v3915_v61  ;;  %7105 = vmatprep.subr.mxu0 %v3915_v61  ;;  %v3906_v59 = vadd.f32 %v10085_v42, %v3654_v19 }
 0x511   : > { %7062 = vmatpush3.msra.mxu1 %v3915_v61  ;;  %7106 = vmatpush3.msra.mxu0 %v3915_v61  ;;  %v3926_v61 = vld [vmem:[%s9927_s9 + $0x20] sm:$0xff] }
 0x512   : > { %7063 = vmatprep.subr.mxu1 %v3914_v48  ;;  %7107 = vmatprep.subr.mxu0 %v3914_v48 }
 0x513   : > { %7064 = vmatpush3.msra.mxu1 %v3914_v48  ;;  %7108 = vmatpush3.msra.mxu0 %v3914_v48  ;;  %v4042_v48 = vld [vmem:[%s9928_s10 + $0x38] sm:$0xff] }
 0x514   : > { %7065 = vmatprep.subr.mxu1 %v3913_v13  ;;  %7109 = vmatprep.subr.mxu0 %v3913_v13 }
 0x515   : > { %7066 = vmatpush3.msra.mxu1 %v3913_v13  ;;  %7110 = vmatpush3.msra.mxu0 %v3913_v13 }
 0x516   : > { %7067 = vmatprep.subr.mxu1 %v3912_v2  ;;  %7111 = vmatprep.subr.mxu0 %v3912_v2 }
 0x517   : > { %7068 = vmatpush3.msra.mxu1 %v3912_v2  ;;  %7112 = vmatpush3.msra.mxu0 %v3912_v2 }
 0x518   : > { %7069 = vmatprep.subr.mxu1 %v3911_v47  ;;  %7113 = vmatprep.subr.mxu0 %v3911_v47 }
 0x519   : > { %7070 = vmatpush3.msra.mxu1 %v3911_v47  ;;  %7114 = vmatpush3.msra.mxu0 %v3911_v47 }
 0x51a   : > { %7071 = vmatprep.subr.mxu1 %v3910_v49  ;;  %7115 = vmatprep.subr.mxu0 %v3910_v49 }
 0x51b   : > { %7072 = vmatpush3.msra.mxu1 %v3910_v49  ;;  %7116 = vmatpush3.msra.mxu0 %v3910_v49 }
 0x51c   : > { %7073 = vmatprep.subr.mxu1 %v3909_v44  ;;  %7117 = vmatprep.subr.mxu0 %v3909_v44 }
 0x51d   : > { %7074 = vmatpush3.msra.mxu1 %v3909_v44  ;;  %7118 = vmatpush3.msra.mxu0 %v3909_v44 }
 0x51e   : > { %7075 = vmatprep.subr.mxu1 %v3908_v1  ;;  %7119 = vmatprep.subr.mxu0 %v3908_v1 }
 0x51f   : > { %7076 = vmatpush3.msra.mxu1 %v3908_v1  ;;  %7120 = vmatpush3.msra.mxu0 %v3908_v1 }
 0x520   : > { %7077 = vmatprep.subr.mxu1 %v3907_v30  ;;  %7121 = vmatprep.subr.mxu0 %v3907_v30 }
 0x521   : > { %7078 = vmatpush3.msra.mxu1 %v3907_v30  ;;  %7122 = vmatpush3.msra.mxu0 %v3907_v30 }
 0x522   : > { %7079 = vmatprep.subr.mxu1 %v3906_v59  ;;  %7123 = vmatprep.subr.mxu0 %v3906_v59 }
 0x523   : > { %7080 = vmatpush3.msra.mxu1 %v3906_v59  ;;  %7124 = vmatpush3.msra.mxu0 %v3906_v59 }
 0x524   : > { %7082 = vmatmul.mubr.f32.vlgmr.msra.gmra.mxu1 %v3923_v46  ;;  %7126 = vmatmul.mubr.f32.vlgmr.msra.gmra.mxu0 %v4036_v7  ;;  %v4416_v7 = vld [vmem:[%s9931_s13] sm:$0xff] }
 0x525   : > { %7084 = vmatprep.mubr.f32.mxu1 %v3924_v58  ;;  %7128 = vmatprep.mubr.f32.mxu0 %v4037_v31  ;;  %v4417_v58 = vld [vmem:[%s9931_s13 + $0x8] sm:$0xff]  ;;  %v4418_v31 = vld [vmem:[%s9931_s13 + $0x10] sm:$0xff] }
 0x526   : > { %7137 = vmatprep.subr.mxu1 %v4156_v23  ;;  %7151 = vmatprep.subr.mxu0 %v4287_v55 }
 0x527   : > { %7138 = vmatpush3.msra.mxu1 %v4156_v23  ;;  %7152 = vmatpush3.msra.mxu0 %v4287_v55  ;;  %v4429_v23 = vld [vmem:[%s9931_s13 + $0x68] sm:$0xff]  ;;  %v4430_v55 = vld [vmem:[%s9931_s13 + $0x70] sm:$0xff] }
 0x528   : > { %7085 = vmatmul.mubr.f32.gmra.mxu1 %v3925_v54  ;;  %7129 = vmatmul.mubr.f32.gmra.mxu0 %v4038_v26  ;;  %v4419_v54 = vld [vmem:[%s9931_s13 + $0x18] sm:$0xff]  ;;  %v4420_v26 = vld [vmem:[%s9931_s13 + $0x20] sm:$0xff] }
 0x529   : > { %7087 = vmatprep.mubr.f32.mxu1 %v3926_v61  ;;  %7131 = vmatprep.mubr.f32.mxu0 %v4039_v25  ;;  %v4421_v61 = vld [vmem:[%s9931_s13 + $0x28] sm:$0xff]  ;;  %v4422_v25 = vld [vmem:[%s9931_s13 + $0x30] sm:$0xff] }
 0x52a   : > { %7165 = vmatprep.subr.mxu1 %v10086_v0  ;;  %7226 = vmatprep.subr.mxu0 %v10086_v0 }
 0x52c   : > { %7088 = vmatmul.mubr.f32.gmra.mxu1 %v3927_v33  ;;  %7132 = vmatmul.mubr.f32.gmra.mxu0 %v4040_v5  ;;  %v4423_v33 = vld [vmem:[%s9931_s13 + $0x38] sm:$0xff]  ;;  %v4424_v5 = vld [vmem:[%s9931_s13 + $0x40] sm:$0xff] }
 0x52d   : > { %7090 = vmatprep.mubr.f32.mxu1 %v3928_v37  ;;  %7134 = vmatprep.mubr.f32.mxu0 %v4041_v43  ;;  %v4425_v37 = vld [vmem:[%s9931_s13 + $0x48] sm:$0xff]  ;;  %v4426_v43 = vld [vmem:[%s9931_s13 + $0x50] sm:$0xff] }
 0x530   : > { %7091 = vmatmul.mubr.f32.gmra.mxu1 %v3929_v6  ;;  %7135 = vmatmul.mubr.f32.gmra.mxu0 %v4042_v48  ;;  %v4427_v6 = vld [vmem:[%s9931_s13 + $0x58] sm:$0xff]  ;;  %v4428_v48 = vld [vmem:[%s9931_s13 + $0x60] sm:$0xff] }
 0x5e4   : > { %v7083_v62 = vpop.f32.mrf.mxu1  ;;  %v7127_v20 = vpop.f32.mrf.mxu0 }
 0x5e5   : > { %v4149_v18 = vmax.f32 %v7083_v62, %v7127_v20 }
 0x5e6   : > { %v3996_v13 = vpop.f32.mrf.mxu1  ;;  %v4109_v9 = vpop.f32.mrf.mxu0 }
 0x5e7   : > { %v4148_v17 = vmax.f32 %v3996_v13, %v4109_v9 }
 0x5e8   : > { %v7086_v4 = vpop.f32.mrf.mxu1  ;;  %v7130_v12 = vpop.f32.mrf.mxu0 }
 0x5e9   : > { %7139 = vmatprep.mubr.msk.f32.mxu1 %vm4157_vm6, %v4148_v17  ;;  %7153 = vmatprep.mubr.msk.f32.mxu0 %vm4157_vm6, %v4148_v17  ;;  %v4151_v2 = vmax.f32 %v7086_v4, %v7130_v12  ;;  %v6034_v12 = vld [vmem:[%s9931_s13 + $0x78] sm:$0xff] }
 0x5ea   : > { %v4006_v16 = vpop.f32.mrf.mxu1  ;;  %v4119_v41 = vpop.f32.mrf.mxu0  ;;  %7140 = vmatmul.mubr.msk.f32.vlgmr.msra.gmra.mxu1 %vm4157_vm6, %v4149_v18  ;;  %7154 = vmatmul.mubr.msk.f32.vlgmr.msra.gmra.mxu0 %vm4157_vm6, %v4149_v18 }
 0x5eb   : > { %v4150_v60 = vmax.f32 %v4006_v16, %v4119_v41 }
 0x5ec   : > { %v7089_v14 = vpop.f32.mrf.mxu1  ;;  %v7133_v35 = vpop.f32.mrf.mxu0 }
 0x5ed   : > { %7142 = vmatprep.mubr.msk.f32.mxu1 %vm4157_vm6, %v4150_v60  ;;  %7156 = vmatprep.mubr.msk.f32.mxu0 %vm4157_vm6, %v4150_v60  ;;  %v4153_v8 = vmax.f32 %v7089_v14, %v7133_v35  ;;  %v6035_v60 = vld [vmem:[%s9931_s13 + $0x80] sm:$0xff]  ;;  %v6036_v35 = vld [vmem:[%s9931_s13 + $0x88] sm:$0xff] }
 0x5ee   : > { %v4016_v34 = vpop.f32.mrf.mxu1  ;;  %v4129_v56 = vpop.f32.mrf.mxu0  ;;  %7143 = vmatmul.mubr.msk.f32.gmra.mxu1 %vm4157_vm6, %v4151_v2  ;;  %7157 = vmatmul.mubr.msk.f32.gmra.mxu0 %vm4157_vm6, %v4151_v2 }
 0x5ef   : > { %v4152_v28 = vmax.f32 %v4016_v34, %v4129_v56 }
 0x5f0   : > { %v7092_v47 = vpop.f32.mrf.mxu1  ;;  %v7136_v38 = vpop.f32.mrf.mxu0 }
 0x5f1   : > { %7145 = vmatprep.mubr.msk.f32.mxu1 %vm4157_vm6, %v4152_v28  ;;  %7159 = vmatprep.mubr.msk.f32.mxu0 %vm4157_vm6, %v4152_v28  ;;  %v4155_v22 = vmax.f32 %v7092_v47, %v7136_v38  ;;  %v6037_v28 = vld [vmem:[%s9931_s13 + $0x90] sm:$0xff]  ;;  %v6038_v38 = vld [vmem:[%s9931_s13 + $0x98] sm:$0xff] }
 0x5f2   : > { %v4026_v45 = vpop.f32.mrf.mxu1  ;;  %v4139_v32 = vpop.f32.mrf.mxu0  ;;  %7146 = vmatmul.mubr.msk.f32.gmra.mxu1 %vm4157_vm6, %v4153_v8  ;;  %7160 = vmatmul.mubr.msk.f32.gmra.mxu0 %vm4157_vm6, %v4153_v8 }
 0x5f3   : > { %v4154_v10 = vmax.f32 %v4026_v45, %v4139_v32 }
 0x5f5   : > { %7148 = vmatprep.mubr.msk.f32.mxu1 %vm4157_vm6, %v4154_v10  ;;  %7162 = vmatprep.mubr.msk.f32.mxu0 %vm4157_vm6, %v4154_v10 }
 0x5f6   : > { %7149 = vmatmul.mubr.msk.f32.gmra.mxu1 %vm4157_vm6, %v4155_v22  ;;  %7163 = vmatmul.mubr.msk.f32.gmra.mxu0 %vm4157_vm6, %v4155_v22  ;;  %v6039_v22 = vld [vmem:[%s9931_s13 + $0xa0] sm:$0xff] }
 0x5f7   : > { %7181 = vmatprep.mubr.msk.f32.mxu1 %vm7542_vm3, %v10086_v0  ;;  %7242 = vmatprep.mubr.msk.f32.mxu0 %vm7542_vm3, %v10086_v0 }
 0x6aa   : > { %v7141_v51 = vpop.f32.mrf.mxu1  ;;  %v7155_v15 = vpop.f32.mrf.mxu0 }
 0x6ab   : > { %v4394_v59 = vmax.f32 %v7141_v51, %v7155_v15 }
 0x6ac   : > { %v4248_v3 = vpop.f32.mrf.mxu1  ;;  %v4354_v49 = vpop.f32.mrf.mxu0 }
 0x6ad   : > { %v4393_v46 = vmax.f32 %v4248_v3, %v4354_v49  ;;  %v6040_v3 = vld [vmem:[%s9931_s13 + $0xa8] sm:$0xff] }
 0x6ae   : > { %v7144_v40 = vpop.f32.mrf.mxu1  ;;  %v7158_v29 = vpop.f32.mrf.mxu0 }
 0x6af   : > { %v4396_v30 = vmax.f32 %v7144_v40, %v7158_v29  ;;  %v6041_v29 = vld [vmem:[%s9931_s13 + $0xb0] sm:$0xff] }
 0x6b0   : > { %v4258_v50 = vpop.f32.mrf.mxu1  ;;  %v4364_v27 = vpop.f32.mrf.mxu0 }
 0x6b1   : > { %v4395_v42 = vmax.f32 %v4258_v50, %v4364_v27  ;;  %v6064_v50 = vld [vmem:[%s9931_s13 + $0xf0] sm:$0xff] }
 0x6b2   : > { %v7147_v53 = vpop.f32.mrf.mxu1  ;;  %v7161_v44 = vpop.f32.mrf.mxu0 }
 0x6b3   : > { %v4398_v19 = vmax.f32 %v7147_v53, %v7161_v44  ;;  %v6042_v44 = vld [vmem:[%s9931_s13 + $0xb8] sm:$0xff] }
 0x6b4   : > { %v4268_v24 = vpop.f32.mrf.mxu1  ;;  %v4374_v52 = vpop.f32.mrf.mxu0 }
 0x6b5   : > { %v4397_v63 = vmax.f32 %v4268_v24, %v4374_v52  ;;  %v6065_v24 = vld [vmem:[%s9931_s13 + $0xf8] sm:$0xff]  ;;  %v6043_v52 = vld [vmem:[%s9931_s13 + $0xc0] sm:$0xff] }
 0x6b6   : > { %v7150_v21 = vpop.f32.mrf.mxu1  ;;  %v7164_v39 = vpop.f32.mrf.mxu0 }
 0x6b7   : > { %v4400_v57 = vmax.f32 %v7150_v21, %v7164_v39  ;;  %v6066_v21 = vld [vmem:[%s9931_s13 + $0x100] sm:$0xff]  ;;  %v6044_v39 = vld [vmem:[%s9931_s13 + $0xc8] sm:$0xff] }
 0x6b8   : > { %v4278_v11 = vpop.f32.mrf.mxu1  ;;  %v4384_v1 = vpop.f32.mrf.mxu0 }
 0x6b9   : > { %v4399_v36 = vmax.f32 %v4278_v11, %v4384_v1  ;;  %4670 = vrot.lane.b32.xlu1 %v4400_v57, %s10026_s3  ;;  %7166 = vmatpush3.msra.mxu1 %v4400_v57  ;;  %v6045_v11 = vld [vmem:[%s9931_s13 + $0xd0] sm:$0xff] }
 0x6ba   : > { %7167 = vmatprep.subr.mxu1 %v10086_v0  ;;  %v6068_v1 = vld [vmem:[%s9931_s13 + $0x110] sm:$0xff] }
 0x6bb   : > { %4668 = vrot.lane.b32.xlu0 %v4399_v36, %s10026_s3  ;;  %7168 = vmatpush3.msra.mxu1 %v4399_v36 }
 0x6bc   : > { %7169 = vmatprep.subr.mxu1 %v10086_v0 }
 0x6bd   : > { %4666 = vrot.lane.b32.xlu1 %v4398_v19, %s10026_s3  ;;  %7170 = vmatpush3.msra.mxu1 %v4398_v19 }
 0x6be   : > { %7171 = vmatprep.subr.mxu1 %v10086_v0 }
 0x6bf   : > { %4664 = vrot.lane.b32.xlu0 %v4397_v63, %s10026_s3  ;;  %7172 = vmatpush3.msra.mxu1 %v4397_v63 }
 0x6c0   : > { %7173 = vmatprep.subr.mxu1 %v10086_v0 }
 0x6c1   : > { %4662 = vrot.lane.b32.xlu1 %v4396_v30, %s10026_s3  ;;  %7174 = vmatpush3.msra.mxu1 %v4396_v30 }
 0x6c2   : > { %7175 = vmatprep.subr.mxu1 %v10086_v0 }
 0x6c3   : > { %4660 = vrot.lane.b32.xlu0 %v4395_v42, %s10026_s3  ;;  %7176 = vmatpush3.msra.mxu1 %v4395_v42 }
 0x6c4   : > { %7177 = vmatprep.subr.mxu1 %v10086_v0 }
 0x6c5   : > { %4658 = vrot.lane.b32.xlu1 %v4394_v59, %s10026_s3  ;;  %7178 = vmatpush3.msra.mxu1 %v4394_v59 }
 0x6c6   : > { %7179 = vmatprep.subr.mxu1 %v10086_v0 }
 0x6c7   : > { %4656 = vrot.lane.b32.xlu0 %v4393_v46, %s10026_s3  ;;  %7180 = vmatpush3.msra.mxu1 %v4393_v46 }
 0x6c8   : > { %7182 = vmatmul.mubr.msk.f32.vlgmr.msra.gmra.mxu1 %vm4431_vm7, %v4416_v7  ;;  %7287 = vmatprep.subr.mxu1 %v10086_v0  ;;  %v6094_v7 = vld [vmem:[%s9931_s13 + $0x168] sm:$0xff] }
 0x6c9   : > { %4910 = vrot.lane.b32.xlu1 %v4400_v57, %s10027_s28  ;;  %7184 = vmatprep.mubr.msk.f32.mxu1 %vm7542_vm3, %v10086_v0 }
 0x6cb   : > { %4906 = vrot.lane.b32.xlu0 %v4398_v19, %s10027_s28 }
 0x6cc   : > { %7185 = vmatmul.mubr.msk.f32.gmra.mxu1 %vm4431_vm7, %v4417_v58  ;;  %v6073_v58 = vld [vmem:[%s9931_s13 + $0x138] sm:$0xff] }
 0x6cd   : > { %5150 = vrot.lane.b32.xlu1 %v4400_v57, %s10028_s29  ;;  %7187 = vmatprep.mubr.msk.f32.mxu1 %vm7542_vm3, %v10086_v0  ;;  %v6067_v57 = vld [vmem:[%s9931_s13 + $0x108] sm:$0xff] }
 0x6cf   : > { %4904 = vrot.lane.b32.xlu0 %v4397_v63, %s10027_s28 }
 0x6d0   : > { %7188 = vmatmul.mubr.msk.f32.gmra.mxu1 %vm4431_vm7, %v4418_v31  ;;  %v6095_v31 = vld [vmem:[%s9931_s13 + $0x170] sm:$0xff] }
 0x6d1   : > { %5146 = vrot.lane.b32.xlu1 %v4398_v19, %s10028_s29  ;;  %7190 = vmatprep.mubr.msk.f32.mxu1 %vm7542_vm3, %v10086_v0  ;;  %v6069_v19 = vld [vmem:[%s9931_s13 + $0x118] sm:$0xff] }
 0x6d3   : > { %4902 = vrot.lane.b32.xlu0 %v4396_v30, %s10027_s28 }
 0x6d4   : > { %7191 = vmatmul.mubr.msk.f32.gmra.mxu1 %vm4431_vm7, %v4419_v54  ;;  %v6074_v54 = vld [vmem:[%s9931_s13 + $0x140] sm:$0xff] }
 0x6d5   : > { %5144 = vrot.lane.b32.xlu1 %v4397_v63, %s10028_s29  ;;  %7193 = vmatprep.mubr.msk.f32.mxu1 %vm7542_vm3, %v10086_v0  ;;  %v6047_v63 = vld [vmem:[%s9931_s13 + $0xe0] sm:$0xff] }
 0x6d7   : > { %4908 = vrot.lane.b32.xlu0 %v4399_v36, %s10027_s28 }
 0x6d8   : > { %7194 = vmatmul.mubr.msk.f32.gmra.mxu1 %vm4431_vm7, %v4420_v26  ;;  %v6096_v26 = vld [vmem:[%s9931_s13 + $0x178] sm:$0xff] }
 0x6d9   : > { %5148 = vrot.lane.b32.xlu1 %v4399_v36, %s10028_s29  ;;  %7196 = vmatprep.mubr.msk.f32.mxu1 %vm7542_vm3, %v10086_v0  ;;  %v6046_v36 = vld [vmem:[%s9931_s13 + $0xd8] sm:$0xff] }
 0x6db   : > { %4900 = vrot.lane.b32.xlu0 %v4395_v42, %s10027_s28 }
 0x6dc   : > { %7197 = vmatmul.mubr.msk.f32.gmra.mxu1 %vm4431_vm7, %v4421_v61  ;;  %v6075_v61 = vld [vmem:[%s9931_s13 + $0x148] sm:$0xff] }
 0x6dd   : > { %5142 = vrot.lane.b32.xlu1 %v4396_v30, %s10028_s29  ;;  %7199 = vmatprep.mubr.msk.f32.mxu1 %vm7542_vm3, %v10086_v0  ;;  %v6070_v30 = vld [vmem:[%s9931_s13 + $0x120] sm:$0xff] }
 0x6df   : > { %4898 = vrot.lane.b32.xlu0 %v4394_v59, %s10027_s28 }
 0x6e0   : > { %7200 = vmatmul.mubr.msk.f32.gmra.mxu1 %vm4431_vm7, %v4422_v25  ;;  %v6097_v25 = vld [vmem:[%s9931_s13 + $0x180] sm:$0xff] }
 0x6e1   : > { %5140 = vrot.lane.b32.xlu1 %v4395_v42, %s10028_s29  ;;  %7202 = vmatprep.mubr.msk.f32.mxu1 %vm7542_vm3, %v10086_v0  ;;  %v6048_v42 = vld [vmem:[%s9931_s13 + $0xe8] sm:$0xff] }
 0x6e3   : > { %4896 = vrot.lane.b32.xlu0 %v4393_v46, %s10027_s28 }
 0x6e4   : > { %7203 = vmatmul.mubr.msk.f32.gmra.mxu1 %vm4431_vm7, %v4423_v33  ;;  %v6076_v33 = vld [vmem:[%s9931_s13 + $0x150] sm:$0xff] }
 0x6e5   : > { %5138 = vrot.lane.b32.xlu1 %v4394_v59, %s10028_s29  ;;  %7205 = vmatprep.mubr.msk.f32.mxu1 %vm7542_vm3, %v10086_v0  ;;  %v6071_v59 = vld [vmem:[%s9931_s13 + $0x128] sm:$0xff] }
 0x6e7   : > { %5136 = vrot.lane.b32.xlu0 %v4393_v46, %s10028_s29  ;;  %v6072_v46 = vld [vmem:[%s9931_s13 + $0x130] sm:$0xff] }
 0x6e8   : > { %7206 = vmatmul.mubr.msk.f32.gmra.mxu1 %vm4431_vm7, %v4424_v5  ;;  %v6098_v5 = vld [vmem:[%s9931_s13 + $0x188] sm:$0xff] }
 0x6e9   : > { %7208 = vmatprep.mubr.msk.f32.mxu1 %vm7542_vm3, %v10086_v0 }
 0x6ec   : > { %7209 = vmatmul.mubr.msk.f32.gmra.mxu1 %vm4431_vm7, %v4425_v37 }
 0x6ed   : > { %7211 = vmatprep.mubr.msk.f32.mxu1 %vm7542_vm3, %v10086_v0 }
 0x6f0   : > { %7212 = vmatmul.mubr.msk.f32.gmra.mxu1 %vm4431_vm7, %v4426_v43  ;;  %v6077_v43 = vld [vmem:[%s9931_s13 + $0x158] sm:$0xff] }
 0x6f1   : > { %7214 = vmatprep.mubr.msk.f32.mxu1 %vm7542_vm3, %v10086_v0 }
 0x6f4   : > { %7215 = vmatmul.mubr.msk.f32.gmra.mxu1 %vm4431_vm7, %v4427_v6  ;;  %v6099_v6 = vld [vmem:[%s9931_s13 + $0x190] sm:$0xff] }
 0x6f5   : > { %7217 = vmatprep.mubr.msk.f32.mxu1 %vm7542_vm3, %v10086_v0 }
 0x6f8   : > { %7218 = vmatmul.mubr.msk.f32.gmra.mxu1 %vm4431_vm7, %v4428_v48 }
 0x6f9   : > { %7220 = vmatprep.mubr.msk.f32.mxu1 %vm7542_vm3, %v10086_v0 }
 0x6fc   : > { %7221 = vmatmul.mubr.msk.f32.gmra.mxu1 %vm4431_vm7, %v4429_v23 }
 0x6fd   : > { %7223 = vmatprep.mubr.msk.f32.mxu1 %vm7542_vm3, %v10086_v0 }
 0x700   : > { %7224 = vmatmul.mubr.msk.f32.gmra.mxu1 %vm4431_vm7, %v4430_v55  ;;  %v6078_v55 = vld [vmem:[%s9931_s13 + $0x160] sm:$0xff] }
 0x701   : > { %7303 = vmatprep.mubr.msk.f32.mxu1 %vm7542_vm3, %v10086_v0 }
 0x72b   : > { %v4671_v62 = vpop.permute.xlu1 %4670 }
 0x72c   : > { %7227 = vmatpush3.msra.mxu0 %v4671_v62  ;;  %v6100_v62 = vld [vmem:[%s9931_s13 + $0x198] sm:$0xff] }
 0x72d   : > { %7228 = vmatprep.subr.mxu0 %v10086_v0  ;;  %v4669_v20 = vpop.permute.xlu0 %4668 }
 0x72e   : > { %7229 = vmatpush3.msra.mxu0 %v4669_v20 }
 0x72f   : > { %v4667_v13 = vpop.permute.xlu1 %4666  ;;  %7230 = vmatprep.subr.mxu0 %v10086_v0 }
 0x730   : > { %7231 = vmatpush3.msra.mxu0 %v4667_v13 }
 0x731   : > { %7232 = vmatprep.subr.mxu0 %v10086_v0  ;;  %v4665_v9 = vpop.permute.xlu0 %4664 }
 0x732   : > { %7233 = vmatpush3.msra.mxu0 %v4665_v9  ;;  %v6101_v9 = vld [vmem:[%s9931_s13 + $0x1a0] sm:$0xff] }
 0x733   : > { %v4663_v17 = vpop.permute.xlu1 %4662  ;;  %7234 = vmatprep.subr.mxu0 %v10086_v0 }
 0x734   : > { %7235 = vmatpush3.msra.mxu0 %v4663_v17 }
 0x735   : > { %7236 = vmatprep.subr.mxu0 %v10086_v0  ;;  %v4661_v18 = vpop.permute.xlu0 %4660 }
 0x736   : > { %7237 = vmatpush3.msra.mxu0 %v4661_v18 }
 0x737   : > { %v4659_v4 = vpop.permute.xlu1 %4658  ;;  %7238 = vmatprep.subr.mxu0 %v10086_v0 }
 0x738   : > { %7239 = vmatpush3.msra.mxu0 %v4659_v4  ;;  %v6102_v4 = vld [vmem:[%s9931_s13 + $0x1a8] sm:$0xff] }
 0x739   : > { %7240 = vmatprep.subr.mxu0 %v10086_v0  ;;  %v4657_v16 = vpop.permute.xlu0 %4656 }
 0x73a   : > { %7241 = vmatpush3.msra.mxu0 %v4657_v16 }
 0x73b   : > { %v4911_v41 = vpop.permute.xlu1 %4910  ;;  %7243 = vmatmul.mubr.msk.f32.vlgmr.msra.gmra.mxu0 %vm4431_vm7, %v6034_v12  ;;  %7348 = vmatprep.subr.mxu0 %v10086_v0 }
 0x73c   : > { %7288 = vmatpush3.msra.mxu1 %v4911_v41  ;;  %7245 = vmatprep.mubr.msk.f32.mxu0 %vm7542_vm3, %v10086_v0  ;;  %v6103_v41 = vld [vmem:[%s9931_s13 + $0x1b0] sm:$0xff] }
 0x73d   : > { %v4907_v2 = vpop.permute.xlu0 %4906  ;;  %7289 = vmatprep.subr.mxu1 %v10086_v0 }
 0x73f   : > { %v5151_v14 = vpop.permute.xlu1 %5150  ;;  %7246 = vmatmul.mubr.msk.f32.gmra.mxu0 %vm4431_vm7, %v6035_v60 }
 0x740   : > { %7349 = vmatpush3.msra.mxu0 %v5151_v14  ;;  %7248 = vmatprep.mubr.msk.f32.mxu0 %vm7542_vm3, %v10086_v0  ;;  %v6104_v14 = vld [vmem:[%s9931_s13 + $0x1b8] sm:$0xff] }
 0x741   : > { %v4905_v34 = vpop.permute.xlu0 %4904  ;;  %7350 = vmatprep.subr.mxu0 %v10086_v0 }
 0x743   : > { %v5147_v56 = vpop.permute.xlu1 %5146  ;;  %7249 = vmatmul.mubr.msk.f32.gmra.mxu0 %vm4431_vm7, %v6036_v35 }
 0x744   : > { %7251 = vmatprep.mubr.msk.f32.mxu0 %vm7542_vm3, %v10086_v0 }
 0x745   : > { %v4903_v8 = vpop.permute.xlu0 %4902 }
 0x747   : > { %v5145_v47 = vpop.permute.xlu1 %5144  ;;  %7252 = vmatmul.mubr.msk.f32.gmra.mxu0 %vm4431_vm7, %v6037_v28 }
 0x748   : > { %7254 = vmatprep.mubr.msk.f32.mxu0 %vm7542_vm3, %v10086_v0 }
 0x749   : > { %v4909_v45 = vpop.permute.xlu0 %4908 }
 0x74a   : > { %7290 = vmatpush3.msra.mxu1 %v4909_v45 }
 0x74b   : > { %v5149_v32 = vpop.permute.xlu1 %5148  ;;  %7255 = vmatmul.mubr.msk.f32.gmra.mxu0 %vm4431_vm7, %v6038_v38  ;;  %7291 = vmatprep.subr.mxu1 %v10086_v0 }
 0x74c   : > { %7292 = vmatpush3.msra.mxu1 %v4907_v2  ;;  %7351 = vmatpush3.msra.mxu0 %v5149_v32  ;;  %v6107_v32 = vld [vmem:[%s9931_s13 + $0x1d0] sm:$0xff] }
 0x74d   : > { %7352 = vmatprep.subr.mxu0 %v10086_v0  ;;  %v4901_v10 = vpop.permute.xlu0 %4900  ;;  %7293 = vmatprep.subr.mxu1 %v10086_v0 }
 0x74e   : > { %7257 = vmatprep.mubr.msk.f32.mxu0 %vm7542_vm3, %v10086_v0  ;;  %7294 = vmatpush3.msra.mxu1 %v4905_v34 }
 0x74f   : > { %7353 = vmatpush3.msra.mxu0 %v5147_v56  ;;  %v5143_v51 = vpop.permute.xlu1 %5142  ;;  %7295 = vmatprep.subr.mxu1 %v10086_v0  ;;  %v6105_v56 = vld [vmem:[%s9931_s13 + $0x1c0] sm:$0xff] }
 0x750   : > { %7258 = vmatmul.mubr.msk.f32.gmra.mxu0 %vm4431_vm7, %v6039_v22  ;;  %7354 = vmatprep.subr.mxu0 %v10086_v0 }
 0x751   : > { %7296 = vmatpush3.msra.mxu1 %v4903_v8  ;;  %7355 = vmatpush3.msra.mxu0 %v5145_v47  ;;  %v4899_v15 = vpop.permute.xlu0 %4898  ;;  %v6106_v47 = vld [vmem:[%s9931_s13 + $0x1c8] sm:$0xff] }
 0x752   : > { %7356 = vmatprep.subr.mxu0 %v10086_v0  ;;  %7297 = vmatprep.subr.mxu1 %v10086_v0 }
 0x753   : > { %7260 = vmatprep.mubr.msk.f32.mxu0 %vm7542_vm3, %v10086_v0  ;;  %7298 = vmatpush3.msra.mxu1 %v4901_v10  ;;  %v5141_v49 = vpop.permute.xlu1 %5140 }
 0x754   : > { %7357 = vmatpush3.msra.mxu0 %v5143_v51  ;;  %7299 = vmatprep.subr.mxu1 %v10086_v0  ;;  %v6108_v51 = vld [vmem:[%s9931_s13 + $0x1d8] sm:$0xff] }
 0x755   : > { %7261 = vmatmul.mubr.msk.f32.gmra.mxu0 %vm4431_vm7, %v6040_v3  ;;  %7358 = vmatprep.subr.mxu0 %v10086_v0  ;;  %v4897_v40 = vpop.permute.xlu0 %4896 }
 0x756   : > { %7300 = vmatpush3.msra.mxu1 %v4899_v15  ;;  %7359 = vmatpush3.msra.mxu0 %v5141_v49 }
 0x757   : > { %7301 = vmatprep.subr.mxu1 %v10086_v0  ;;  %7263 = vmatprep.mubr.msk.f32.mxu0 %vm7542_vm3, %v10086_v0  ;;  %v5139_v27 = vpop.permute.xlu1 %5138 }
 0x758   : > { %7302 = vmatpush3.msra.mxu1 %v4897_v40  ;;  %7360 = vmatprep.subr.mxu0 %v10086_v0 }
 0x759   : > { %7264 = vmatmul.mubr.msk.f32.gmra.mxu0 %vm4431_vm7, %v6041_v29  ;;  %7304 = vmatmul.mubr.msk.f32.vlgmr.msra.gmra.mxu1 %vm4431_vm7, %v6064_v50  ;;  %v5137_v53 = vpop.permute.xlu0 %5136 }
 0x75a   : > { %7361 = vmatpush3.msra.mxu0 %v5139_v27  ;;  %7266 = vmatprep.mubr.msk.f32.mxu0 %vm7542_vm3, %v10086_v0 }
 0x75b   : > { %7362 = vmatprep.subr.mxu0 %v10086_v0  ;;  %7306 = vmatprep.mubr.msk.f32.mxu1 %vm7542_vm3, %v10086_v0 }
 0x75c   : > { %7363 = vmatpush3.msra.mxu0 %v5137_v53  ;;  %7409 = vmatprep.subr.mxu1 %v10086_v0 }
 0x75d   : > { %7267 = vmatmul.mubr.msk.f32.gmra.mxu0 %vm4431_vm7, %v6042_v44  ;;  %7307 = vmatmul.mubr.msk.f32.gmra.mxu1 %vm4431_vm7, %v6065_v24 }
 0x75e   : > { %7269 = vmatprep.mubr.msk.f32.mxu0 %vm7542_vm3, %v10086_v0  ;;  %7309 = vmatprep.mubr.msk.f32.mxu1 %vm7542_vm3, %v10086_v0 }
 0x761   : > { %7270 = vmatmul.mubr.msk.f32.gmra.mxu0 %vm4431_vm7, %v6043_v52  ;;  %7310 = vmatmul.mubr.msk.f32.gmra.mxu1 %vm4431_vm7, %v6066_v21  ;;  %v4401_v21 = vld [vmem:[%s9932_s14] sm:$0xff] }
 0x762   : > { %7272 = vmatprep.mubr.msk.f32.mxu0 %vm7542_vm3, %v10086_v0  ;;  %7312 = vmatprep.mubr.msk.f32.mxu1 %vm7542_vm3, %v10086_v0 }
 0x765   : > { %7273 = vmatmul.mubr.msk.f32.gmra.mxu0 %vm4431_vm7, %v6044_v39  ;;  %7313 = vmatmul.mubr.msk.f32.gmra.mxu1 %vm4431_vm7, %v6067_v57  ;;  %v4402_v57 = vld [vmem:[%s9932_s14 + $0x8] sm:$0xff] }
 0x766   : > { %7275 = vmatprep.mubr.msk.f32.mxu0 %vm7542_vm3, %v10086_v0  ;;  %7315 = vmatprep.mubr.msk.f32.mxu1 %vm7542_vm3, %v10086_v0 }
 0x769   : > { %7276 = vmatmul.mubr.msk.f32.gmra.mxu0 %vm4431_vm7, %v6045_v11  ;;  %7316 = vmatmul.mubr.msk.f32.gmra.mxu1 %vm4431_vm7, %v6068_v1 }
 0x76a   : > { %7278 = vmatprep.mubr.msk.f32.mxu0 %vm7542_vm3, %v10086_v0  ;;  %7318 = vmatprep.mubr.msk.f32.mxu1 %vm7542_vm3, %v10086_v0 }
 0x76d   : > { %7279 = vmatmul.mubr.msk.f32.gmra.mxu0 %vm4431_vm7, %v6046_v36  ;;  %7319 = vmatmul.mubr.msk.f32.gmra.mxu1 %vm4431_vm7, %v6069_v19  ;;  %v4403_v19 = vld [vmem:[%s9932_s14 + $0x10] sm:$0xff] }
 0x76e   : > { %7281 = vmatprep.mubr.msk.f32.mxu0 %vm7542_vm3, %v10086_v0  ;;  %7321 = vmatprep.mubr.msk.f32.mxu1 %vm7542_vm3, %v10086_v0 }
 0x771   : > { %7282 = vmatmul.mubr.msk.f32.gmra.mxu0 %vm4431_vm7, %v6047_v63  ;;  %7322 = vmatmul.mubr.msk.f32.gmra.mxu1 %vm4431_vm7, %v6070_v30 }
 0x772   : > { %7284 = vmatprep.mubr.msk.f32.mxu0 %vm7542_vm3, %v10086_v0  ;;  %7324 = vmatprep.mubr.msk.f32.mxu1 %vm7542_vm3, %v10086_v0 }
 0x775   : > { %7285 = vmatmul.mubr.msk.f32.gmra.mxu0 %vm4431_vm7, %v6048_v42  ;;  %7325 = vmatmul.mubr.msk.f32.gmra.mxu1 %vm4431_vm7, %v6071_v59 }
 0x776   : > { %7327 = vmatprep.mubr.msk.f32.mxu1 %vm7542_vm3, %v10086_v0  ;;  %7364 = vmatprep.mubr.msk.f32.mxu0 %vm7542_vm3, %v10086_v0 }
 0x779   : > { %7328 = vmatmul.mubr.msk.f32.gmra.mxu1 %vm4431_vm7, %v6072_v46  ;;  %7365 = vmatmul.mubr.msk.f32.vlgmr.msra.gmra.mxu0 %vm4431_vm7, %v6094_v7  ;;  %v4404_v46 = vld [vmem:[%s9932_s14 + $0x18] sm:$0xff] }
 0x77a   : > { %7330 = vmatprep.mubr.msk.f32.mxu1 %vm7542_vm3, %v10086_v0  ;;  %7367 = vmatprep.mubr.msk.f32.mxu0 %vm7542_vm3, %v10086_v0 }
 0x77d   : > { %7331 = vmatmul.mubr.msk.f32.gmra.mxu1 %vm4431_vm7, %v6073_v58  ;;  %7368 = vmatmul.mubr.msk.f32.gmra.mxu0 %vm4431_vm7, %v6095_v31 }
 0x77e   : > { %7333 = vmatprep.mubr.msk.f32.mxu1 %vm7542_vm3, %v10086_v0  ;;  %7370 = vmatprep.mubr.msk.f32.mxu0 %vm7542_vm3, %v10086_v0 }
 0x781   : > { %7334 = vmatmul.mubr.msk.f32.gmra.mxu1 %vm4431_vm7, %v6074_v54  ;;  %7371 = vmatmul.mubr.msk.f32.gmra.mxu0 %vm4431_vm7, %v6096_v26  ;;  %v4405_v26 = vld [vmem:[%s9932_s14 + $0x20] sm:$0xff] }
 0x782   : > { %7336 = vmatprep.mubr.msk.f32.mxu1 %vm7542_vm3, %v10086_v0  ;;  %7373 = vmatprep.mubr.msk.f32.mxu0 %vm7542_vm3, %v10086_v0 }
 0x785   : > { %7337 = vmatmul.mubr.msk.f32.gmra.mxu1 %vm4431_vm7, %v6075_v61  ;;  %7374 = vmatmul.mubr.msk.f32.gmra.mxu0 %vm4431_vm7, %v6097_v25 }
 0x786   : > { %7339 = vmatprep.mubr.msk.f32.mxu1 %vm7542_vm3, %v10086_v0  ;;  %7376 = vmatprep.mubr.msk.f32.mxu0 %vm7542_vm3, %v10086_v0 }
 0x788   : > { %v9591_v37 = vpop.f32.mrf.mxu1 }
 0x789   : > { %7340 = vmatmul.mubr.msk.f32.gmra.mxu1 %vm4431_vm7, %v6076_v33  ;;  %7377 = vmatmul.mubr.msk.f32.gmra.mxu0 %vm4431_vm7, %v6098_v5  ;;  %v4617_v39 = vadd.f32 %v9591_v37, %v4401_v21 }
 0x78a   : > { %7342 = vmatprep.mubr.msk.f32.mxu1 %vm7542_vm3, %v10086_v0  ;;  %7379 = vmatprep.mubr.msk.f32.mxu0 %vm7542_vm3, %v10086_v0  ;;  %v7183_v48 = vpop.f32.mrf.mxu1 }
 0x78c   : > { %v9605_v23 = vpop.f32.mrf.mxu1 }
 0x78d   : > { %7343 = vmatmul.mubr.msk.f32.gmra.mxu1 %vm4431_vm7, %v6077_v43  ;;  %7380 = vmatmul.mubr.msk.f32.gmra.mxu0 %vm4431_vm7, %v6099_v6  ;;  %v4618_v1 = vadd.f32 %v9605_v23, %v4402_v57  ;;  %v4406_v43 = vld [vmem:[%s9932_s14 + $0x28] sm:$0xff]  ;;  %v4412_v57 = vld [vmem:[%s9932_s14 + $0x58] sm:$0xff] }
 0x78e   : > { %7345 = vmatprep.mubr.msk.f32.mxu1 %vm7542_vm3, %v10086_v0  ;;  %7382 = vmatprep.mubr.msk.f32.mxu0 %vm7542_vm3, %v10086_v0  ;;  %v7186_v20 = vpop.f32.mrf.mxu1 }
 0x790   : > { %v4553_v13 = vpop.f32.mrf.mxu1 }
 0x791   : > { %7346 = vmatmul.mubr.msk.f32.gmra.mxu1 %vm4431_vm7, %v6078_v55  ;;  %7383 = vmatmul.mubr.msk.f32.gmra.mxu0 %vm4431_vm7, %v6100_v62  ;;  %v4619_v42 = vadd.f32 %v4553_v13, %v4403_v19  ;;  %v4407_v62 = vld [vmem:[%s9932_s14 + $0x30] sm:$0xff] }
 0x792   : > { %7385 = vmatprep.mubr.msk.f32.mxu0 %vm7542_vm3, %v10086_v0  ;;  %v7189_v17 = vpop.f32.mrf.mxu1  ;;  %7439 = vmatprep.mubr.msk.f32.mxu1 %vm7542_vm3, %v10086_v0 }
 0x794   : > { %v4558_v18 = vpop.f32.mrf.mxu1 }
 0x795   : > { %7386 = vmatmul.mubr.msk.f32.gmra.mxu0 %vm4431_vm7, %v6101_v9  ;;  %v4620_v31 = vadd.f32 %v4558_v18, %v4404_v46  ;;  %v4408_v18 = vld [vmem:[%s9932_s14 + $0x38] sm:$0xff] }
 0x796   : > { %7388 = vmatprep.mubr.msk.f32.mxu0 %vm7542_vm3, %v10086_v0  ;;  %v7192_v12 = vpop.f32.mrf.mxu1 }
 0x798   : > { %v4563_v16 = vpop.f32.mrf.mxu1 }
 0x799   : > { %7389 = vmatmul.mubr.msk.f32.gmra.mxu0 %vm4431_vm7, %v6102_v4  ;;  %v4621_v33 = vadd.f32 %v4563_v16, %v4405_v26 }
 0x79a   : > { %7391 = vmatprep.mubr.msk.f32.mxu0 %vm7542_vm3, %v10086_v0  ;;  %v7195_v60 = vpop.f32.mrf.mxu1 }
 0x79c   : > { %v4568_v2 = vpop.f32.mrf.mxu1 }
 0x79d   : > { %7392 = vmatmul.mubr.msk.f32.gmra.mxu0 %vm4431_vm7, %v6103_v41  ;;  %v4622_v23 = vadd.f32 %v4568_v2, %v4406_v43  ;;  %v4409_v41 = vld [vmem:[%s9932_s14 + $0x40] sm:$0xff] }
 0x79e   : > { %7394 = vmatprep.mubr.msk.f32.mxu0 %vm7542_vm3, %v10086_v0  ;;  %v7198_v35 = vpop.f32.mrf.mxu1 }
 0x7a0   : > { %v4573_v34 = vpop.f32.mrf.mxu1 }
 0x7a1   : > { %7395 = vmatmul.mubr.msk.f32.gmra.mxu0 %vm4431_vm7, %v6104_v14  ;;  %v4623_v9 = vadd.f32 %v4573_v34, %v4407_v62  ;;  %v4410_v34 = vld [vmem:[%s9932_s14 + $0x48] sm:$0xff] }
 0x7a2   : > { %7397 = vmatprep.mubr.msk.f32.mxu0 %vm7542_vm3, %v10086_v0  ;;  %v7201_v28 = vpop.f32.mrf.mxu1 }
 0x7a4   : > { %v4578_v8 = vpop.f32.mrf.mxu1 }
 0x7a5   : > { %7398 = vmatmul.mubr.msk.f32.gmra.mxu0 %vm4431_vm7, %v6105_v56  ;;  %v4624_v12 = vadd.f32 %v4578_v8, %v4408_v18 }
 0x7a6   : > { %7400 = vmatprep.mubr.msk.f32.mxu0 %vm7542_vm3, %v10086_v0  ;;  %v7204_v38 = vpop.f32.mrf.mxu1 }
 0x7a8   : > { %v4583_v45 = vpop.f32.mrf.mxu1 }
 0x7a9   : > { %7401 = vmatmul.mubr.msk.f32.gmra.mxu0 %vm4431_vm7, %v6106_v47  ;;  %v4625_v35 = vadd.f32 %v4583_v45, %v4409_v41 }
 0x7aa   : > { %7403 = vmatprep.mubr.msk.f32.mxu0 %vm7542_vm3, %v10086_v0  ;;  %v7207_v10 = vpop.f32.mrf.mxu1 }
 0x7ac   : > { %v9664_v22 = vpop.f32.mrf.mxu1 }
 0x7ad   : > { %7404 = vmatmul.mubr.msk.f32.gmra.mxu0 %vm4431_vm7, %v6107_v32  ;;  %v4626_v8 = vadd.f32 %v9664_v22, %v4410_v34 }
 0x7ae   : > { %7406 = vmatprep.mubr.msk.f32.mxu0 %vm7542_vm3, %v10086_v0  ;;  %v7210_v15 = vpop.f32.mrf.mxu1 }
 0x7b0   : > { %v9672_v3 = vpop.f32.mrf.mxu1 }
 0x7b1   : > { %7407 = vmatmul.mubr.msk.f32.gmra.mxu0 %vm4431_vm7, %v6108_v51 }
 0x7b2   : > { %v7213_v49 = vpop.f32.mrf.mxu1 }
 0x7b3   : > { %v4411_v49 = vld [vmem:[%s9932_s14 + $0x50] sm:$0xff] }
 0x7b4   : > { %v9675_v40 = vpop.f32.mrf.mxu1 }
 0x7b5   : > { %v4628_v19 = vadd.f32 %v9675_v40, %v4412_v57 }
 0x7b6   : > { %v7216_v29 = vpop.f32.mrf.mxu1 }
 0x7b8   : > { %v9677_v50 = vpop.f32.mrf.mxu1 }
 0x7ba   : > { %v7219_v27 = vpop.f32.mrf.mxu1 }
 0x7bc   : > { %v9679_v53 = vpop.f32.mrf.mxu1 }
 0x7be   : > { %v7222_v44 = vpop.f32.mrf.mxu1 }
 0x7c0   : > { %v9681_v24 = vpop.f32.mrf.mxu1 }
 0x7c2   : > { %v7225_v52 = vpop.f32.mrf.mxu1 }
 0x7c3   : > { %v4627_v52 = vadd.f32 %v9672_v3, %v4411_v49  ;;  %v4413_v3 = vld [vmem:[%s9932_s14 + $0x60] sm:$0xff] }
 0x7fb   : > { %v4791_v11 = vpop.f32.mrf.mxu0 }
 0x7fc   : > { %v4865_v36 = vadd.f32 %v4791_v11, %v4617_v39 }
 0x7fd   : > { %v7244_v63 = vpop.f32.mrf.mxu0 }
 0x7ff   : > { %v4796_v30 = vpop.f32.mrf.mxu0 }
 0x800   : > { %v4866_v59 = vadd.f32 %v4796_v30, %v4618_v1 }
 0x801   : > { %v7247_v7 = vpop.f32.mrf.mxu0 }
 0x803   : > { %v4801_v58 = vpop.f32.mrf.mxu0 }
 0x804   : > { %v4867_v54 = vadd.f32 %v4801_v58, %v4619_v42  ;;  %v4629_v58 = vadd.f32 %v9677_v50, %v4413_v3 }
 0x805   : > { %v7250_v61 = vpop.f32.mrf.mxu0 }
 0x807   : > { %v4806_v25 = vpop.f32.mrf.mxu0 }
 0x808   : > { %v4868_v5 = vadd.f32 %v4806_v25, %v4620_v31 }
 0x809   : > { %v7253_v37 = vpop.f32.mrf.mxu0 }
 0x80b   : > { %v4811_v6 = vpop.f32.mrf.mxu0 }
 0x80c   : > { %v4869_v48 = vadd.f32 %v4811_v6, %v4621_v33 }
 0x80d   : > { %v7256_v55 = vpop.f32.mrf.mxu0 }
 0x810   : > { %v4816_v20 = vpop.f32.mrf.mxu0 }
 0x811   : > { %v4870_v13 = vadd.f32 %v4816_v20, %v4622_v23 }
 0x812   : > { %v7259_v17 = vpop.f32.mrf.mxu0 }
 0x815   : > { %v4821_v4 = vpop.f32.mrf.mxu0 }
 0x816   : > { %v4871_v16 = vadd.f32 %v4821_v4, %v4623_v9 }
 0x817   : > { %v7262_v60 = vpop.f32.mrf.mxu0 }
 0x819   : > { %v4826_v2 = vpop.f32.mrf.mxu0  ;;  %v5031_v14 = vpop.f32.mrf.mxu1 }
 0x81a   : > { %v4872_v56 = vadd.f32 %v4826_v2, %v4624_v12  ;;  %v5105_v28 = vadd.f32 %v5031_v14, %v4865_v36 }
 0x81b   : > { %v7265_v47 = vpop.f32.mrf.mxu0  ;;  %v7305_v38 = vpop.f32.mrf.mxu1 }
 0x81d   : > { %v4831_v32 = vpop.f32.mrf.mxu0  ;;  %v5036_v10 = vpop.f32.mrf.mxu1 }
 0x81e   : > { %v4873_v51 = vadd.f32 %v4831_v32, %v4625_v35  ;;  %v5106_v15 = vadd.f32 %v5036_v10, %v4866_v59 }
 0x81f   : > { %v7268_v29 = vpop.f32.mrf.mxu0  ;;  %v7308_v45 = vpop.f32.mrf.mxu1 }
 0x821   : > { %v4836_v27 = vpop.f32.mrf.mxu0  ;;  %v5041_v44 = vpop.f32.mrf.mxu1 }
 0x822   : > { %v9720_v21 = vadd.f32 %v4836_v27, %v4626_v8  ;;  %v5107_v39 = vadd.f32 %v5041_v44, %v4867_v54 }
 0x823   : > { %v7271_v22 = vpop.f32.mrf.mxu0  ;;  %v7311_v11 = vpop.f32.mrf.mxu1 }
 0x825   : > { %v4841_v1 = vpop.f32.mrf.mxu0  ;;  %v5046_v36 = vpop.f32.mrf.mxu1 }
 0x826   : > { %v9726_v63 = vadd.f32 %v4841_v1, %v4627_v52  ;;  %v5108_v30 = vadd.f32 %v5046_v36, %v4868_v5 }
 0x827   : > { %v7274_v42 = vpop.f32.mrf.mxu0  ;;  %v7314_v59 = vpop.f32.mrf.mxu1 }
 0x829   : > { %v4846_v46 = vpop.f32.mrf.mxu0  ;;  %v5051_v7 = vpop.f32.mrf.mxu1 }
 0x82a   : > { %v9732_v31 = vadd.f32 %v4846_v46, %v4628_v19  ;;  %v9734_v54 = vadd.f32 %v5051_v7, %v4869_v48 }
 0x82b   : > { %v7277_v26 = vpop.f32.mrf.mxu0  ;;  %v7317_v61 = vpop.f32.mrf.mxu1 }
 0x82d   : > { %v4851_v40 = vpop.f32.mrf.mxu0  ;;  %v5056_v25 = vpop.f32.mrf.mxu1 }
 0x82e   : > { %v9736_v33 = vadd.f32 %v4851_v40, %v4629_v58  ;;  %v9738_v5 = vadd.f32 %v5056_v25, %v4870_v13  ;;  %v4414_v25 = vld [vmem:[%s9932_s14 + $0x68] sm:$0xff] }
 0x82f   : > { %v7280_v37 = vpop.f32.mrf.mxu0  ;;  %v7320_v43 = vpop.f32.mrf.mxu1 }
 0x830   : > { %v4415_v37 = vld [vmem:[%s9932_s14 + $0x70] sm:$0xff] }
 0x831   : > { %v4856_v6 = vpop.f32.mrf.mxu0  ;;  %v5061_v23 = vpop.f32.mrf.mxu1 }
 0x832   : > { %v9740_v55 = vadd.f32 %v5061_v23, %v4871_v16 }
 0x833   : > { %v7283_v62 = vpop.f32.mrf.mxu0  ;;  %v7323_v50 = vpop.f32.mrf.mxu1 }
 0x834   : > { %v4630_v62 = vadd.f32 %v9679_v53, %v4414_v25  ;;  %v4631_v50 = vadd.f32 %v9681_v24, %v4415_v37 }
 0x835   : > { %v4861_v20 = vpop.f32.mrf.mxu0  ;;  %v5066_v9 = vpop.f32.mrf.mxu1 }
 0x836   : > { %v9742_v48 = vadd.f32 %v5066_v9, %v4872_v56 }
 0x837   : > { %v7286_v17 = vpop.f32.mrf.mxu0  ;;  %v7326_v18 = vpop.f32.mrf.mxu1 }
 0x838   : > { %v4878_v18 = vadd.f32 %v4856_v6, %v4630_v62 }
 0x839   : > { %v5071_v4 = vpop.f32.mrf.mxu1  ;;  %v5271_v12 = vpop.f32.mrf.mxu0 }
 0x83a   : > { %v9744_v41 = vadd.f32 %v5071_v4, %v4873_v51  ;;  %v9746_v13 = vadd.f32 %v5271_v12, %v5105_v28  ;;  %v4879_v4 = vadd.f32 %v4861_v20, %v4631_v50 }
 0x83b   : > { %v7329_v60 = vpop.f32.mrf.mxu1  ;;  %v7366_v2 = vpop.f32.mrf.mxu0 }
 0x83d   : > { %v5076_v14 = vpop.f32.mrf.mxu1  ;;  %v5276_v35 = vpop.f32.mrf.mxu0 }
 0x83e   : > { %v9748_v16 = vadd.f32 %v5276_v35, %v5106_v15  ;;  %v5114_v6 = vadd.f32 %v5076_v14, %v9720_v21 }
 0x83f   : > { %v7332_v34 = vpop.f32.mrf.mxu1  ;;  %v7369_v47 = vpop.f32.mrf.mxu0 }
 0x841   : > { %v5081_v38 = vpop.f32.mrf.mxu1  ;;  %v5281_v32 = vpop.f32.mrf.mxu0 }
 0x842   : > { %v9750_v56 = vadd.f32 %v5281_v32, %v5107_v39  ;;  %v5115_v53 = vadd.f32 %v5081_v38, %v9726_v63 }
 0x843   : > { %v7335_v10 = vpop.f32.mrf.mxu1  ;;  %v7372_v8 = vpop.f32.mrf.mxu0 }
 0x845   : > { %v5086_v49 = vpop.f32.mrf.mxu1  ;;  %v5286_v29 = vpop.f32.mrf.mxu0 }
 0x846   : > { %v9752_v51 = vadd.f32 %v5286_v29, %v5108_v30  ;;  %v5116_v8 = vadd.f32 %v5086_v49, %v9732_v31 }
 0x847   : > { %v7338_v28 = vpop.f32.mrf.mxu1  ;;  %v7375_v45 = vpop.f32.mrf.mxu0 }
 0x849   : > { %v5091_v27 = vpop.f32.mrf.mxu1  ;;  %v9754_v44 = vpop.f32.mrf.mxu0 }
 0x84a   : > { %v5117_v34 = vadd.f32 %v5091_v27, %v9736_v33 }
 0x84b   : > { %v7341_v52 = vpop.f32.mrf.mxu1  ;;  %v7378_v15 = vpop.f32.mrf.mxu0 }
 0x84d   : > { %v5096_v57 = vpop.f32.mrf.mxu1  ;;  %v9756_v22 = vpop.f32.mrf.mxu0 }
 0x84e   : > { %v5118_v60 = vadd.f32 %v5096_v57, %v4878_v18  ;;  %v5350_v15 = vadd.f32 %v9756_v22, %v9738_v5  ;;  %v5363_v5 = vmax.f32 %v9752_v51, 0.0  ;;  %v5362_v22 = vmax.f32 %v9750_v56, 0.0  ;;  %v5375_v51 = vld [vmem:[%s9933_s15] sm:$0xff]  ;;  %v5378_v56 = vld [vmem:[%s9933_s15 + $0x18] sm:$0xff] }
 0x84f   : > { %v7344_v11 = vpop.f32.mrf.mxu1  ;;  %v7381_v1 = vpop.f32.mrf.mxu0 }
 0x850   : > { %v5365_v11 = vmax.f32 %v5350_v15, 0.0  ;;  %v5379_v1 = vld [vmem:[%s9933_s15 + $0x20] sm:$0xff]  ;;  %v5388_v15 = vld [vmem:[%s9934_s16 + $0x10] sm:$0xff] }
 0x851   : > { %v5101_v39 = vpop.f32.mrf.mxu1  ;;  %v5301_v36 = vpop.f32.mrf.mxu0 }
 0x852   : > { %v5119_v2 = vadd.f32 %v5101_v39, %v4879_v4  ;;  %v5351_v21 = vadd.f32 %v5301_v36, %v9740_v55  ;;  %v5380_v39 = vld [vmem:[%s9933_s15 + $0x28] sm:$0xff]  ;;  %v5381_v36 = vld [vmem:[%s9933_s15 + $0x30] sm:$0xff] }
 0x853   : > { %v7384_v19 = vpop.f32.mrf.mxu0  ;;  %v7347_v3 = vpop.f32.mrf.mxu1 }
 0x854   : > { %v5366_v57 = vmax.f32 %v5351_v21, 0.0  ;;  %v5382_v19 = vld [vmem:[%s9933_s15 + $0x38] sm:$0xff]  ;;  %v5383_v3 = vld [vmem:[%s9933_s15 + $0x40] sm:$0xff] }
 0x855   : > { %v5306_v42 = vpop.f32.mrf.mxu0 }
 0x856   : > { %v5352_v38 = vadd.f32 %v5306_v42, %v9742_v48  ;;  %v5349_v48 = vadd.f32 %v9754_v44, %v9734_v54  ;;  %v5361_v54 = vmax.f32 %v9748_v16, 0.0  ;;  %v5360_v44 = vmax.f32 %v9746_v13, 0.0  ;;  %v5376_v16 = vld [vmem:[%s9933_s15 + $0x8] sm:$0xff]  ;;  %v5377_v13 = vld [vmem:[%s9933_s15 + $0x10] sm:$0xff] }
 0x857   : > { %v7387_v59 = vpop.f32.mrf.mxu0  ;;  %v5384_v42 = vld [vmem:[%s9933_s15 + $0x48] sm:$0xff] }
 0x858   : > { %v5364_v55 = vmax.f32 %v5349_v48, 0.0  ;;  %v5385_v59 = vld [vmem:[%s9933_s15 + $0x50] sm:$0xf] }
 0x859   : > { %v5311_v30 = vpop.f32.mrf.mxu0 }
 0x85a   : > { %v5353_v31 = vadd.f32 %v5311_v30, %v9744_v41  ;;  %v5367_v41 = vmax.f32 %v5352_v38, 0.0  ;;  %v5562_v30 = vld [vmem:[%s9935_s17] sm:$0xff] }
 0x85b   : > { %v7390_v46 = vpop.f32.mrf.mxu0  ;;  %7494 = vmatprep.mubr.msk.f32.mxu0 %vm5566_vm9, %v5562_v30 }
 0x85c   : > { %v5368_v14 = vmax.f32 %v5353_v31, 0.0  ;;  %v5390_v31 = vld [vmem:[%s9934_s16 + $0x20] sm:$0xff] }
 0x85d   : > { %v5316_v7 = vpop.f32.mrf.mxu0 }
 0x85e   : > { %v5354_v33 = vadd.f32 %v5316_v7, %v5114_v6 }
 0x85f   : > { %v7393_v58 = vpop.f32.mrf.mxu0 }
 0x860   : > { %v5369_v49 = vmax.f32 %v5354_v33, 0.0 }
 0x861   : > { %v5321_v26 = vpop.f32.mrf.mxu0 }
 0x862   : > { %v5355_v20 = vadd.f32 %v5321_v26, %v5115_v53 }
 0x863   : > { %v7396_v61 = vpop.f32.mrf.mxu0 }
 0x864   : > { %v5370_v63 = vmax.f32 %v5355_v20, 0.0 }
 0x865   : > { %v5326_v40 = vpop.f32.mrf.mxu0 }
 0x866   : > { %v5356_v24 = vadd.f32 %v5326_v40, %v5116_v8 }
 0x867   : > { %v7399_v43 = vpop.f32.mrf.mxu0 }
 0x868   : > { %v5371_v27 = vmax.f32 %v5356_v24, 0.0 }
 0x869   : > { %v5331_v23 = vpop.f32.mrf.mxu0 }
 0x86a   : > { %v5357_v29 = vadd.f32 %v5331_v23, %v5117_v34  ;;  %v5396_v34 = vld [vmem:[%s9934_s16 + $0x50] sm:$0xf] }
 0x86b   : > { %v7402_v9 = vpop.f32.mrf.mxu0 }
 0x86c   : > { %v5372_v52 = vmax.f32 %v5357_v29, 0.0  ;;  %v5393_v29 = vld [vmem:[%s9934_s16 + $0x38] sm:$0xff] }
 0x86d   : > { %v5336_v17 = vpop.f32.mrf.mxu0 }
 0x86e   : > { %v5358_v47 = vadd.f32 %v5336_v17, %v5118_v60 }
 0x86f   : > { %v7405_v12 = vpop.f32.mrf.mxu0 }
 0x870   : > { %v5373_v45 = vmax.f32 %v5358_v47, 0.0  ;;  %v5394_v47 = vld [vmem:[%s9934_s16 + $0x40] sm:$0xff] }
 0x871   : > { %v5341_v35 = vpop.f32.mrf.mxu0 }
 0x872   : > { %v5359_v32 = vadd.f32 %v5341_v35, %v5119_v2  ;;  %v5395_v2 = vld [vmem:[%s9934_s16 + $0x48] sm:$0xff] }
 0x873   : > { %v7408_v10 = vpop.f32.mrf.mxu0 }
 0x874   : > { %v5374_v28 = vmax.f32 %v5359_v32, 0.0 }
 0x876   : > { %7410 = vmatpush3.msra.mxu1 %v5374_v28 }
 0x877   : > { %7411 = vmatprep.subr.mxu1 %v10086_v0 }
 0x878   : > { %7412 = vmatpush3.msra.mxu1 %v5373_v45  ;;  %v5392_v45 = vld [vmem:[%s9934_s16 + $0x30] sm:$0xff] }
 0x879   : > { %7413 = vmatprep.subr.mxu1 %v10086_v0 }
 0x87a   : > { %7414 = vmatpush3.msra.mxu1 %v5372_v52  ;;  %v5391_v52 = vld [vmem:[%s9934_s16 + $0x28] sm:$0xff] }
 0x87b   : > { %7415 = vmatprep.subr.mxu1 %v10086_v0 }
 0x87c   : > { %7416 = vmatpush3.msra.mxu1 %v5371_v27 }
 0x87d   : > { %7417 = vmatprep.subr.mxu1 %v10086_v0 }
 0x87e   : > { %7418 = vmatpush3.msra.mxu1 %v5370_v63 }
 0x87f   : > { %7419 = vmatprep.subr.mxu1 %v10086_v0 }
 0x880   : > { %7420 = vmatpush3.msra.mxu1 %v5369_v49  ;;  %v5389_v49 = vld [vmem:[%s9934_s16 + $0x18] sm:$0xff] }
 0x881   : > { %7421 = vmatprep.subr.mxu1 %v10086_v0 }
 0x882   : > { %7422 = vmatpush3.msra.mxu1 %v5368_v14 }
 0x883   : > { %7423 = vmatprep.subr.mxu1 %v10086_v0 }
 0x884   : > { %7424 = vmatpush3.msra.mxu1 %v5367_v41 }
 0x885   : > { %7425 = vmatprep.subr.mxu1 %v10086_v0 }
 0x886   : > { %7426 = vmatpush3.msra.mxu1 %v5366_v57  ;;  %v5387_v57 = vld [vmem:[%s9934_s16 + $0x8] sm:$0xff] }
 0x887   : > { %7427 = vmatprep.subr.mxu1 %v10086_v0 }
 0x888   : > { %7428 = vmatpush3.msra.mxu1 %v5365_v11 }
 0x889   : > { %7429 = vmatprep.subr.mxu1 %v10086_v0 }
 0x88a   : > { %7430 = vmatpush3.msra.mxu1 %v5364_v55 }
 0x88b   : > { %7431 = vmatprep.subr.mxu1 %v10086_v0 }
 0x88c   : > { %7432 = vmatpush3.msra.mxu1 %v5363_v5  ;;  %v5386_v5 = vld [vmem:[%s9934_s16] sm:$0xff] }
 0x88d   : > { %7433 = vmatprep.subr.mxu1 %v10086_v0 }
 0x88e   : > { %7434 = vmatpush3.msra.mxu1 %v5362_v22 }
 0x88f   : > { %7435 = vmatprep.subr.mxu1 %v10086_v0 }
 0x890   : > { %7436 = vmatpush3.msra.mxu1 %v5361_v54 }
 0x891   : > { %7437 = vmatprep.subr.mxu1 %v10086_v0 }
 0x892   : > { %7438 = vmatpush3.msra.mxu1 %v5360_v44 }
 0x893   : > { %7440 = vmatmul.mubr.msk.f32.vlgmr.msra.gmra.mxu1 %vm5397_vm8, %v5375_v51 }
 0x894   : > { %7442 = vmatprep.mubr.msk.f32.mxu1 %vm7542_vm3, %v10086_v0 }
 0x897   : > { %7443 = vmatmul.mubr.msk.f32.gmra.mxu1 %vm5397_vm8, %v5376_v16 }
 0x898   : > { %7445 = vmatprep.mubr.msk.f32.mxu1 %vm7542_vm3, %v10086_v0 }
 0x89b   : > { %7446 = vmatmul.mubr.msk.f32.gmra.mxu1 %vm5397_vm8, %v5377_v13 }
 0x89c   : > { %7448 = vmatprep.mubr.msk.f32.mxu1 %vm7542_vm3, %v10086_v0 }
 0x89f   : > { %7449 = vmatmul.mubr.msk.f32.gmra.mxu1 %vm5397_vm8, %v5378_v56  ;;  %v5563_v56 = vld [vmem:[%s9935_s17 + $0x8] sm:$0x3] }
 0x8a0   : > { %7451 = vmatprep.mubr.msk.f32.mxu1 %vm7542_vm3, %v10086_v0 }
 0x8a3   : > { %7452 = vmatmul.mubr.msk.f32.gmra.mxu1 %vm5397_vm8, %v5379_v1 }
 0x8a4   : > { %7454 = vmatprep.mubr.msk.f32.mxu1 %vm7542_vm3, %v10086_v0 }
 0x8a7   : > { %7455 = vmatmul.mubr.msk.f32.gmra.mxu1 %vm5397_vm8, %v5380_v39  ;;  %v5564_v39 = vld [vmem:[%s9936_s18] sm:$0xff] }
 0x8a8   : > { %7457 = vmatprep.mubr.msk.f32.mxu1 %vm7542_vm3, %v10086_v0 }
 0x8ab   : > { %7458 = vmatmul.mubr.msk.f32.gmra.mxu1 %vm5397_vm8, %v5381_v36 }
 0x8ac   : > { %7460 = vmatprep.mubr.msk.f32.mxu1 %vm7542_vm3, %v10086_v0 }
 0x8af   : > { %7461 = vmatmul.mubr.msk.f32.gmra.mxu1 %vm5397_vm8, %v5382_v19 }
 0x8b0   : > { %7463 = vmatprep.mubr.msk.f32.mxu1 %vm7542_vm3, %v10086_v0 }
 0x8b3   : > { %7464 = vmatmul.mubr.msk.f32.gmra.mxu1 %vm5397_vm8, %v5383_v3 }
 0x8b4   : > { %7466 = vmatprep.mubr.msk.f32.mxu1 %vm7542_vm3, %v10086_v0 }
 0x8b7   : > { %7467 = vmatmul.mubr.msk.f32.gmra.mxu1 %vm5397_vm8, %v5384_v42 }
 0x8b8   : > { %7469 = vmatprep.mubr.msk.f32.mxu1 %vm7542_vm3, %v10086_v0 }
 0x8bb   : > { %7470 = vmatmul.mubr.msk.f32.gmra.mxu1 %vm5397_vm8, %v5385_v59 }
 0x953   : > { %v9863_v46 = vpop.f32.mrf.mxu1 }
 0x954   : > { %v5498_v44 = vadd.f32 %v9863_v46, %v5386_v5 }
 0x955   : > { %v7441_v7 = vpop.f32.mrf.mxu1 }
 0x956   : > { %v5551_v13 = vmax.f32 %v5498_v44, 0.0 }
 0x957   : > { %v5502_v58 = vpop.f32.mrf.mxu1 }
 0x958   : > { %v5503_v22 = vadd.f32 %v5502_v58, %v5387_v57 }
 0x959   : > { %v7444_v26 = vpop.f32.mrf.mxu1 }
 0x95a   : > { %v5552_v16 = vmax.f32 %v5503_v22, 0.0 }
 0x95b   : > { %v5507_v61 = vpop.f32.mrf.mxu1 }
 0x95c   : > { %v5508_v11 = vadd.f32 %v5507_v61, %v5388_v15 }
 0x95d   : > { %v7447_v0 = vpop.f32.mrf.mxu1 }
 0x95e   : > { %v5553_v51 = vmax.f32 %v5508_v11, 0.0  ;;  %v5678_v0 = vlaneseq }
 0x95f   : > { %v5512_v40 = vpop.f32.mrf.mxu1 }
 0x960   : > { %v5513_v41 = vadd.f32 %v5512_v40, %v5389_v49  ;;  %v5565_v40 = vld [vmem:[%s9936_s18 + $0x8] sm:$0x3] }
 0x961   : > { %v7450_v25 = vpop.f32.mrf.mxu1 }
 0x962   : > { %v5554_v54 = vmax.f32 %v5513_v41, 0.0 }
 0x963   : > { %v5517_v37 = vpop.f32.mrf.mxu1 }
 0x964   : > { %v5518_v21 = vadd.f32 %v5517_v37, %v5390_v31 }
 0x965   : > { %v7453_v43 = vpop.f32.mrf.mxu1 }
 0x966   : > { %v5555_v55 = vmax.f32 %v5518_v21, 0.0 }
 0x967   : > { %v5522_v23 = vpop.f32.mrf.mxu1 }
 0x968   : > { %v5523_v63 = vadd.f32 %v5522_v23, %v5391_v52 }
 0x969   : > { %v7456_v62 = vpop.f32.mrf.mxu1 }
 0x96a   : > { %v5556_v48 = vmax.f32 %v5523_v63, 0.0 }
 0x96b   : > { %v5527_v50 = vpop.f32.mrf.mxu1 }
 0x96c   : > { %v5528_v33 = vadd.f32 %v5527_v50, %v5392_v45  ;;  %v5679_v50 = vshrl.u32 %v5678_v0, 7 }
 0x96d   : > { %v7459_v9 = vpop.f32.mrf.mxu1 }
 0x96e   : > { %v5557_v14 = vmax.f32 %v5528_v33, 0.0 }
 0x96f   : > { %v5532_v17 = vpop.f32.mrf.mxu1 }
 0x970   : > { %v5533_v6 = vadd.f32 %v5532_v17, %v5393_v29 }
 0x971   : > { %v7462_v18 = vpop.f32.mrf.mxu1 }
 0x972   : > { %v5558_v38 = vmax.f32 %v5533_v6, 0.0 }
 0x973   : > { %v5537_v4 = vpop.f32.mrf.mxu1 }
 0x974   : > { %v5538_v53 = vadd.f32 %v5537_v4, %v5394_v47  ;;  %v5680_v4 = vsub.s32 0, %v5679_v50 }
 0x975   : > { %v7465_v12 = vpop.f32.mrf.mxu1 }
 0x976   : > { %v5559_v27 = vmax.f32 %v5538_v53, 0.0 }
 0x977   : > { %v5542_v60 = vpop.f32.mrf.mxu1 }
 0x978   : > { %v5543_v10 = vadd.f32 %v5542_v60, %v5395_v2 }
 0x979   : > { %v7468_v35 = vpop.f32.mrf.mxu1 }
 0x97a   : > { %v5560_v20 = vmax.f32 %v5543_v10, 0.0 }
 0x97b   : > { %v5547_v32 = vpop.f32.mrf.mxu1 }
 0x97c   : > { %v5548_v8 = vadd.f32 %v5547_v32, %v5396_v34 }
 0x97d   : > { %v7471_v28 = vpop.f32.mrf.mxu1 }
 0x97e   : > { %v5561_v24 = vmax.f32 %v5548_v8, 0.0 }
 0x980   : > { %7472 = vmatprep.subr.msk.mxu0 %vm698_vm1, %v5561_v24 }
 0x981   : > { %7473 = vmatpush3.msk.msra.mxu0 %vm698_vm1, %v5561_v24 }
 0x982   : > { %7474 = vmatprep.subr.mxu0 %v5560_v20 }
 0x983   : > { %7475 = vmatpush3.msra.mxu0 %v5560_v20 }
 0x984   : > { %7476 = vmatprep.subr.mxu0 %v5559_v27 }
 0x985   : > { %7477 = vmatpush3.msra.mxu0 %v5559_v27 }
 0x986   : > { %7478 = vmatprep.subr.mxu0 %v5558_v38 }
 0x987   : > { %7479 = vmatpush3.msra.mxu0 %v5558_v38 }
 0x988   : > { %7480 = vmatprep.subr.mxu0 %v5557_v14 }
 0x989   : > { %7481 = vmatpush3.msra.mxu0 %v5557_v14 }
 0x98a   : > { %7482 = vmatprep.subr.mxu0 %v5556_v48 }
 0x98b   : > { %7483 = vmatpush3.msra.mxu0 %v5556_v48 }
 0x98c   : > { %7484 = vmatprep.subr.mxu0 %v5555_v55 }
 0x98d   : > { %7485 = vmatpush3.msra.mxu0 %v5555_v55 }
 0x98e   : > { %7486 = vmatprep.subr.mxu0 %v5554_v54 }
 0x98f   : > { %7487 = vmatpush3.msra.mxu0 %v5554_v54 }
 0x990   : > { %7488 = vmatprep.subr.mxu0 %v5553_v51 }
 0x991   : > { %7489 = vmatpush3.msra.mxu0 %v5553_v51 }
 0x992   : > { %7490 = vmatprep.subr.mxu0 %v5552_v16 }
 0x993   : > { %7491 = vmatpush3.msra.mxu0 %v5552_v16 }
 0x994   : > { %7492 = vmatprep.subr.mxu0 %v5551_v13 }
 0x995   : > { %7493 = vmatpush3.msra.mxu0 %v5551_v13 }
 0x996   : > { %7495 = vmatmul.mubr.msk.f32.vlgmr.msra.gmra.mxu0 %vm5566_vm9, %v5563_v56 }
 0xa56   : > { %v7496_v1 = vpop.f32.mrf.mxu0 }
 0xa57   : > { %v5648_v43 = vadd.f32 %v7496_v1, %v5565_v40 }
 0xa58   : > { %v5642_v36 = vpop.f32.mrf.mxu0 }
 0xa59   : > { %v5643_v19 = vadd.f32 %v5642_v36, %v5564_v39  ;;  %v5675_v17 = vrot.slane %v5648_v43, 1 }
 0xa5b   : > { %v5652_v3 = vrot.slane %v5643_v19, 1  ;;  %v5655_v59 = vrot.slane %v5643_v19, 2  ;;  %v5658_v46 = vrot.slane %v5643_v19, 3  ;;  %v5661_v58 = vrot.slane %v5643_v19, 4 }
 0xa5c   : > { %v5664_v61 = vrot.slane %v5643_v19, 5  ;;  %v5667_v37 = vrot.slane %v5643_v19, 6  ;;  %v5670_v62 = vrot.slane %v5643_v19, 7 }
 0xa5d   : > { %v5654_v42 = vmax.f32 %v5643_v19, %v5652_v3 }
 0xa5f   : > { %v5657_v30 = vmax.f32 %v5654_v42, %v5655_v59 }
 0xa61   : > { %v5660_v7 = vmax.f32 %v5657_v30, %v5658_v46 }
 0xa63   : > { %v5663_v26 = vmax.f32 %v5660_v7, %v5661_v58 }
 0xa65   : > { %v5666_v25 = vmax.f32 %v5663_v26, %v5664_v61 }
 0xa67   : > { %v5669_v23 = vmax.f32 %v5666_v25, %v5667_v37 }
 0xa69   : > { %v5672_v9 = vmax.f32 %v5669_v23, %v5670_v62 }
 0xa6b   : > { %v5673_v18 = vmax.f32 %v5672_v9, %v5648_v43 }
 0xa6d   : > { %v5677_v12 = vmax.f32 %v5673_v18, %v5675_v17 }
 0xa6f   : > { %v5681_v60 = vrot.slane %v5677_v12, %v5680_v4 }
 0xa71   : > { %v5682_v2 = vsub.f32 %v5643_v19, %v5681_v60  ;;  %v5683_v34 = vsub.f32 %v5648_v43, %v5681_v60 }
 0xa73   : > { %v5684_v35 = vmul.f32 1.442695, %v5682_v2  ;;  %v5686_v47 = vmul.f32 1.442695, %v5683_v34 }
 0xa75   : > { %7522 = vpow2.f32 %v5684_v35 }
 0xa76   : > { %7524 = vpow2.f32 %v5686_v47 }
 0xa82   : > { %v7523_v32 = vpop.eup %7522 }
 0xa83   : > { %v5689_v10 = vrot.slane %v7523_v32, 1  ;;  %v5692_v29 = vrot.slane %v7523_v32, 2  ;;  %v5695_v53 = vrot.slane %v7523_v32, 3  ;;  %v5698_v45 = vrot.slane %v7523_v32, 4  ;;  %v7525_v63 = vpop.eup %7524 }
 0xa84   : > { %v5701_v20 = vrot.slane %v7523_v32, 5  ;;  %v5704_v33 = vrot.slane %v7523_v32, 6  ;;  %v5707_v31 = vrot.slane %v7523_v32, 7  ;;  %v5712_v21 = vrot.slane %v7525_v63, 1 }
 0xa85   : > { %v5691_v8 = vadd.f32 %v7523_v32, %v5689_v10 }
 0xa87   : > { %v5694_v28 = vadd.f32 %v5692_v29, %v5691_v8 }
 0xa89   : > { %v5697_v24 = vadd.f32 %v5695_v53, %v5694_v28 }
 0xa8b   : > { %v5700_v6 = vadd.f32 %v5698_v45, %v5697_v24 }
 0xa8d   : > { %v5703_v52 = vadd.f32 %v5701_v20, %v5700_v6 }
 0xa8f   : > { %v5706_v27 = vadd.f32 %v5704_v33, %v5703_v52 }
 0xa91   : > { %v5709_v38 = vadd.f32 %v5707_v31, %v5706_v27 }
 0xa93   : > { %v5710_v49 = vadd.f32 %v7525_v63, %v5709_v38 }
 0xa95   : > { %v5714_v14 = vadd.f32 %v5712_v21, %v5710_v49 }
 0xa97   : > { %7526 = vlog2.f32 %v5714_v14 }
 0xaa4   : > { %v7527_v15 = vpop.eup %7526 }
 0xaa5   : > { %v5716_v41 = vmul.f32 0.6931472, %v7527_v15 }
 0xaa7   : > { %v5717_v48 = vadd.f32 %v5716_v41, %v5677_v12 }
 0xaa9   : > { %v5721_v57 = vrot.slane %v5717_v48, %v5680_v4 }
 0xaab   : > { %v5722_v11 = vsub.f32 %v5643_v19, %v5721_v57  ;;  %v5723_v55 = vsub.f32 %v5648_v43, %v5721_v57 }
 0xaad   : > { %5725 = vst.msk [vmem:[%s602_s27] sm:$0xff] %vm5724_vm10, %v5722_v11 }
 0xaae   : > { %5727 = vst.msk [vmem:[%s602_s27 + $0x8] sm:$0x3] %vm5726_vm11, %v5723_v55 }
 0xaaf PF: > { %s29_s0 = sadd.s32 1, %s7534_s0  }
 0xab0   : > { %p26_p4 = scmp.ge.s32.totalorder %s29_s0, 4  }
 0xab2   :  { %28 = sbr.rel (!%p26_p4) target bundleno = 7 (0x7), region = 129 }

</bundles_post_ra>
